<compile_context>
chip_gen: v5e
topology: v5e:2x2
jax: 0.10.0
libtpu: 0.0.40
codegen_flags: <defaults>
</compile_context>

<pallas_src>
import functools

import jax
import jax.numpy as jnp
from jax import lax
from jax.experimental import pallas as pl
from jax.experimental.pallas import tpu as pltpu


# --------------------------------------------------------------------------- #
# Small helpers
# --------------------------------------------------------------------------- #
def _round_up(x, m):
    return ((x + m - 1) // m) * m


def _vmem_limit_bytes():
    """Generation-aware scoped-VMEM budget (~half of physical), safe fallback."""
    try:
        cap = int(pltpu.get_tpu_info().vmem_capacity_bytes)
    except Exception:
        cap = 64 * 1024 * 1024
    return max(32 * 1024 * 1024, min(cap // 2, 96 * 1024 * 1024))


def _largest_divisor(total, ok):
    best = 1
    for d in range(1, total + 1):
        if total % d == 0 and ok(d):
            best = d
    return best


def _pass1_step_bytes(thh, wup, cin, tn):
    """Rough per-grid-step VMEM footprint of pass 1 for a low-res row block of thh."""
    th = 2 * thh
    return (th * wup * tn * 4                        # f32 accumulator
            + 3 * ((th + 2) * wup + 2) * cin * 2     # padded taps + 2 masked copies (bf16)
            + 2 * th * wup * tn * 2                  # double-buffered bf16 conv output block
            + 2 * thh * wup * cin * 2                # double-buffered bf16 input block
            + 2 * 9 * cin * tn * 2)                  # double-buffered bf16 weight block


# --------------------------------------------------------------------------- #
# Pass 1: nearest-x2 upsample (H) + 3x3 conv + bias, per (N, row-block, Cout-block)
# --------------------------------------------------------------------------- #
def _up_conv_kernel(core_ref, top_ref, bot_ref, w_ref, b_ref,
                    y_ref, psum_ref, psumsq_ref):
    """core_ref : (1, THh, Wup, Cin) bf16  low-res rows of this block (W already x2)
       top_ref  : (1, 1,  Wup, Cin) bf16  halo row above (zero at the image border)
       bot_ref  : (1, 1,  Wup, Cin) bf16  halo row below (zero at the image border)
       w_ref    : (9, Cin, TN)      bf16  conv weights, one (Cin, TN) slab per (kh, kw)
       b_ref    : (1, TN)           f32   conv bias (zero in padded channels)
       y_ref    : (1, TH, Wup, TN)  bf16  conv + bias output tile (lane-dense)
       psum_ref / psumsq_ref : (1, 1, 1, TN) f32 per-tile BatchNorm partial statistics
    """
    _, THh, Wup, Cin = core_ref.shape
    TH = 2 * THh
    TN = y_ref.shape[3]

    # Nearest x2 upsample along H plus the two halo rows (= the 3x3 conv's neighbouring
    # rows / zero padding, prepared by the wrapper so only THh+2 rows are fetched here).
    core = core_ref[0]                                                    # (THh, Wup, Cin)
    core_up = jnp.broadcast_to(core[:, None], (THh, 2, Wup, Cin)).reshape(TH, Wup, Cin)
    xh = jnp.concatenate([top_ref[0], core_up, bot_ref[0]], axis=0)       # (TH+2, Wup, Cin)

    # Flatten spatial positions into matmul rows and pad one zero row at each end so
    # every (kh, kw) tap set is a single contiguous row slice of `mp`.
    rows = (TH + 2) * Wup
    m = xh.reshape(rows, Cin)
    zrow = jnp.zeros((1, Cin), m.dtype)
    mp = jnp.concatenate([zrow, m, zrow], axis=0)                         # (rows + 2, Cin)

    # W-boundary masks (the conv's zero padding along W): kw=0 taps must not wrap onto
    # the previous row's last column; kw=2 taps must not wrap onto the next row's first.
    col = (lax.broadcasted_iota(jnp.int32, (rows + 2, 1), 0) - 1) % Wup
    zero = jnp.zeros((), m.dtype)
    mp_l = jnp.where(col == Wup - 1, zero, mp)
    mp_r = jnp.where(col == 0, zero, mp)
    srcs = (mp_l, mp, mp_r)

    # 9 accumulating MXU matmuls (bf16 operands, f32 accumulation), one per (kh, kw);
    # K = Cin, so there is no lane-axis concat / relayout and no VMEM scratch.
    acc = None
    for kh in range(3):
        for kw in range(3):
            start = kh * Wup + kw
            taps = srcs[kw][start:start + TH * Wup]                       # (TH*Wup, Cin)
            part = jnp.dot(taps, w_ref[3 * kh + kw],
                           preferred_element_type=jnp.float32)            # (TH*Wup, TN)
            acc = part if acc is None else acc + part
    acc = acc + b_ref[...]                                                # + bias, f32

    # Lane-dense bf16 conv tile + f32 BatchNorm partials (mean / var finalized outside,
    # so the whole grid stays fully parallel despite BN needing global statistics).
    y_ref[...] = acc.reshape(1, TH, Wup, TN).astype(y_ref.dtype)
    psum_ref[...] = jnp.sum(acc, axis=0).reshape(1, 1, 1, TN)
    psumsq_ref[...] = jnp.sum(acc * acc, axis=0).reshape(1, 1, 1, TN)


# --------------------------------------------------------------------------- #
# Pass 2: per-channel scale/shift (BatchNorm) + ReLU, large lane-dense tiles
# --------------------------------------------------------------------------- #
def _bn_relu_kernel(y_ref, scale_ref, shift_ref, o_ref):
    y = y_ref[...].astype(jnp.float32) * scale_ref[...] + shift_ref[...]
    o_ref[...] = jnp.maximum(y, 0.0).astype(o_ref.dtype)


# --------------------------------------------------------------------------- #
# Wrapper
# --------------------------------------------------------------------------- #
def prepare_params(params):
    """One-time packing: HWIO weights -> (9, Cin, Coutp) bf16; pad channel vectors."""
    w = params["w"].astype(jnp.float32)                 # (3, 3, Cin, Cout)
    Cin, Cout = int(w.shape[2]), int(w.shape[3])
    Coutp = _round_up(Cout, 128)                        # lane-dense stores
    wp = jnp.zeros((3, 3, Cin, Coutp), jnp.float32).at[..., :Cout].set(w)
    wp = wp.reshape(9, Cin, Coutp).astype(jnp.bfloat16)  # bf16 MXU operands

    def padvec(v):
        return jnp.zeros((1, Coutp), jnp.float32).at[0, :Cout].set(v.astype(jnp.float32))

    packed = dict(w=wp, b=padvec(params["b"]),
                  gamma=padvec(params["gamma"]), beta=padvec(params["beta"]))
    return packed, Cout


@functools.partial(jax.jit, static_argnames=("cout",))
def up_conv_forward(x_nchw, packed, *, cout):
    N, Cin, H, W = x_nchw.shape
    Hup, Wup = 2 * H, 2 * W
    Coutp = packed["w"].shape[-1]
    TN = 256 if Coutp % 256 == 0 else 128               # Cout tile (matches 256-wide MXU)
    n_cb = Coutp // TN

    vmem_limit = _vmem_limit_bytes()
    budget = vmem_limit // 2

    # Low-res rows per row-block (divisor of H): biggest block that fits the VMEM budget
    # while keeping >= ~4 grid steps (work for both v7x TensorCores + the pipeline).
    min_steps1 = min(4, N * n_cb * H)
    THh = _largest_divisor(
        H, lambda d: (_pass1_step_bytes(d, Wup, Cin, TN) <= budget
                      and N * n_cb * (H // d) >= min_steps1))
    n_rb = H // THh
    TH = 2 * THh

    # NCHW -> NHWC (channels on lanes), bf16 (halves input HBM reads), nearest x2 along
    # W on the small low-res input. The H-upsample + halo/zero-pad are done in-kernel,
    # so the full upsampled tensor never round-trips HBM before the conv.
    x = jnp.transpose(x_nchw, (0, 2, 3, 1)).astype(jnp.bfloat16)          # (N, H, W, Cin)
    x = jnp.repeat(x, 2, axis=2)                                          # (N, H, Wup, Cin)

    # Conv halo rows per row-block (zero at the image boundary = the conv's padding),
    # prepared once on the cheap low-res input so each grid step needs only THh+2 rows.
    rb = jnp.arange(n_rb)
    top_id, bot_id = rb * THh - 1, rb * THh + THh
    top = jnp.where((top_id >= 0)[None, :, None, None],
                    x[:, jnp.clip(top_id, 0, H - 1)], 0).astype(jnp.bfloat16)
    bot = jnp.where((bot_id <= H - 1)[None, :, None, None],
                    x[:, jnp.clip(bot_id, 0, H - 1)], 0).astype(jnp.bfloat16)

    flops1 = 2 * N * Hup * Wup * 9 * Cin * Coutp
    bytes1 = (2 * (N * H * Wup * Cin + 2 * N * n_rb * Wup * Cin
                   + 9 * Cin * Coutp + N * Hup * Wup * Coutp)
              + 4 * (Coutp + 2 * N * n_rb * Coutp))

    conv, psum, psumsq = pl.pallas_call(
        _up_conv_kernel,
        out_shape=(jax.ShapeDtypeStruct((N, Hup, Wup, Coutp), jnp.bfloat16),
                   jax.ShapeDtypeStruct((N, n_rb, 1, Coutp), jnp.float32),
                   jax.ShapeDtypeStruct((N, n_rb, 1, Coutp), jnp.float32)),
        grid_spec=pltpu.PrefetchScalarGridSpec(
            num_scalar_prefetch=0,
            grid=(N, n_rb, n_cb),
            in_specs=[
                pl.BlockSpec((1, THh, Wup, Cin), lambda n, r, c: (n, r, 0, 0)),
                pl.BlockSpec((1, 1, Wup, Cin), lambda n, r, c: (n, r, 0, 0)),
                pl.BlockSpec((1, 1, Wup, Cin), lambda n, r, c: (n, r, 0, 0)),
                pl.BlockSpec((9, Cin, TN), lambda n, r, c: (0, 0, c)),
                pl.BlockSpec((1, TN), lambda n, r, c: (0, c)),
            ],
            out_specs=[
                pl.BlockSpec((1, TH, Wup, TN), lambda n, r, c: (n, r, 0, c)),
                pl.BlockSpec((1, 1, 1, TN), lambda n, r, c: (n, r, 0, c)),
                pl.BlockSpec((1, 1, 1, TN), lambda n, r, c: (n, r, 0, c)),
            ],
        ),
        compiler_params=pltpu.CompilerParams(
            dimension_semantics=("parallel", "parallel", "parallel"),
            vmem_limit_bytes=vmem_limit),
        cost_estimate=pl.CostEstimate(flops=flops1, transcendentals=0,
                                      bytes_accessed=bytes1),
    )(x, top, bot, packed["w"], packed["b"])

    # Finalize BatchNorm training-mode batch statistics (biased variance, eps = 1e-5).
    cnt = jnp.float32(N * Hup * Wup)
    mean = jnp.sum(psum, axis=(0, 1, 2)) / cnt                            # (Coutp,)
    var = jnp.maximum(jnp.sum(psumsq, axis=(0, 1, 2)) / cnt - mean * mean, 0.0)
    inv = lax.rsqrt(var + jnp.float32(1e-5))
    scale = packed["gamma"] * inv[None, :]                                # (1, Coutp)
    shift = packed["beta"] - mean[None, :] * scale                        # (1, Coutp)

    # Pass 2: memory-bound normalize + ReLU with large lane-dense tiles.
    min_steps2 = min(4, N * Hup)
    TH2 = _largest_divisor(
        Hup, lambda d: (d * Wup * Coutp * 12 <= budget
                        and N * (Hup // d) >= min_steps2))
    n_rb2 = Hup // TH2

    flops2 = 3 * N * Hup * Wup * Coutp
    bytes2 = N * Hup * Wup * Coutp * 6 + 8 * Coutp

    y = pl.pallas_call(
        _bn_relu_kernel,
        out_shape=jax.ShapeDtypeStruct((N, Hup, Wup, Coutp), jnp.float32),
        grid_spec=pltpu.PrefetchScalarGridSpec(
            num_scalar_prefetch=0,
            grid=(N, n_rb2),
            in_specs=[
                pl.BlockSpec((1, TH2, Wup, Coutp), lambda n, r: (n, r, 0, 0)),
                pl.BlockSpec((1, Coutp), lambda n, r: (0, 0)),
                pl.BlockSpec((1, Coutp), lambda n, r: (0, 0)),
            ],
            out_specs=pl.BlockSpec((1, TH2, Wup, Coutp), lambda n, r: (n, r, 0, 0)),
        ),
        compiler_params=pltpu.CompilerParams(
            dimension_semantics=("parallel", "parallel"),
            vmem_limit_bytes=vmem_limit),
        cost_estimate=pl.CostEstimate(flops=flops2, transcendentals=0,
                                      bytes_accessed=bytes2),
    )(conv, scale, shift)

    # Interface plumbing only: drop channel padding and return NCHW like the PyTorch
    # module. (A fused NHWC pipeline would keep `y` as-is and skip this round trip.)
    return jnp.transpose(y[..., :cout], (0, 3, 1, 2))


# --------------------------------------------------------------------------- #
# Params / reference / test
# --------------------------------------------------------------------------- #
def init_params(key, ch_in, ch_out):
    """Deterministic init mirroring PyTorch defaults (kaiming-uniform conv, BN gamma=1/beta=0)."""
    k1, k2 = jax.random.split(key)
    fan_in = ch_in * 3 * 3
    bound = 1.0 / jnp.sqrt(fan_in)
    w = jax.random.uniform(k1, (3, 3, ch_in, ch_out), jnp.float32, -bound, bound)  # HWIO
    b = jax.random.uniform(k2, (ch_out,), jnp.float32, -bound, bound)
    return dict(w=w, b=b,
                gamma=jnp.ones((ch_out,), jnp.float32),
                beta=jnp.zeros((ch_out,), jnp.float32))


def _reference_forward(x_nchw, params):
    """Pure-JAX f32 reference (XLA conv) for a sanity check."""
    x = jnp.transpose(x_nchw, (0, 2, 3, 1)).astype(jnp.float32)
    x = jnp.repeat(jnp.repeat(x, 2, axis=1), 2, axis=2)                   # nearest x2
    y = lax.conv_general_dilated(
        x, params["w"].astype(jnp.float32), window_strides=(1, 1), padding="SAME",
        dimension_numbers=("NHWC", "HWIO", "NHWC"),
    ) + params["b"][None, None, None, :]
    mean = jnp.mean(y, axis=(0, 1, 2), keepdims=True)
    var = jnp.mean((y - mean) ** 2, axis=(0, 1, 2), keepdims=True)        # biased
    y = (y - mean) * lax.rsqrt(var + 1e-5) * params["gamma"] + params["beta"]
    y = jnp.maximum(y, 0.0)
    return jnp.transpose(y, (0, 3, 1, 2))


if __name__ == "__main__":
    key = jax.random.PRNGKey(0)
    k_x, k_p = jax.random.split(key)

    ch_in, ch_out = 4, 8
    x = jax.random.normal(k_x, (2, ch_in, 16, 16), dtype=jnp.float32)     # NCHW
    params = init_params(k_p, ch_in, ch_out)
    packed, cout = prepare_params(params)

    out = up_conv_forward(x, packed, cout=cout)
    out = jax.block_until_ready(out)

    assert out.shape == (2, ch_out, 32, 32), out.shape
    assert bool(jnp.all(jnp.isfinite(out))), "non-finite output"

    ref = _reference_forward(x, params)
    err = float(jnp.max(jnp.abs(out - ref)))
    # bf16 MXU operands + bf16 intermediate => slightly looser tolerance than pure f32.
    assert jnp.allclose(out, ref, atol=6e-2, rtol=6e-2), f"max abs err {err}"

    print("KERNEL_OK")
</pallas_src>

<mosaic_0001>
module attributes {stable_mosaic.version = 11 : i64} {
  func.func @_up_conv_kernel(%arg0: i32, %arg1: i32, %arg2: i32, %arg3: memref<1x8x32x4xbf16, #tpu.memory_space<vmem>>, %arg4: memref<1x1x32x4xbf16, #tpu.memory_space<vmem>>, %arg5: memref<1x1x32x4xbf16, #tpu.memory_space<vmem>>, %arg6: memref<9x4x128xbf16, #tpu.memory_space<vmem>>, %arg7: memref<1x128xf32, #tpu.memory_space<vmem>>, %arg8: memref<1x16x32x128xbf16, #tpu.memory_space<vmem>>, %arg9: memref<1x1x1x128xf32, #tpu.memory_space<vmem>>, %arg10: memref<1x1x1x128xf32, #tpu.memory_space<vmem>>) attributes {dimension_semantics = [#tpu.dimension_semantics<parallel>, #tpu.dimension_semantics<parallel>, #tpu.dimension_semantics<parallel>], iteration_bounds = array<i64: 2, 2, 1>, scalar_prefetch = 0 : i64, scratch_operands = 0 : i64, tpu.core_type = #tpu.core_type<tc>, window_params = [{transform_indices = @transform_0, window_bounds = array<i64: 1, 8, 32, 4>}, {transform_indices = @transform_1, window_bounds = array<i64: 1, 1, 32, 4>}, {transform_indices = @transform_2, window_bounds = array<i64: 1, 1, 32, 4>}, {transform_indices = @transform_3, window_bounds = array<i64: 9, 4, 128>}, {transform_indices = @transform_4, window_bounds = array<i64: 1, 128>}, {transform_indices = @transform_5, window_bounds = array<i64: 1, 16, 32, 128>}, {transform_indices = @transform_6, window_bounds = array<i64: 1, 1, 1, 128>}, {transform_indices = @transform_7, window_bounds = array<i64: 1, 1, 1, 128>}]} {
    %c0 = arith.constant 0 : index
    %c0_0 = arith.constant 0 : index
    %c0_1 = arith.constant 0 : index
    %c0_2 = arith.constant 0 : index
    %0 = vector.load %arg3[%c0, %c0_0, %c0_1, %c0_2] : memref<1x8x32x4xbf16, #tpu.memory_space<vmem>>, vector<1x8x32x4xbf16>
    %1 = vector.shape_cast %0 : vector<1x8x32x4xbf16> to vector<8x32x4xbf16>
    %2 = vector.shape_cast %1 : vector<8x32x4xbf16> to vector<8x1x32x4xbf16>
    %3 = vector.shape_cast %2 : vector<8x1x32x4xbf16> to vector<8x1x32x4xbf16>
    %4 = vector.broadcast %3 : vector<8x1x32x4xbf16> to vector<8x2x32x4xbf16>
    %5 = vector.shape_cast %4 : vector<8x2x32x4xbf16> to vector<16x32x4xbf16>
    %c0_3 = arith.constant 0 : index
    %c0_4 = arith.constant 0 : index
    %c0_5 = arith.constant 0 : index
    %c0_6 = arith.constant 0 : index
    %6 = vector.load %arg4[%c0_3, %c0_4, %c0_5, %c0_6] : memref<1x1x32x4xbf16, #tpu.memory_space<vmem>>, vector<1x1x32x4xbf16>
    %7 = vector.shape_cast %6 : vector<1x1x32x4xbf16> to vector<1x32x4xbf16>
    %c0_7 = arith.constant 0 : index
    %c0_8 = arith.constant 0 : index
    %c0_9 = arith.constant 0 : index
    %c0_10 = arith.constant 0 : index
    %8 = vector.load %arg5[%c0_7, %c0_8, %c0_9, %c0_10] : memref<1x1x32x4xbf16, #tpu.memory_space<vmem>>, vector<1x1x32x4xbf16>
    %9 = vector.shape_cast %8 : vector<1x1x32x4xbf16> to vector<1x32x4xbf16>
    %10 = tpu.concatenate %7, %5, %9 in 0 : vector<1x32x4xbf16>, vector<16x32x4xbf16>, vector<1x32x4xbf16> -> vector<18x32x4xbf16>
    %11 = vector.shape_cast %10 : vector<18x32x4xbf16> to vector<576x4xbf16>
    %cst = arith.constant 0.000000e+00 : bf16
    %12 = vector.broadcast %cst : bf16 to vector<1x4xbf16>
    %13 = tpu.concatenate %12, %11, %12 in 0 : vector<1x4xbf16>, vector<576x4xbf16>, vector<1x4xbf16> -> vector<578x4xbf16>
    %14 = tpu.iota {dimensions = array<i32: 0>} : vector<578x1xi32>
    %c1_i32 = arith.constant 1 : i32
    %15 = vector.broadcast %c1_i32 : i32 to vector<578x1xi32>
    %16 = arith.subi %14, %15 : vector<578x1xi32>
    %c32_i32 = arith.constant 32 : i32
    %c0_i32 = arith.constant 0 : i32
    %17 = arith.cmpi eq, %c32_i32, %c0_i32 : i32
    %c1_i32_11 = arith.constant 1 : i32
    %18 = arith.select %17, %c1_i32_11, %c32_i32 : i32
    %19 = vector.broadcast %18 : i32 to vector<578x1xi32>
    %20 = arith.remsi %16, %19 : vector<578x1xi32>
    %c0_i32_12 = arith.constant 0 : i32
    %21 = vector.broadcast %c0_i32_12 : i32 to vector<578x1xi32>
    %22 = arith.cmpi ne, %20, %21 : vector<578x1xi32>
    %c0_i32_13 = arith.constant 0 : i32
    %23 = vector.broadcast %c0_i32_13 : i32 to vector<578x1xi32>
    %24 = arith.cmpi slt, %20, %23 : vector<578x1xi32>
    %c0_i32_14 = arith.constant 0 : i32
    %25 = arith.cmpi slt, %18, %c0_i32_14 : i32
    %26 = vector.broadcast %25 : i1 to vector<578x1xi1>
    %27 = vector.broadcast %26 : vector<578x1xi1> to vector<578x1xi1>
    %28 = arith.xori %24, %27 : vector<578x1xi1>
    %29 = arith.andi %28, %22 : vector<578x1xi1>
    %30 = vector.broadcast %18 : i32 to vector<578x1xi32>
    %31 = arith.addi %20, %30 : vector<578x1xi32>
    %32 = arith.select %29, %31, %20 : vector<578x1xi1>, vector<578x1xi32>
    %c31_i32 = arith.constant 31 : i32
    %33 = vector.broadcast %c31_i32 : i32 to vector<578x1xi32>
    %34 = arith.cmpi eq, %32, %33 : vector<578x1xi32>
    %cst_15 = arith.constant 0.000000e+00 : bf16
    %35 = vector.shape_cast %34 : vector<578x1xi1> to vector<578x1xi1>
    %36 = vector.broadcast %35 : vector<578x1xi1> to vector<578x4xi1>
    %37 = vector.broadcast %cst_15 : bf16 to vector<578x4xbf16>
    %38 = arith.select %36, %37, %13 : vector<578x4xi1>, vector<578x4xbf16>
    %c0_i32_16 = arith.constant 0 : i32
    %39 = vector.broadcast %c0_i32_16 : i32 to vector<578x1xi32>
    %40 = arith.cmpi eq, %32, %39 : vector<578x1xi32>
    %cst_17 = arith.constant 0.000000e+00 : bf16
    %41 = vector.shape_cast %40 : vector<578x1xi1> to vector<578x1xi1>
    %42 = vector.broadcast %41 : vector<578x1xi1> to vector<578x4xi1>
    %43 = vector.broadcast %cst_17 : bf16 to vector<578x4xbf16>
    %44 = arith.select %42, %43, %13 : vector<578x4xi1>, vector<578x4xbf16>
    %45 = vector.extract_strided_slice %38 {offsets = [0, 0], sizes = [512, 4], strides = [1, 1]} : vector<578x4xbf16> to vector<512x4xbf16>
    %c0_18 = arith.constant 0 : index
    %c0_19 = arith.constant 0 : index
    %c0_20 = arith.constant 0 : index
    %46 = vector.load %arg6[%c0_18, %c0_19, %c0_20] : memref<9x4x128xbf16, #tpu.memory_space<vmem>>, vector<1x4x128xbf16>
    %47 = vector.shape_cast %46 : vector<1x4x128xbf16> to vector<4x128xbf16>
    %cst_21 = arith.constant dense<0.000000e+00> : vector<512x128xf32>
    %48 = tpu.matmul %45, %47, %cst_21 {dimension_numbers = #tpu.dot_dimension_numbers<[1], [0], [0], [1], [0, 0, 1, 1], [], []>} : vector<512x4xbf16>, vector<4x128xbf16>, vector<512x128xf32> -> vector<512x128xf32>
    %49 = vector.extract_strided_slice %13 {offsets = [1, 0], sizes = [512, 4], strides = [1, 1]} : vector<578x4xbf16> to vector<512x4xbf16>
    %c1 = arith.constant 1 : index
    %c0_22 = arith.constant 0 : index
    %c0_23 = arith.constant 0 : index
    %50 = vector.load %arg6[%c1, %c0_22, %c0_23] : memref<9x4x128xbf16, #tpu.memory_space<vmem>>, vector<1x4x128xbf16>
    %51 = vector.shape_cast %50 : vector<1x4x128xbf16> to vector<4x128xbf16>
    %cst_24 = arith.constant dense<0.000000e+00> : vector<512x128xf32>
    %52 = tpu.matmul %49, %51, %cst_24 {dimension_numbers = #tpu.dot_dimension_numbers<[1], [0], [0], [1], [0, 0, 1, 1], [], []>} : vector<512x4xbf16>, vector<4x128xbf16>, vector<512x128xf32> -> vector<512x128xf32>
    %53 = arith.addf %48, %52 : vector<512x128xf32>
    %54 = vector.extract_strided_slice %44 {offsets = [2, 0], sizes = [512, 4], strides = [1, 1]} : vector<578x4xbf16> to vector<512x4xbf16>
    %c2 = arith.constant 2 : index
    %c0_25 = arith.constant 0 : index
    %c0_26 = arith.constant 0 : index
    %55 = vector.load %arg6[%c2, %c0_25, %c0_26] : memref<9x4x128xbf16, #tpu.memory_space<vmem>>, vector<1x4x128xbf16>
    %56 = vector.shape_cast %55 : vector<1x4x128xbf16> to vector<4x128xbf16>
    %cst_27 = arith.constant dense<0.000000e+00> : vector<512x128xf32>
    %57 = tpu.matmul %54, %56, %cst_27 {dimension_numbers = #tpu.dot_dimension_numbers<[1], [0], [0], [1], [0, 0, 1, 1], [], []>} : vector<512x4xbf16>, vector<4x128xbf16>, vector<512x128xf32> -> vector<512x128xf32>
    %58 = arith.addf %53, %57 : vector<512x128xf32>
    %59 = vector.extract_strided_slice %38 {offsets = [32, 0], sizes = [512, 4], strides = [1, 1]} : vector<578x4xbf16> to vector<512x4xbf16>
    %c3 = arith.constant 3 : index
    %c0_28 = arith.constant 0 : index
    %c0_29 = arith.constant 0 : index
    %60 = vector.load %arg6[%c3, %c0_28, %c0_29] : memref<9x4x128xbf16, #tpu.memory_space<vmem>>, vector<1x4x128xbf16>
    %61 = vector.shape_cast %60 : vector<1x4x128xbf16> to vector<4x128xbf16>
    %cst_30 = arith.constant dense<0.000000e+00> : vector<512x128xf32>
    %62 = tpu.matmul %59, %61, %cst_30 {dimension_numbers = #tpu.dot_dimension_numbers<[1], [0], [0], [1], [0, 0, 1, 1], [], []>} : vector<512x4xbf16>, vector<4x128xbf16>, vector<512x128xf32> -> vector<512x128xf32>
    %63 = arith.addf %58, %62 : vector<512x128xf32>
    %64 = vector.extract_strided_slice %13 {offsets = [33, 0], sizes = [512, 4], strides = [1, 1]} : vector<578x4xbf16> to vector<512x4xbf16>
    %c4 = arith.constant 4 : index
    %c0_31 = arith.constant 0 : index
    %c0_32 = arith.constant 0 : index
    %65 = vector.load %arg6[%c4, %c0_31, %c0_32] : memref<9x4x128xbf16, #tpu.memory_space<vmem>>, vector<1x4x128xbf16>
    %66 = vector.shape_cast %65 : vector<1x4x128xbf16> to vector<4x128xbf16>
    %cst_33 = arith.constant dense<0.000000e+00> : vector<512x128xf32>
    %67 = tpu.matmul %64, %66, %cst_33 {dimension_numbers = #tpu.dot_dimension_numbers<[1], [0], [0], [1], [0, 0, 1, 1], [], []>} : vector<512x4xbf16>, vector<4x128xbf16>, vector<512x128xf32> -> vector<512x128xf32>
    %68 = arith.addf %63, %67 : vector<512x128xf32>
    %69 = vector.extract_strided_slice %44 {offsets = [34, 0], sizes = [512, 4], strides = [1, 1]} : vector<578x4xbf16> to vector<512x4xbf16>
    %c5 = arith.constant 5 : index
    %c0_34 = arith.constant 0 : index
    %c0_35 = arith.constant 0 : index
    %70 = vector.load %arg6[%c5, %c0_34, %c0_35] : memref<9x4x128xbf16, #tpu.memory_space<vmem>>, vector<1x4x128xbf16>
    %71 = vector.shape_cast %70 : vector<1x4x128xbf16> to vector<4x128xbf16>
    %cst_36 = arith.constant dense<0.000000e+00> : vector<512x128xf32>
    %72 = tpu.matmul %69, %71, %cst_36 {dimension_numbers = #tpu.dot_dimension_numbers<[1], [0], [0], [1], [0, 0, 1, 1], [], []>} : vector<512x4xbf16>, vector<4x128xbf16>, vector<512x128xf32> -> vector<512x128xf32>
    %73 = arith.addf %68, %72 : vector<512x128xf32>
    %74 = vector.extract_strided_slice %38 {offsets = [64, 0], sizes = [512, 4], strides = [1, 1]} : vector<578x4xbf16> to vector<512x4xbf16>
    %c6 = arith.constant 6 : index
    %c0_37 = arith.constant 0 : index
    %c0_38 = arith.constant 0 : index
    %75 = vector.load %arg6[%c6, %c0_37, %c0_38] : memref<9x4x128xbf16, #tpu.memory_space<vmem>>, vector<1x4x128xbf16>
    %76 = vector.shape_cast %75 : vector<1x4x128xbf16> to vector<4x128xbf16>
    %cst_39 = arith.constant dense<0.000000e+00> : vector<512x128xf32>
    %77 = tpu.matmul %74, %76, %cst_39 {dimension_numbers = #tpu.dot_dimension_numbers<[1], [0], [0], [1], [0, 0, 1, 1], [], []>} : vector<512x4xbf16>, vector<4x128xbf16>, vector<512x128xf32> -> vector<512x128xf32>
    %78 = arith.addf %73, %77 : vector<512x128xf32>
    %79 = vector.extract_strided_slice %13 {offsets = [65, 0], sizes = [512, 4], strides = [1, 1]} : vector<578x4xbf16> to vector<512x4xbf16>
    %c7 = arith.constant 7 : index
    %c0_40 = arith.constant 0 : index
    %c0_41 = arith.constant 0 : index
    %80 = vector.load %arg6[%c7, %c0_40, %c0_41] : memref<9x4x128xbf16, #tpu.memory_space<vmem>>, vector<1x4x128xbf16>
    %81 = vector.shape_cast %80 : vector<1x4x128xbf16> to vector<4x128xbf16>
    %cst_42 = arith.constant dense<0.000000e+00> : vector<512x128xf32>
    %82 = tpu.matmul %79, %81, %cst_42 {dimension_numbers = #tpu.dot_dimension_numbers<[1], [0], [0], [1], [0, 0, 1, 1], [], []>} : vector<512x4xbf16>, vector<4x128xbf16>, vector<512x128xf32> -> vector<512x128xf32>
    %83 = arith.addf %78, %82 : vector<512x128xf32>
    %84 = vector.extract_strided_slice %44 {offsets = [66, 0], sizes = [512, 4], strides = [1, 1]} : vector<578x4xbf16> to vector<512x4xbf16>
    %c8 = arith.constant 8 : index
    %c0_43 = arith.constant 0 : index
    %c0_44 = arith.constant 0 : index
    %85 = vector.load %arg6[%c8, %c0_43, %c0_44] : memref<9x4x128xbf16, #tpu.memory_space<vmem>>, vector<1x4x128xbf16>
    %86 = vector.shape_cast %85 : vector<1x4x128xbf16> to vector<4x128xbf16>
    %cst_45 = arith.constant dense<0.000000e+00> : vector<512x128xf32>
    %87 = tpu.matmul %84, %86, %cst_45 {dimension_numbers = #tpu.dot_dimension_numbers<[1], [0], [0], [1], [0, 0, 1, 1], [], []>} : vector<512x4xbf16>, vector<4x128xbf16>, vector<512x128xf32> -> vector<512x128xf32>
    %88 = arith.addf %83, %87 : vector<512x128xf32>
    %c0_46 = arith.constant 0 : index
    %c0_47 = arith.constant 0 : index
    %89 = vector.load %arg7[%c0_46, %c0_47] : memref<1x128xf32, #tpu.memory_space<vmem>>, vector<1x128xf32>
    %90 = vector.broadcast %89 : vector<1x128xf32> to vector<512x128xf32>
    %91 = arith.addf %88, %90 : vector<512x128xf32>
    %92 = vector.shape_cast %91 : vector<512x128xf32> to vector<1x16x32x128xf32>
    %93 = arith.truncf %92 : vector<1x16x32x128xf32> to vector<1x16x32x128xbf16>
    %c0_48 = arith.constant 0 : index
    %c0_49 = arith.constant 0 : index
    %c0_50 = arith.constant 0 : index
    %c0_51 = arith.constant 0 : index
    %94 = vector.load %arg8[%c0_48, %c0_49, %c0_50, %c0_51] : memref<1x16x32x128xbf16, #tpu.memory_space<vmem>>, vector<1x16x32x128xbf16>
    tpu.vector_store %arg8[%c0_48, %c0_49, %c0_50, %c0_51], %93 {strides = array<i32>} : memref<1x16x32x128xbf16, #tpu.memory_space<vmem>>, vector<1x16x32x128xbf16>,
    %cst_52 = arith.constant dense<0.000000e+00> : vector<128xf32>
    %95 = vector.multi_reduction <add>, %91, %cst_52 [0] : vector<512x128xf32> to vector<128xf32>
    %96 = vector.shape_cast %95 : vector<128xf32> to vector<1x1x1x128xf32>
    %c0_53 = arith.constant 0 : index
    %c0_54 = arith.constant 0 : index
    %c0_55 = arith.constant 0 : index
    %c0_56 = arith.constant 0 : index
    %97 = vector.load %arg9[%c0_53, %c0_54, %c0_55, %c0_56] : memref<1x1x1x128xf32, #tpu.memory_space<vmem>>, vector<1x1x1x128xf32>
    tpu.vector_store %arg9[%c0_53, %c0_54, %c0_55, %c0_56], %96 {strides = array<i32>} : memref<1x1x1x128xf32, #tpu.memory_space<vmem>>, vector<1x1x1x128xf32>,
    %98 = arith.mulf %91, %91 : vector<512x128xf32>
    %cst_57 = arith.constant dense<0.000000e+00> : vector<128xf32>
    %99 = vector.multi_reduction <add>, %98, %cst_57 [0] : vector<512x128xf32> to vector<128xf32>
    %100 = vector.shape_cast %99 : vector<128xf32> to vector<1x1x1x128xf32>
    %c0_58 = arith.constant 0 : index
    %c0_59 = arith.constant 0 : index
    %c0_60 = arith.constant 0 : index
    %c0_61 = arith.constant 0 : index
    %101 = vector.load %arg10[%c0_58, %c0_59, %c0_60, %c0_61] : memref<1x1x1x128xf32, #tpu.memory_space<vmem>>, vector<1x1x1x128xf32>
    tpu.vector_store %arg10[%c0_58, %c0_59, %c0_60, %c0_61], %100 {strides = array<i32>} : memref<1x1x1x128xf32, #tpu.memory_space<vmem>>, vector<1x1x1x128xf32>,
    return
  }
  func.func @transform_0(%arg0: i32, %arg1: i32, %arg2: i32) -> (i32, i32, i32, i32) {
    %c0_i32 = arith.constant 0 : i32
    %c0_i32_0 = arith.constant 0 : i32
    %c0_i32_1 = arith.constant 0 : i32
    return %arg0, %arg1, %c0_i32, %c0_i32_0 : i32, i32, i32, i32
  }
  func.func @transform_1(%arg0: i32, %arg1: i32, %arg2: i32) -> (i32, i32, i32, i32) {
    %c0_i32 = arith.constant 0 : i32
    %c0_i32_0 = arith.constant 0 : i32
    %c0_i32_1 = arith.constant 0 : i32
    return %arg0, %arg1, %c0_i32, %c0_i32_0 : i32, i32, i32, i32
  }
  func.func @transform_2(%arg0: i32, %arg1: i32, %arg2: i32) -> (i32, i32, i32, i32) {
    %c0_i32 = arith.constant 0 : i32
    %c0_i32_0 = arith.constant 0 : i32
    %c0_i32_1 = arith.constant 0 : i32
    return %arg0, %arg1, %c0_i32, %c0_i32_0 : i32, i32, i32, i32
  }
  func.func @transform_3(%arg0: i32, %arg1: i32, %arg2: i32) -> (i32, i32, i32) {
    %c0_i32 = arith.constant 0 : i32
    %c0_i32_0 = arith.constant 0 : i32
    %c0_i32_1 = arith.constant 0 : i32
    return %c0_i32, %c0_i32_0, %arg2 : i32, i32, i32
  }
  func.func @transform_4(%arg0: i32, %arg1: i32, %arg2: i32) -> (i32, i32) {
    %c0_i32 = arith.constant 0 : i32
    %c0_i32_0 = arith.constant 0 : i32
    return %c0_i32, %arg2 : i32, i32
  }
  func.func @transform_5(%arg0: i32, %arg1: i32, %arg2: i32) -> (i32, i32, i32, i32) {
    %c0_i32 = arith.constant 0 : i32
    %c0_i32_0 = arith.constant 0 : i32
    return %arg0, %arg1, %c0_i32, %arg2 : i32, i32, i32, i32
  }
  func.func @transform_6(%arg0: i32, %arg1: i32, %arg2: i32) -> (i32, i32, i32, i32) {
    %c0_i32 = arith.constant 0 : i32
    %c0_i32_0 = arith.constant 0 : i32
    return %arg0, %arg1, %c0_i32, %arg2 : i32, i32, i32, i32
  }
  func.func @transform_7(%arg0: i32, %arg1: i32, %arg2: i32) -> (i32, i32, i32, i32) {
    %c0_i32 = arith.constant 0 : i32
    %c0_i32_0 = arith.constant 0 : i32
    return %arg0, %arg1, %c0_i32, %arg2 : i32, i32, i32, i32
  }
}

module attributes {stable_mosaic.version = 11 : i64} {
  func.func @_bn_relu_kernel(%arg0: i32, %arg1: i32, %arg2: memref<1x16x32x128xbf16, #tpu.memory_space<vmem>>, %arg3: memref<1x128xf32, #tpu.memory_space<vmem>>, %arg4: memref<1x128xf32, #tpu.memory_space<vmem>>, %arg5: memref<1x16x32x128xf32, #tpu.memory_space<vmem>>) attributes {dimension_semantics = [#tpu.dimension_semantics<parallel>, #tpu.dimension_semantics<parallel>], iteration_bounds = array<i64: 2, 2>, scalar_prefetch = 0 : i64, scratch_operands = 0 : i64, tpu.core_type = #tpu.core_type<tc>, window_params = [{transform_indices = @transform_0, window_bounds = array<i64: 1, 16, 32, 128>}, {pipeline_mode = #tpu.pipeline_mode<synchronous>, transform_indices = @transform_1, window_bounds = array<i64: 1, 128>}, {pipeline_mode = #tpu.pipeline_mode<synchronous>, transform_indices = @transform_2, window_bounds = array<i64: 1, 128>}, {transform_indices = @transform_3, window_bounds = array<i64: 1, 16, 32, 128>}]} {
    %c0 = arith.constant 0 : index
    %c0_0 = arith.constant 0 : index
    %c0_1 = arith.constant 0 : index
    %c0_2 = arith.constant 0 : index
    %0 = vector.load %arg2[%c0, %c0_0, %c0_1, %c0_2] : memref<1x16x32x128xbf16, #tpu.memory_space<vmem>>, vector<1x16x32x128xbf16>
    %1 = arith.extf %0 : vector<1x16x32x128xbf16> to vector<1x16x32x128xf32>
    %c0_3 = arith.constant 0 : index
    %c0_4 = arith.constant 0 : index
    %2 = vector.load %arg3[%c0_3, %c0_4] : memref<1x128xf32, #tpu.memory_space<vmem>>, vector<1x128xf32>
    %3 = vector.shape_cast %2 : vector<1x128xf32> to vector<1x1x1x128xf32>
    %4 = vector.broadcast %3 : vector<1x1x1x128xf32> to vector<1x16x32x128xf32>
    %5 = arith.mulf %1, %4 : vector<1x16x32x128xf32>
    %c0_5 = arith.constant 0 : index
    %c0_6 = arith.constant 0 : index
    %6 = vector.load %arg4[%c0_5, %c0_6] : memref<1x128xf32, #tpu.memory_space<vmem>>, vector<1x128xf32>
    %7 = vector.shape_cast %6 : vector<1x128xf32> to vector<1x1x1x128xf32>
    %8 = vector.broadcast %7 : vector<1x1x1x128xf32> to vector<1x16x32x128xf32>
    %9 = arith.addf %5, %8 : vector<1x16x32x128xf32>
    %cst = arith.constant 0.000000e+00 : f32
    %10 = vector.broadcast %cst : f32 to vector<1x16x32x128xf32>
    %11 = arith.maximumf %9, %10 : vector<1x16x32x128xf32>
    %c0_7 = arith.constant 0 : index
    %c0_8 = arith.constant 0 : index
    %c0_9 = arith.constant 0 : index
    %c0_10 = arith.constant 0 : index
    %12 = vector.load %arg5[%c0_7, %c0_8, %c0_9, %c0_10] : memref<1x16x32x128xf32, #tpu.memory_space<vmem>>, vector<1x16x32x128xf32>
    tpu.vector_store %arg5[%c0_7, %c0_8, %c0_9, %c0_10], %11 {strides = array<i32>} : memref<1x16x32x128xf32, #tpu.memory_space<vmem>>, vector<1x16x32x128xf32>,
    return
  }
  func.func @transform_0(%arg0: i32, %arg1: i32) -> (i32, i32, i32, i32) {
    %c0_i32 = arith.constant 0 : i32
    %c0_i32_0 = arith.constant 0 : i32
    %c0_i32_1 = arith.constant 0 : i32
    return %arg0, %arg1, %c0_i32, %c0_i32_0 : i32, i32, i32, i32
  }
  func.func @transform_1(%arg0: i32, %arg1: i32) -> (i32, i32) {
    %c0_i32 = arith.constant 0 : i32
    %c0_i32_0 = arith.constant 0 : i32
    %c0_i32_1 = arith.constant 0 : i32
    return %c0_i32, %c0_i32_0 : i32, i32
  }
  func.func @transform_2(%arg0: i32, %arg1: i32) -> (i32, i32) {
    %c0_i32 = arith.constant 0 : i32
    %c0_i32_0 = arith.constant 0 : i32
    %c0_i32_1 = arith.constant 0 : i32
    return %c0_i32, %c0_i32_0 : i32, i32
  }
  func.func @transform_3(%arg0: i32, %arg1: i32) -> (i32, i32, i32, i32) {
    %c0_i32 = arith.constant 0 : i32
    %c0_i32_0 = arith.constant 0 : i32
    %c0_i32_1 = arith.constant 0 : i32
    return %arg0, %arg1, %c0_i32, %c0_i32_0 : i32, i32, i32, i32
  }
}

</mosaic_0001>

<bundles_post_ra>
// kernel: up_conv_forward.3
= control target key start
LH: loop header
LB: loop body
LE: loop exit
PB: predicated region body
PF: predicated region fallthrough
CT: control target
= control target key end

     0   :  { %s982_s12 = smov 0   ;;  %s984_s13 = smov 0   ;;  %s1275_s0 = inlined_call_operand.vmem [shape: bf16[2,32,32,128], index: 0, kind: input, shape index: {}]   ;;  %s1276_s1 = inlined_call_operand.vmem [shape: f32[1,128], index: 1, kind: input, shape index: {}]   ;;  %s1277_s2 = inlined_call_operand.vmem [shape: f32[1,128], index: 2, kind: input, shape index: {}]   ;;  %s1278_s3 = inlined_call_operand.vmem [shape: f32[2,32,32,128], index: 3, kind: output, shape index: {}]  }
   0x1   :  { %s986_s14 = smov 0   ;;  %s988_s15 = smov 0  }
   0x2   :  { %s990_s16 = smov 0  }
   0x3 LB: > { %s22_s17 = sadd.s32 1, %s952_s14  ;;  %s25_s18 = sadd.s32 1, %s956_s15  ;;  %s960_s16 = sphi %s990_s16, %s13_s16   ;;  %s956_s15 = sphi %s988_s15, %s1282_s15   ;;  %s952_s14 = sphi %s986_s14, %s1281_s14   ;;  %s948_s13 = sphi %s984_s13, %s1280_s13   ;;  %s944_s12 = sphi %s982_s12, %s1279_s12  }
   0x4   : > { %p23_p0 = scmp.ge.s32.totalorder %s22_s17, 2  ;;  %p710_p1 = scmp.ge.s32.totalorder %s960_s16, 1 }
   0x5   : > { %p159_p2 = scmp.lt.s32.totalorder %s960_s16, 5 }
   0x6   : > { %s1284_s17 = smov (%p23_p0, %s22_s17), 0  ;;  %s1286_s18 = smov (!%p23_p0, %s25_s18), %s956_s15 }
   0x7   : > { %p160_p3 = pnand %p710_p1, %p159_p2  ;;  %p27_p4 = scmp.ge.s32.totalorder %s1286_s18, 2 }
   0x8   : > { %s711_s19 = sshll.u32 (!%p160_p3), %s944_s12, 4  ;;  %p194_p5 = scmp.lt.s32.totalorder (!%p160_p3), %s948_s13, 1 }
   0x9   : > { %s1288_s18 = smov (%p27_p4, %s1286_s18), 0  ;;  %163 = sbr.rel (%p160_p3) target bundleno = 92 (0x5c), region = 32 }
   0xa   : > { %p196_p6 = scmp.lt.s32.totalorder (!%p160_p3), %s711_s19, 31 }
   0xe   : > { %s1290_s13 = smov (!%p194_p5, %s948_s13), 1  ;;  %s1292_s19 = smov (!%p196_p6, %s711_s19), 31  ;;  %v1023_v0 = vld [vmem:[%s1276_s1] ss:$0 sm:$0xff] }
   0xf   : > { %s713_s20 = sshll.u32 %s1290_s13, 7  ;;  %s712_s21 = sshll.u32 %s1292_s19, 2  ;;  %v1031_v5 = vld [vmem:[%s1277_s2] ss:$0 sm:$0xff] }
  0x10   : > { %s1012_s22 = sadd.s32 %s713_s20, %s712_s21 }
  0x11   : > { %s714_s23 = sshll.u32 %s1012_s22, 2  ;;  %s718_s4 = sshll.u32 %s1012_s22, 3 }
  0x12   : > { %s1018_s26 = scalar_lea.vmem %s1275_s0, %s714_s23  ;;  %s1050_s7 = scalar_lea.vmem %s1278_s3, %s718_s4 }
  0x13   : > { %v722_v1 = vld [vmem:[%s1018_s26] sm:$0xff]   ;;  %v849_v2 = vld [vmem:[%s1018_s26 + $0x8] sm:$0xff]   ;;  %v850_v3 = vld [vmem:[%s1018_s26 + $0x10] sm:$0xff]  }
  0x14   : > { %v723_v4 = vunpack.c.l.bf16 %v722_v1  ;;  %v724_v6 = vunpack.c.h.bf16 %v722_v1  ;;  %v727_v7 = vunpack.c.l.bf16 %v849_v2  ;;  %v728_v8 = vunpack.c.h.bf16 %v849_v2  ;;  %v851_v9 = vld [vmem:[%s1018_s26 + $0x18] sm:$0xff]   ;;  %v852_v30 = vld [vmem:[%s1018_s26 + $0x20] sm:$0xff]   ;;  %v853_v31 = vld [vmem:[%s1018_s26 + $0x28] sm:$0xff]  }
  0x15   : > { %v731_v10 = vunpack.c.l.bf16 %v850_v3  ;;  %v732_v11 = vunpack.c.h.bf16 %v850_v3  ;;  %v735_v12 = vunpack.c.l.bf16 %v851_v9  ;;  %v736_v13 = vunpack.c.h.bf16 %v851_v9  ;;  %v854_v36 = vld [vmem:[%s1018_s26 + $0x30] sm:$0xff]   ;;  %v855_v37 = vld [vmem:[%s1018_s26 + $0x38] sm:$0xff]   ;;  %v856_v3 = vld [vmem:[%s1018_s26 + $0x40] sm:$0xff]  }
  0x16   : > { %v347_v14 = vmul.f32 %v1023_v0, %v723_v4  ;;  %v348_v15 = vmul.f32 %v1023_v0, %v724_v6  ;;  %v349_v16 = vmul.f32 %v1023_v0, %v727_v7  ;;  %v350_v17 = vmul.f32 %v1023_v0, %v728_v8  ;;  %v857_v4 = vld [vmem:[%s1018_s26 + $0x48] sm:$0xff]   ;;  %v858_v6 = vld [vmem:[%s1018_s26 + $0x50] sm:$0xff]  }
  0x17   : > { %v351_v18 = vmul.f32 %v1023_v0, %v731_v10  ;;  %v352_v19 = vmul.f32 %v1023_v0, %v732_v11  ;;  %v353_v20 = vmul.f32 %v1023_v0, %v735_v12  ;;  %v354_v21 = vmul.f32 %v1023_v0, %v736_v13  ;;  %v859_v11 = vld [vmem:[%s1018_s26 + $0x58] sm:$0xff]  }
  0x18   : > { %v415_v22 = vadd.f32 %v1031_v5, %v347_v14  ;;  %v416_v23 = vadd.f32 %v1031_v5, %v348_v15  ;;  %v417_v24 = vadd.f32 %v1031_v5, %v349_v16  ;;  %v418_v25 = vadd.f32 %v1031_v5, %v350_v17 }
  0x19   : > { %v419_v26 = vadd.f32 %v1031_v5, %v351_v18  ;;  %v420_v27 = vadd.f32 %v1031_v5, %v352_v19  ;;  %v421_v28 = vadd.f32 %v1031_v5, %v353_v20  ;;  %v422_v29 = vadd.f32 %v1031_v5, %v354_v21 }
  0x1a   : > { %v479_v32 = vmax.f32 %v415_v22, 0.0  ;;  %v480_v33 = vmax.f32 %v416_v23, 0.0  ;;  %v481_v34 = vmax.f32 %v417_v24, 0.0  ;;  %v482_v35 = vmax.f32 %v418_v25, 0.0 }
  0x1b   : > { %v483_v38 = vmax.f32 %v419_v26, 0.0  ;;  %v484_v39 = vmax.f32 %v420_v27, 0.0  ;;  %v485_v40 = vmax.f32 %v421_v28, 0.0  ;;  %v486_v41 = vmax.f32 %v422_v29, 0.0 }
  0x1c   : > { %543 = vst [vmem:[%s1050_s7] sm:$0xff] %v479_v32  ;;  %v739_v42 = vunpack.c.l.bf16 %v852_v30  ;;  %v740_v43 = vunpack.c.h.bf16 %v852_v30  ;;  %v743_v44 = vunpack.c.l.bf16 %v853_v31  ;;  %v744_v45 = vunpack.c.h.bf16 %v853_v31 }
  0x1d   : > { %544 = vst [vmem:[%s1050_s7 + $0x8] sm:$0xff] %v480_v33  ;;  %v747_v46 = vunpack.c.l.bf16 %v854_v36  ;;  %v748_v47 = vunpack.c.h.bf16 %v854_v36  ;;  %v751_v48 = vunpack.c.l.bf16 %v855_v37  ;;  %v752_v49 = vunpack.c.h.bf16 %v855_v37 }
  0x1e   : > { %545 = vst [vmem:[%s1050_s7 + $0x10] sm:$0xff] %v481_v34  ;;  %v355_v50 = vmul.f32 %v1023_v0, %v739_v42  ;;  %v356_v51 = vmul.f32 %v1023_v0, %v740_v43  ;;  %v357_v52 = vmul.f32 %v1023_v0, %v743_v44  ;;  %v358_v53 = vmul.f32 %v1023_v0, %v744_v45  ;;  %v862_v42 = vld [vmem:[%s1018_s26 + $0x70] sm:$0xff]  }
  0x1f   : > { %546 = vst [vmem:[%s1050_s7 + $0x18] sm:$0xff] %v482_v35  ;;  %v359_v54 = vmul.f32 %v1023_v0, %v747_v46  ;;  %v360_v55 = vmul.f32 %v1023_v0, %v748_v47  ;;  %v361_v56 = vmul.f32 %v1023_v0, %v751_v48  ;;  %v362_v57 = vmul.f32 %v1023_v0, %v752_v49  ;;  %v863_v47 = vld [vmem:[%s1018_s26 + $0x78] sm:$0xff]  }
  0x20   : > { %547 = vst [vmem:[%s1050_s7 + $0x20] sm:$0xff] %v483_v38  ;;  %v423_v58 = vadd.f32 %v1031_v5, %v355_v50  ;;  %v424_v59 = vadd.f32 %v1031_v5, %v356_v51  ;;  %v425_v60 = vadd.f32 %v1031_v5, %v357_v52  ;;  %v426_v61 = vadd.f32 %v1031_v5, %v358_v53 }
  0x21   : > { %548 = vst [vmem:[%s1050_s7 + $0x28] sm:$0xff] %v484_v39  ;;  %v427_v62 = vadd.f32 %v1031_v5, %v359_v54  ;;  %v428_v63 = vadd.f32 %v1031_v5, %v360_v55  ;;  %v429_v1 = vadd.f32 %v1031_v5, %v361_v56  ;;  %v430_v2 = vadd.f32 %v1031_v5, %v362_v57 }
  0x22   : > { %549 = vst [vmem:[%s1050_s7 + $0x30] sm:$0xff] %v485_v40  ;;  %v487_v7 = vmax.f32 %v423_v58, 0.0  ;;  %v488_v8 = vmax.f32 %v424_v59, 0.0  ;;  %v489_v9 = vmax.f32 %v425_v60, 0.0  ;;  %v490_v10 = vmax.f32 %v426_v61, 0.0  ;;  %v860_v40 = vld [vmem:[%s1018_s26 + $0x60] sm:$0xff]  }
  0x23   : > { %550 = vst [vmem:[%s1050_s7 + $0x38] sm:$0xff] %v486_v41  ;;  %v491_v12 = vmax.f32 %v427_v62, 0.0  ;;  %v492_v13 = vmax.f32 %v428_v63, 0.0  ;;  %v493_v14 = vmax.f32 %v429_v1, 0.0  ;;  %v494_v15 = vmax.f32 %v430_v2, 0.0  ;;  %v861_v41 = vld [vmem:[%s1018_s26 + $0x68] sm:$0xff]  }
  0x24   : > { %551 = vst [vmem:[%s1050_s7 + $0x40] sm:$0xff] %v487_v7  ;;  %v755_v16 = vunpack.c.l.bf16 %v856_v3  ;;  %v756_v17 = vunpack.c.h.bf16 %v856_v3  ;;  %v759_v18 = vunpack.c.l.bf16 %v857_v4  ;;  %v760_v19 = vunpack.c.h.bf16 %v857_v4 }
  0x25   : > { %552 = vst [vmem:[%s1050_s7 + $0x48] sm:$0xff] %v488_v8  ;;  %v763_v20 = vunpack.c.l.bf16 %v858_v6  ;;  %v764_v21 = vunpack.c.h.bf16 %v858_v6  ;;  %v767_v22 = vunpack.c.l.bf16 %v859_v11  ;;  %v768_v23 = vunpack.c.h.bf16 %v859_v11 }
  0x26   : > { %553 = vst [vmem:[%s1050_s7 + $0x50] sm:$0xff] %v489_v9  ;;  %v363_v24 = vmul.f32 %v1023_v0, %v755_v16  ;;  %v364_v25 = vmul.f32 %v1023_v0, %v756_v17  ;;  %v365_v26 = vmul.f32 %v1023_v0, %v759_v18  ;;  %v366_v27 = vmul.f32 %v1023_v0, %v760_v19  ;;  %v866_v16 = vld [vmem:[%s1018_s26 + $0x90] sm:$0xff]  }
  0x27   : > { %554 = vst [vmem:[%s1050_s7 + $0x58] sm:$0xff] %v490_v10  ;;  %v367_v28 = vmul.f32 %v1023_v0, %v763_v20  ;;  %v368_v29 = vmul.f32 %v1023_v0, %v764_v21  ;;  %v369_v30 = vmul.f32 %v1023_v0, %v767_v22  ;;  %v370_v31 = vmul.f32 %v1023_v0, %v768_v23  ;;  %v867_v21 = vld [vmem:[%s1018_s26 + $0x98] sm:$0xff]  }
  0x28   : > { %555 = vst [vmem:[%s1050_s7 + $0x60] sm:$0xff] %v491_v12  ;;  %v431_v32 = vadd.f32 %v1031_v5, %v363_v24  ;;  %v432_v33 = vadd.f32 %v1031_v5, %v364_v25  ;;  %v433_v34 = vadd.f32 %v1031_v5, %v365_v26  ;;  %v434_v35 = vadd.f32 %v1031_v5, %v366_v27 }
  0x29   : > { %556 = vst [vmem:[%s1050_s7 + $0x68] sm:$0xff] %v492_v13  ;;  %v435_v36 = vadd.f32 %v1031_v5, %v367_v28  ;;  %v436_v37 = vadd.f32 %v1031_v5, %v368_v29  ;;  %v437_v38 = vadd.f32 %v1031_v5, %v369_v30  ;;  %v438_v39 = vadd.f32 %v1031_v5, %v370_v31 }
  0x2a   : > { %557 = vst [vmem:[%s1050_s7 + $0x70] sm:$0xff] %v493_v14  ;;  %v495_v43 = vmax.f32 %v431_v32, 0.0  ;;  %v496_v44 = vmax.f32 %v432_v33, 0.0  ;;  %v497_v45 = vmax.f32 %v433_v34, 0.0  ;;  %v498_v46 = vmax.f32 %v434_v35, 0.0  ;;  %v864_v14 = vld [vmem:[%s1018_s26 + $0x80] sm:$0xff]  }
  0x2b   : > { %558 = vst [vmem:[%s1050_s7 + $0x78] sm:$0xff] %v494_v15  ;;  %v499_v48 = vmax.f32 %v435_v36, 0.0  ;;  %v500_v49 = vmax.f32 %v436_v37, 0.0  ;;  %v501_v50 = vmax.f32 %v437_v38, 0.0  ;;  %v502_v51 = vmax.f32 %v438_v39, 0.0  ;;  %v865_v15 = vld [vmem:[%s1018_s26 + $0x88] sm:$0xff]  }
  0x2c   : > { %559 = vst [vmem:[%s1050_s7 + $0x80] sm:$0xff] %v495_v43  ;;  %v771_v52 = vunpack.c.l.bf16 %v860_v40  ;;  %v772_v53 = vunpack.c.h.bf16 %v860_v40  ;;  %v775_v54 = vunpack.c.l.bf16 %v861_v41  ;;  %v776_v55 = vunpack.c.h.bf16 %v861_v41 }
  0x2d   : > { %560 = vst [vmem:[%s1050_s7 + $0x88] sm:$0xff] %v496_v44  ;;  %v779_v56 = vunpack.c.l.bf16 %v862_v42  ;;  %v780_v57 = vunpack.c.h.bf16 %v862_v42  ;;  %v783_v58 = vunpack.c.l.bf16 %v863_v47  ;;  %v784_v59 = vunpack.c.h.bf16 %v863_v47 }
  0x2e   : > { %561 = vst [vmem:[%s1050_s7 + $0x90] sm:$0xff] %v497_v45  ;;  %v371_v60 = vmul.f32 %v1023_v0, %v771_v52  ;;  %v372_v61 = vmul.f32 %v1023_v0, %v772_v53  ;;  %v373_v62 = vmul.f32 %v1023_v0, %v775_v54  ;;  %v374_v63 = vmul.f32 %v1023_v0, %v776_v55  ;;  %v870_v52 = vld [vmem:[%s1018_s26 + $0xb0] sm:$0xff]  }
  0x2f   : > { %562 = vst [vmem:[%s1050_s7 + $0x98] sm:$0xff] %v498_v46  ;;  %v375_v1 = vmul.f32 %v1023_v0, %v779_v56  ;;  %v376_v2 = vmul.f32 %v1023_v0, %v780_v57  ;;  %v377_v3 = vmul.f32 %v1023_v0, %v783_v58  ;;  %v378_v4 = vmul.f32 %v1023_v0, %v784_v59  ;;  %v871_v57 = vld [vmem:[%s1018_s26 + $0xb8] sm:$0xff]  }
  0x30   : > { %563 = vst [vmem:[%s1050_s7 + $0xa0] sm:$0xff] %v499_v48  ;;  %v439_v6 = vadd.f32 %v1031_v5, %v371_v60  ;;  %v440_v7 = vadd.f32 %v1031_v5, %v372_v61  ;;  %v441_v8 = vadd.f32 %v1031_v5, %v373_v62  ;;  %v442_v9 = vadd.f32 %v1031_v5, %v374_v63 }
  0x31   : > { %564 = vst [vmem:[%s1050_s7 + $0xa8] sm:$0xff] %v500_v49  ;;  %v443_v10 = vadd.f32 %v1031_v5, %v375_v1  ;;  %v444_v11 = vadd.f32 %v1031_v5, %v376_v2  ;;  %v445_v12 = vadd.f32 %v1031_v5, %v377_v3  ;;  %v446_v13 = vadd.f32 %v1031_v5, %v378_v4 }
  0x32   : > { %565 = vst [vmem:[%s1050_s7 + $0xb0] sm:$0xff] %v501_v50  ;;  %v503_v17 = vmax.f32 %v439_v6, 0.0  ;;  %v504_v18 = vmax.f32 %v440_v7, 0.0  ;;  %v505_v19 = vmax.f32 %v441_v8, 0.0  ;;  %v506_v20 = vmax.f32 %v442_v9, 0.0  ;;  %v868_v50 = vld [vmem:[%s1018_s26 + $0xa0] sm:$0xff]  }
  0x33   : > { %566 = vst [vmem:[%s1050_s7 + $0xb8] sm:$0xff] %v502_v51  ;;  %v507_v22 = vmax.f32 %v443_v10, 0.0  ;;  %v508_v23 = vmax.f32 %v444_v11, 0.0  ;;  %v509_v24 = vmax.f32 %v445_v12, 0.0  ;;  %v510_v25 = vmax.f32 %v446_v13, 0.0  ;;  %v869_v51 = vld [vmem:[%s1018_s26 + $0xa8] sm:$0xff]  }
  0x34   : > { %567 = vst [vmem:[%s1050_s7 + $0xc0] sm:$0xff] %v503_v17  ;;  %v787_v26 = vunpack.c.l.bf16 %v864_v14  ;;  %v788_v27 = vunpack.c.h.bf16 %v864_v14  ;;  %v791_v28 = vunpack.c.l.bf16 %v865_v15  ;;  %v792_v29 = vunpack.c.h.bf16 %v865_v15 }
  0x35   : > { %568 = vst [vmem:[%s1050_s7 + $0xc8] sm:$0xff] %v504_v18  ;;  %v795_v30 = vunpack.c.l.bf16 %v866_v16  ;;  %v796_v31 = vunpack.c.h.bf16 %v866_v16  ;;  %v799_v32 = vunpack.c.l.bf16 %v867_v21  ;;  %v800_v33 = vunpack.c.h.bf16 %v867_v21 }
  0x36   : > { %569 = vst [vmem:[%s1050_s7 + $0xd0] sm:$0xff] %v505_v19  ;;  %v379_v34 = vmul.f32 %v1023_v0, %v787_v26  ;;  %v380_v35 = vmul.f32 %v1023_v0, %v788_v27  ;;  %v381_v36 = vmul.f32 %v1023_v0, %v791_v28  ;;  %v382_v37 = vmul.f32 %v1023_v0, %v792_v29  ;;  %v874_v26 = vld [vmem:[%s1018_s26 + $0xd0] sm:$0xff]  }
  0x37   : > { %570 = vst [vmem:[%s1050_s7 + $0xd8] sm:$0xff] %v506_v20  ;;  %v383_v38 = vmul.f32 %v1023_v0, %v795_v30  ;;  %v384_v39 = vmul.f32 %v1023_v0, %v796_v31  ;;  %v385_v40 = vmul.f32 %v1023_v0, %v799_v32  ;;  %v386_v41 = vmul.f32 %v1023_v0, %v800_v33  ;;  %v875_v31 = vld [vmem:[%s1018_s26 + $0xd8] sm:$0xff]  }
  0x38   : > { %571 = vst [vmem:[%s1050_s7 + $0xe0] sm:$0xff] %v507_v22  ;;  %v447_v42 = vadd.f32 %v1031_v5, %v379_v34  ;;  %v448_v43 = vadd.f32 %v1031_v5, %v380_v35  ;;  %v449_v44 = vadd.f32 %v1031_v5, %v381_v36  ;;  %v450_v45 = vadd.f32 %v1031_v5, %v382_v37 }
  0x39   : > { %572 = vst [vmem:[%s1050_s7 + $0xe8] sm:$0xff] %v508_v23  ;;  %v451_v46 = vadd.f32 %v1031_v5, %v383_v38  ;;  %v452_v47 = vadd.f32 %v1031_v5, %v384_v39  ;;  %v453_v48 = vadd.f32 %v1031_v5, %v385_v40  ;;  %v454_v49 = vadd.f32 %v1031_v5, %v386_v41 }
  0x3a   : > { %573 = vst [vmem:[%s1050_s7 + $0xf0] sm:$0xff] %v509_v24  ;;  %v511_v53 = vmax.f32 %v447_v42, 0.0  ;;  %v512_v54 = vmax.f32 %v448_v43, 0.0  ;;  %v513_v55 = vmax.f32 %v449_v44, 0.0  ;;  %v514_v56 = vmax.f32 %v450_v45, 0.0  ;;  %v872_v24 = vld [vmem:[%s1018_s26 + $0xc0] sm:$0xff]  }
  0x3b   : > { %574 = vst [vmem:[%s1050_s7 + $0xf8] sm:$0xff] %v510_v25  ;;  %v515_v58 = vmax.f32 %v451_v46, 0.0  ;;  %v516_v59 = vmax.f32 %v452_v47, 0.0  ;;  %v517_v60 = vmax.f32 %v453_v48, 0.0  ;;  %v518_v61 = vmax.f32 %v454_v49, 0.0  ;;  %v873_v25 = vld [vmem:[%s1018_s26 + $0xc8] sm:$0xff]  }
  0x3c   : > { %575 = vst [vmem:[%s1050_s7 + $0x100] sm:$0xff] %v511_v53  ;;  %v803_v62 = vunpack.c.l.bf16 %v868_v50  ;;  %v804_v63 = vunpack.c.h.bf16 %v868_v50  ;;  %v807_v1 = vunpack.c.l.bf16 %v869_v51  ;;  %v808_v2 = vunpack.c.h.bf16 %v869_v51 }
  0x3d   : > { %576 = vst [vmem:[%s1050_s7 + $0x108] sm:$0xff] %v512_v54  ;;  %v811_v3 = vunpack.c.l.bf16 %v870_v52  ;;  %v812_v4 = vunpack.c.h.bf16 %v870_v52  ;;  %v815_v6 = vunpack.c.l.bf16 %v871_v57  ;;  %v816_v7 = vunpack.c.h.bf16 %v871_v57 }
  0x3e   : > { %577 = vst [vmem:[%s1050_s7 + $0x110] sm:$0xff] %v513_v55  ;;  %v387_v8 = vmul.f32 %v1023_v0, %v803_v62  ;;  %v388_v9 = vmul.f32 %v1023_v0, %v804_v63  ;;  %v389_v10 = vmul.f32 %v1023_v0, %v807_v1  ;;  %v390_v11 = vmul.f32 %v1023_v0, %v808_v2  ;;  %v878_v62 = vld [vmem:[%s1018_s26 + $0xf0] sm:$0xff]  }
  0x3f   : > { %578 = vst [vmem:[%s1050_s7 + $0x118] sm:$0xff] %v514_v56  ;;  %v391_v12 = vmul.f32 %v1023_v0, %v811_v3  ;;  %v392_v13 = vmul.f32 %v1023_v0, %v812_v4  ;;  %v393_v14 = vmul.f32 %v1023_v0, %v815_v6  ;;  %v394_v15 = vmul.f32 %v1023_v0, %v816_v7  ;;  %v879_v4 = vld [vmem:[%s1018_s26 + $0xf8] sm:$0xff]  }
  0x40   : > { %579 = vst [vmem:[%s1050_s7 + $0x120] sm:$0xff] %v515_v58  ;;  %v455_v16 = vadd.f32 %v1031_v5, %v387_v8  ;;  %v456_v17 = vadd.f32 %v1031_v5, %v388_v9  ;;  %v457_v18 = vadd.f32 %v1031_v5, %v389_v10  ;;  %v458_v19 = vadd.f32 %v1031_v5, %v390_v11 }
  0x41   : > { %580 = vst [vmem:[%s1050_s7 + $0x128] sm:$0xff] %v516_v59  ;;  %v459_v20 = vadd.f32 %v1031_v5, %v391_v12  ;;  %v460_v21 = vadd.f32 %v1031_v5, %v392_v13  ;;  %v461_v22 = vadd.f32 %v1031_v5, %v393_v14  ;;  %v462_v23 = vadd.f32 %v1031_v5, %v394_v15 }
  0x42   : > { %581 = vst [vmem:[%s1050_s7 + $0x130] sm:$0xff] %v517_v60  ;;  %v519_v27 = vmax.f32 %v455_v16, 0.0  ;;  %v520_v28 = vmax.f32 %v456_v17, 0.0  ;;  %v521_v29 = vmax.f32 %v457_v18, 0.0  ;;  %v522_v30 = vmax.f32 %v458_v19, 0.0  ;;  %v876_v60 = vld [vmem:[%s1018_s26 + $0xe0] sm:$0xff]  }
  0x43   : > { %582 = vst [vmem:[%s1050_s7 + $0x138] sm:$0xff] %v518_v61  ;;  %v523_v32 = vmax.f32 %v459_v20, 0.0  ;;  %v524_v33 = vmax.f32 %v460_v21, 0.0  ;;  %v525_v34 = vmax.f32 %v461_v22, 0.0  ;;  %v526_v35 = vmax.f32 %v462_v23, 0.0  ;;  %v877_v61 = vld [vmem:[%s1018_s26 + $0xe8] sm:$0xff]  }
  0x44   : > { %583 = vst [vmem:[%s1050_s7 + $0x140] sm:$0xff] %v519_v27  ;;  %v819_v36 = vunpack.c.l.bf16 %v872_v24  ;;  %v820_v37 = vunpack.c.h.bf16 %v872_v24  ;;  %v823_v38 = vunpack.c.l.bf16 %v873_v25  ;;  %v824_v39 = vunpack.c.h.bf16 %v873_v25 }
  0x45   : > { %584 = vst [vmem:[%s1050_s7 + $0x148] sm:$0xff] %v520_v28  ;;  %v827_v40 = vunpack.c.l.bf16 %v874_v26  ;;  %v828_v41 = vunpack.c.h.bf16 %v874_v26  ;;  %v831_v42 = vunpack.c.l.bf16 %v875_v31  ;;  %v832_v43 = vunpack.c.h.bf16 %v875_v31 }
  0x46   : > { %585 = vst [vmem:[%s1050_s7 + $0x150] sm:$0xff] %v521_v29  ;;  %v395_v44 = vmul.f32 %v1023_v0, %v819_v36  ;;  %v396_v45 = vmul.f32 %v1023_v0, %v820_v37  ;;  %v397_v46 = vmul.f32 %v1023_v0, %v823_v38  ;;  %v398_v47 = vmul.f32 %v1023_v0, %v824_v39 }
  0x47   : > { %586 = vst [vmem:[%s1050_s7 + $0x158] sm:$0xff] %v522_v30  ;;  %v399_v48 = vmul.f32 %v1023_v0, %v827_v40  ;;  %v400_v49 = vmul.f32 %v1023_v0, %v828_v41  ;;  %v401_v50 = vmul.f32 %v1023_v0, %v831_v42  ;;  %v402_v51 = vmul.f32 %v1023_v0, %v832_v43 }
  0x48   : > { %587 = vst [vmem:[%s1050_s7 + $0x160] sm:$0xff] %v523_v32  ;;  %v463_v52 = vadd.f32 %v1031_v5, %v395_v44  ;;  %v464_v53 = vadd.f32 %v1031_v5, %v396_v45  ;;  %v465_v54 = vadd.f32 %v1031_v5, %v397_v46  ;;  %v466_v55 = vadd.f32 %v1031_v5, %v398_v47 }
  0x49   : > { %588 = vst [vmem:[%s1050_s7 + $0x168] sm:$0xff] %v524_v33  ;;  %v467_v56 = vadd.f32 %v1031_v5, %v399_v48  ;;  %v468_v57 = vadd.f32 %v1031_v5, %v400_v49  ;;  %v469_v58 = vadd.f32 %v1031_v5, %v401_v50  ;;  %v470_v59 = vadd.f32 %v1031_v5, %v402_v51 }
  0x4a   : > { %589 = vst [vmem:[%s1050_s7 + $0x170] sm:$0xff] %v525_v34  ;;  %v527_v63 = vmax.f32 %v463_v52, 0.0  ;;  %v528_v1 = vmax.f32 %v464_v53, 0.0  ;;  %v529_v2 = vmax.f32 %v465_v54, 0.0  ;;  %v530_v3 = vmax.f32 %v466_v55, 0.0 }
  0x4b   : > { %590 = vst [vmem:[%s1050_s7 + $0x178] sm:$0xff] %v526_v35  ;;  %v531_v6 = vmax.f32 %v467_v56, 0.0  ;;  %v532_v7 = vmax.f32 %v468_v57, 0.0  ;;  %v533_v8 = vmax.f32 %v469_v58, 0.0  ;;  %v534_v9 = vmax.f32 %v470_v59, 0.0 }
  0x4c   : > { %591 = vst [vmem:[%s1050_s7 + $0x180] sm:$0xff] %v527_v63  ;;  %v835_v10 = vunpack.c.l.bf16 %v876_v60  ;;  %v836_v11 = vunpack.c.h.bf16 %v876_v60  ;;  %v839_v12 = vunpack.c.l.bf16 %v877_v61  ;;  %v840_v13 = vunpack.c.h.bf16 %v877_v61 }
  0x4d   : > { %592 = vst [vmem:[%s1050_s7 + $0x188] sm:$0xff] %v528_v1  ;;  %v843_v14 = vunpack.c.l.bf16 %v878_v62  ;;  %v844_v15 = vunpack.c.h.bf16 %v878_v62  ;;  %v847_v16 = vunpack.c.l.bf16 %v879_v4  ;;  %v848_v17 = vunpack.c.h.bf16 %v879_v4 }
  0x4e   : > { %593 = vst [vmem:[%s1050_s7 + $0x190] sm:$0xff] %v529_v2  ;;  %v403_v18 = vmul.f32 %v1023_v0, %v835_v10  ;;  %v404_v19 = vmul.f32 %v1023_v0, %v836_v11  ;;  %v405_v20 = vmul.f32 %v1023_v0, %v839_v12  ;;  %v406_v21 = vmul.f32 %v1023_v0, %v840_v13 }
  0x4f   : > { %594 = vst [vmem:[%s1050_s7 + $0x198] sm:$0xff] %v530_v3  ;;  %v407_v22 = vmul.f32 %v1023_v0, %v843_v14  ;;  %v408_v23 = vmul.f32 %v1023_v0, %v844_v15  ;;  %v409_v24 = vmul.f32 %v1023_v0, %v847_v16  ;;  %v410_v25 = vmul.f32 %v1023_v0, %v848_v17 }
  0x50   : > { %595 = vst [vmem:[%s1050_s7 + $0x1a0] sm:$0xff] %v531_v6  ;;  %v471_v26 = vadd.f32 %v1031_v5, %v403_v18  ;;  %v472_v27 = vadd.f32 %v1031_v5, %v404_v19  ;;  %v473_v28 = vadd.f32 %v1031_v5, %v405_v20  ;;  %v474_v29 = vadd.f32 %v1031_v5, %v406_v21 }
  0x51   : > { %596 = vst [vmem:[%s1050_s7 + $0x1a8] sm:$0xff] %v532_v7  ;;  %v475_v30 = vadd.f32 %v1031_v5, %v407_v22  ;;  %v476_v31 = vadd.f32 %v1031_v5, %v408_v23  ;;  %v478_v0 = vadd.f32 %v1031_v5, %v410_v25  ;;  %v477_v35 = vadd.f32 %v1031_v5, %v409_v24 }
  0x52   : > { %597 = vst [vmem:[%s1050_s7 + $0x1b0] sm:$0xff] %v533_v8  ;;  %v535_v32 = vmax.f32 %v471_v26, 0.0  ;;  %v536_v33 = vmax.f32 %v472_v27, 0.0  ;;  %v537_v34 = vmax.f32 %v473_v28, 0.0  ;;  %v538_v36 = vmax.f32 %v474_v29, 0.0 }
  0x53   : > { %598 = vst [vmem:[%s1050_s7 + $0x1b8] sm:$0xff] %v534_v9  ;;  %v539_v37 = vmax.f32 %v475_v30, 0.0  ;;  %v540_v38 = vmax.f32 %v476_v31, 0.0  ;;  %v541_v39 = vmax.f32 %v477_v35, 0.0  ;;  %v542_v40 = vmax.f32 %v478_v0, 0.0 }
  0x54   : > { %599 = vst [vmem:[%s1050_s7 + $0x1c0] sm:$0xff] %v535_v32 }
  0x55   : > { %600 = vst [vmem:[%s1050_s7 + $0x1c8] sm:$0xff] %v536_v33 }
  0x56   : > { %601 = vst [vmem:[%s1050_s7 + $0x1d0] sm:$0xff] %v537_v34 }
  0x57   : > { %602 = vst [vmem:[%s1050_s7 + $0x1d8] sm:$0xff] %v538_v36 }
  0x58   : > { %603 = vst [vmem:[%s1050_s7 + $0x1e0] sm:$0xff] %v539_v37 }
  0x59   : > { %604 = vst [vmem:[%s1050_s7 + $0x1e8] sm:$0xff] %v540_v38 }
  0x5a   : > { %605 = vst [vmem:[%s1050_s7 + $0x1f0] sm:$0xff] %v541_v39 }
  0x5b   : > { %606 = vst [vmem:[%s1050_s7 + $0x1f8] sm:$0xff] %v542_v40 }
  0x5c PF: > { %s13_s16 = sadd.s32 1, %s960_s16   ;;  %s1279_s12 = smov %s952_s14 }
  0x5d   : > { %p10_p7 = scmp.ge.s32.totalorder %s13_s16, 6   ;;  %s1280_s13 = smov %s956_s15 }
  0x5e   : > { %s1281_s14 = smov %s1284_s17  ;;  %s1282_s15 = smov %s1288_s18 }
  0x5f   :  { %12 = sbr.rel (!%p10_p7) target bundleno = 3 (0x3), region = 62 }

// kernel: up_conv_forward.2
= control target key start
LH: loop header
LB: loop body
LE: loop exit
PB: predicated region body
PF: predicated region fallthrough
CT: control target
= control target key end

     0   :  { %s7714_s24 = smov 0   ;;  %s7716_s25 = smov 0   ;;  %s9799_s0 = inlined_call_operand.vmem [shape: bf16[2,16,32,4], index: 0, kind: input, shape index: {}]   ;;  %s9800_s1 = inlined_call_operand.vmem [shape: bf16[2,2,32,4], index: 1, kind: input, shape index: {}]   ;;  %s9801_s2 = inlined_call_operand.vmem [shape: bf16[2,2,32,4], index: 2, kind: input, shape index: {}]   ;;  %s9802_s3 = inlined_call_operand.vmem [shape: bf16[9,4,128], index: 3, kind: input, shape index: {}]   ;;  %s9803_s4 = inlined_call_operand.vmem [shape: f32[1,128], index: 4, kind: input, shape index: {}]   ;;  %s9804_s5 = inlined_call_operand.vmem [shape: bf16[2,32,32,128], index: 5, kind: output, shape index: {0}]   ;;  %s9805_s6 = inlined_call_operand.vmem [shape: f32[2,2,1,128], index: 6, kind: output, shape index: {1}]   ;;  %s9806_s7 = inlined_call_operand.vmem [shape: f32[2,2,1,128], index: 7, kind: output, shape index: {2}]  }
   0x1   :  { %s7718_s26 = smov 0   ;;  %s7720_s27 = smov 0  }
   0x2   :  { %s7722_s28 = smov 0  }
   0x3 LB: > { %s33_s29 = sadd.s32 1, %s7662_s26  ;;  %s37_s30 = sadd.s32 1, %s7666_s27  ;;  %s7670_s28 = sphi %s7722_s28, %s18_s28   ;;  %s7666_s27 = sphi %s7720_s27, %s10277_s27   ;;  %s7662_s26 = sphi %s7718_s26, %s10276_s26   ;;  %s7658_s25 = sphi %s7716_s25, %s10275_s25   ;;  %s7654_s24 = sphi %s7714_s24, %s10274_s24  }
   0x4   : > { %p35_p0 = scmp.ge.s32.totalorder %s33_s29, 2  ;;  %p6760_p1 = scmp.ge.s32.totalorder %s7670_s28, 1 }
   0x5   : > { %p330_p2 = scmp.lt.s32.totalorder %s7670_s28, 5 }
   0x6   : > { %s10279_s29 = smov (%p35_p0, %s33_s29), 0  ;;  %s10281_s30 = smov (!%p35_p0, %s37_s30), %s7666_s27 }
   0x7   : > { %p331_p3 = pnand %p6760_p1, %p330_p2  ;;  %p39_p4 = scmp.ge.s32.totalorder %s10281_s30, 2 }
   0x9   : > { %s10283_s30 = smov (%p39_p4, %s10281_s30), 0  ;;  %334 = sbr.rel (%p331_p3) target bundleno = 1340 (0x53c), region = 40 }
   0xe   : > { %v7076_v0 = vld [vmem:[%s9802_s3 + $0x2] sm:$0x3]  ;;  %vm3696_vm0 = vcmask 1041408   ;;  %s6761_s10 = sshll.u32 %s7654_s24, 3  ;;  %p421_p5 = scmp.lt.s32.totalorder %s7658_s25, 1  ;;  %vm3599_vm2 = vcmask 31744  }
   0xf   : > { %v3698_v1 = vsel %vm3696_vm0, %v7076_v0, 0  ;;  %p423_p6 = scmp.lt.s32.totalorder %s6761_s10, 15  ;;  %v7141_v2 = vld [vmem:[%s9802_s3 + $0x4] sm:$0x3]  ;;  %v7174_v4 = vld [vmem:[%s9802_s3 + $0x6] sm:$0x3] }
  0x10   : > { %7585 = vmatpush.bf16.msra.mxu1 %v3698_v1  ;;  %7586 = vmatpush.bf16.msra.mxu2 %v3698_v1  ;;  %s10285_s25 = smov (!%p421_p5, %s7658_s25), 1  ;;  %v4335_v3 = vsel %vm3696_vm0, %v7141_v2, 0  ;;  %v3384_v5 = vld [vmem:[%s9802_s3] sm:$0x3]  ;;  %p433_p7 = scmp.lt.s32.totalorder %s7654_s24, 1  ;;  %v4579_v6 = vsel %vm3696_vm0, %v7174_v4, 0 }
  0x11   : > { %7587 = vmatpush.bf16.msra.mxu3 %v3698_v1  ;;  %3707 = vmatpush.bf16.msra.mxu0 %v3698_v1  ;;  %s10287_s10 = smov (!%p423_p6, %s6761_s10), 15  ;;  %s6763_s13 = sshll.u32 %s10285_s25, 6  ;;  %v3966_v7 = vsel %vm3696_vm0, %v3384_v5, 0  ;;  %v7207_v8 = vld [vmem:[%s9802_s3 + $0x8] sm:$0x3]  ;;  %vm830_vm4 = vcmask 1040384  }
  0x12   : > { %s6762_s18 = sshll.u32 %s10287_s10, 2  ;;  %v4832_v9 = vsel %vm3696_vm0, %v7207_v8, 0  ;;  %s6766_s10 = sshll.u32 %s10285_s25, 3  ;;  %vm633_vm1 = vsmask.f32 256  ;;  %vm7672_vm11 = vmmov 0  }
  0x13   : > { %s427_s21 = sadd.s32 %s6763_s13, %s6762_s18  ;;  %vm3387_vm3 = vsmask.f32 7424  ;;  %vm7870_vm5 = vmand %vm830_vm4, %vm633_vm1 }
  0x14   : > { %4344 = vmatpush.bf16.msrb.mxu2 %v4335_v3  ;;  %3975 = vmatpush.bf16.msrb.mxu1 %v3966_v7  ;;  %s6764_s22 = sshll.u32 %s427_s21, 2  ;;  %vm2074_vm12 = vmpackc.low %vm7672_vm11, %vm7672_vm11 }
  0x15   : > { %4588 = vmatpush.bf16.msrb.mxu3 %v4579_v6  ;;  %4841 = vmatpush.bf16.msrb.mxu0 %v4832_v9  ;;  %s7774_s9 = scalar_lea.vmem %s9799_s0, %s6764_s22 }
  0x16   : > { %v7376_v10 = vld [vmem:[%s7774_s9 + $0x10] sm:$0xff]  ;;  %v7377_v11 = vld [vmem:[%s7774_s9 + $0x18] sm:$0xff]  ;;  %s7783_s11 = scalar_select %p433_p7, %s7654_s24, 1  ;;  %v7378_v39 = vld [vmem:[%s7774_s9 + $0x20] sm:$0xff] }
  0x17   : > { %v7380_v12 = vld [vmem:[%s7774_s9 + $0x30] sm:$0xff]  ;;  %v7381_v13 = vld [vmem:[%s7774_s9 + $0x38] sm:$0xff]  ;;  %v667_v16 = vshrl.u32 %v7376_v10, 16  ;;  %v670_v17 = vshll.u32 %v7376_v10, 16  ;;  %v675_v18 = vshrl.u32 %v7377_v11, 16  ;;  %v678_v19 = vshll.u32 %v7377_v11, 16 }
  0x18   : > { %v7384_v14 = vld [vmem:[%s7774_s9 + $0x50] sm:$0xff]  ;;  %v7385_v15 = vld [vmem:[%s7774_s9 + $0x58] sm:$0xff]  ;;  %s6765_s12 = sshll.u32 %s7783_s11, 2  ;;  %v701_v20 = vshrl.u32 %v7380_v12, 16  ;;  %v704_v21 = vshll.u32 %v7380_v12, 16  ;;  %v709_v22 = vshrl.u32 %v7381_v13, 16 }
  0x19   : > { %v712_v23 = vshll.u32 %v7381_v13, 16  ;;  %s7789_s13 = sadd.s32 %s6766_s10, %s6765_s12  ;;  %v669_v24 = vrot.slane %v667_v16, 7  ;;  %v7791_v25 = vrot.slane %v675_v18, 7  ;;  %v735_v26 = vshrl.u32 %v7384_v14, 16  ;;  %v7382_v0 = vld [vmem:[%s7774_s9 + $0x40] sm:$0xff] }
  0x1a   : > { %v738_v27 = vshll.u32 %v7384_v14, 16  ;;  %s6767_s14 = sshll.u32 %s7789_s13, 2  ;;  %v703_v28 = vrot.slane %v701_v20, 7  ;;  %v7794_v29 = vrot.slane %v709_v22, 7  ;;  %v743_v30 = vshrl.u32 %v7385_v15, 16  ;;  %s6771_s13 = sshll.u32 %s7654_s24, 4 }
  0x1b   : > { %s439_s17 = scalar_lea.vmem %s9800_s1, %s6767_s14  ;;  %v7801_v31 = vor.u32 %v670_v17, %v669_v24  ;;  %v680_v32 = vor.u32 %v678_v19, %v7791_v25  ;;  %v737_v33 = vrot.slane %v735_v26, 7  ;;  %v746_v34 = vshll.u32 %v7385_v15, 16  ;;  %v7386_v17 = vld [vmem:[%s7774_s9 + $0x60] sm:$0xff]  ;;  %s9146_s15 = scalar_lea.vmem %s9801_s2, %s6767_s14 }
  0x1c   : > { %v7390_v35 = vld [vmem:[%s439_s17] sm:$0xff]  ;;  %v7804_v36 = vor.u32 %v704_v21, %v703_v28  ;;  %v714_v37 = vor.u32 %v712_v23, %v7794_v29  ;;  %v7807_v38 = vrot.slane %v743_v30, 7  ;;  %v7391_v54 = vld [vmem:[%s439_s17 + $0x8] sm:$0xff]  ;;  %v684_v55 = vshrl.u32 %v7378_v39, 16  ;;  %p459_p8 = scmp.lt.s32.totalorder %s6771_s13, 31  ;;  %s6773_s14 = sshll.u32 %s10285_s25, 7 }
  0x1d   : > { %v7811_v40 = vsel %vm633_vm1, %v669_v24, %v680_v32  ;;  %v7816_v41 = vsel %vm633_vm1, %v7791_v25, %v7801_v31  ;;  %v7818_v42 = vor.u32 %v738_v27, %v737_v33  ;;  %v635_v46 = vshrl.u32 %v7390_v35, 16  ;;  %v7374_v32 = vld [vmem:[%s7774_s9] sm:$0xff] }
  0x1e   : > { %v3437_v43 = vshll.u32 %v7811_v40, 16  ;;  %v3445_v44 = vshll.u32 %v7816_v41, 16  ;;  %v3449_v45 = vshrl.u32 %v7816_v41, 16  ;;  %v7824_v47 = vsel %vm633_vm1, %v703_v28, %v714_v37  ;;  %s10289_s13 = smov (!%p459_p8, %s6771_s13), 31 }
  0x1f   : > { %v7829_v48 = vsel %vm633_vm1, %v7794_v29, %v7804_v36  ;;  %v748_v49 = vor.u32 %v746_v34, %v7807_v38  ;;  %v7835_v50 = vsel %vm633_vm1, %v7807_v38, %v7818_v42  ;;  %v3487_v53 = vshll.u32 %v7824_v47, 16  ;;  %s6772_s24 = sshll.u32 %s10289_s13, 2 }
  0x20   : > { %9923 = vst [vmem:[#allocation2_spill] sm:$0xff] %v7835_v50  ;;  %v7837_v51 = vrot.slane %v3437_v43, 1  ;;  %v7839_v52 = vrot.slane %v3445_v44, 1  ;;  %v3495_v56 = vshll.u32 %v7829_v48, 16  ;;  %v3499_v57 = vshrl.u32 %v7829_v48, 16  ;;  %s466_s18 = sadd.s32 %s6773_s14, %s6772_s24 }
  0x21   : > { %v7845_v58 = vsel %vm633_vm1, %v737_v33, %v748_v49  ;;  %v3545_v59 = vshll.u32 %v7835_v50, 16  ;;  %v7849_v61 = vrot.slane %v3487_v53, 1  ;;  %v687_v63 = vshll.u32 %v7378_v39, 16  ;;  %v7379_v53 = vld [vmem:[%s7774_s9 + $0x28] sm:$0xff]  ;;  %s6774_s19 = sshll.u32 %s466_s18, 2 }
  0x22   : > { %9924 = vst [vmem:[#allocation3_spill] sm:$0xff] %v7845_v58  ;;  %v3451_v60 = vor.u32 %v3449_v45, %v7839_v52  ;;  %v3537_v62 = vshll.u32 %v7845_v58, 16  ;;  %v7853_v1 = vrot.slane %v3495_v56, 1  ;;  %v3549_v3 = vshrl.u32 %v7835_v50, 16  ;;  %s9370_s22 = scalar_lea.vmem %s9804_s5, %s6774_s19 }
  0x23   : > { %v7855_v2 = vrot.slane %v3545_v59, 1  ;;  %v637_v4 = vrot.slane %v635_v46, 7  ;;  %v638_v7 = vshll.u32 %v7390_v35, 16  ;;  %v642_v8 = vshrl.u32 %v7391_v54, 16 }
  0x24   : > { %v7860_v5 = vsel %vm3387_vm3, %v3451_v60, %v7837_v51  ;;  %v7862_v6 = vrot.slane %v3537_v62, 1  ;;  %v3501_v9 = vor.u32 %v3499_v57, %v7853_v1  ;;  %v645_v11 = vshll.u32 %v7391_v54, 16 }
  0x25   : > { %9925 = vst [vmem:[#allocation4_spill] sm:$0xff] %v7860_v5  ;;  %7085 = vmatmul.msk.bf16.vlgmr.msra.gmra.mxu1 %vm3599_vm2, %v7860_v5  ;;  %v3551_v10 = vor.u32 %v3549_v3, %v7855_v2  ;;  %v9926_v12 = vmov 0  ;;  %v7874_v13 = vrot.slane %v684_v55, 7  ;;  %v640_v14 = vor.u32 %v638_v7, %v637_v4 }
  0x26   : > { %v9927_v12 = vsel %vm7870_vm5, 4294967295, %v9926_v12  ;;  %v644_v15 = vrot.slane %v642_v8, 7  ;;  %v718_v16 = vshrl.u32 %v7382_v0, 16  ;;  %v7879_v18 = vsel %vm3387_vm3, %v3501_v9, %v7849_v61 }
  0x27   : > { %9928 = vst [vmem:[#allocation5_spill] sm:$0xff] %v9927_v12  ;;  %v7883_v19 = vsel %vm3387_vm3, %v3551_v10, %v7862_v6  ;;  %v7886_v20 = vor.u32 %v687_v63, %v7874_v13  ;;  %v721_v21 = vshll.u32 %v7382_v0, 16  ;;  %7093 = vmatmul.msk.bf16.vlgmr.msra.gmra.mxu2 %vm3599_vm2, %v7879_v18  ;;  %v7894_v23 = vsel %vm7870_vm5, 0, %v640_v14  ;;  %v7383_v63 = vld [vmem:[%s7774_s9 + $0x48] sm:$0xff] }
  0x28   : > { %9929 = vst [vmem:[#allocation6_spill] sm:$0xff] %v7883_v19  ;;  %7101 = vmatmul.msk.bf16.vlgmr.msra.gmra.mxu3 %vm3599_vm2, %v7883_v19  ;;  %v647_v22 = vor.u32 %v645_v11, %v644_v15  ;;  %v7896_v24 = vrot.slane %v718_v16, 7  ;;  %v3389_v26 = vshrl.u32 %v7894_v23, 16  ;;  %v3391_v27 = vshll.u32 %v7894_v23, 16 }
  0x29   : > { %v7903_v28 = vsel %vm633_vm1, %v7791_v25, %v7886_v20  ;;  %v3441_v30 = vshrl.u32 %v7811_v40, 16  ;;  %v752_v37 = vshrl.u32 %v7386_v17, 16  ;;  %v755_v44 = vshll.u32 %v7386_v17, 16 }
  0x2a   : > { %v7908_v33 = vsel %vm633_vm1, %v637_v4, %v647_v22  ;;  %v3454_v34 = vshll.u32 %v7903_v28, 16  ;;  %v7912_v35 = vor.u32 %v721_v21, %v7896_v24  ;;  %v3393_v39 = vrot.slane %v3391_v27, 1  ;;  %v7387_v4 = vld [vmem:[%s7774_s9 + $0x68] sm:$0xff] }
  0x2b   : > { %v3396_v43 = vshll.u32 %v7908_v33, 16  ;;  %v3491_v45 = vshrl.u32 %v7824_v47, 16  ;;  %v754_v46 = vrot.slane %v752_v37, 7  ;;  %v3541_v49 = vshrl.u32 %v7845_v58, 16 }
  0x2c   : > { %v7918_v25 = vsel %vm633_vm1, %v7794_v29, %v7912_v35  ;;  %v3394_v54 = vor.u32 %v3393_v39, %v3389_v26  ;;  %v650_v57 = vshrl.u32 %v7374_v32, 16  ;;  %v7925_v59 = vor.u32 %v3441_v30, %v7837_v51 }
  0x2d   : > { %v3398_v55 = vrot.slane %v3396_v43, 1  ;;  %v3504_v56 = vshll.u32 %v7918_v25, 16  ;;  %v3456_v60 = vrot.slane %v3454_v34, 1  ;;  %v7927_v62 = vor.u32 %v755_v44, %v754_v46 }
  0x2e   : > { %v653_v29 = vshll.u32 %v7374_v32, 16  ;;  %v652_v3 = vrot.slane %v650_v57, 7  ;;  %v7934_v7 = vor.u32 %v3491_v45, %v7849_v61  ;;  %v692_v9 = vshrl.u32 %v7379_v53, 16 }
  0x2f   : > { %v3399_v0 = vsel %vm3387_vm3, %v3394_v54, %v3398_v55  ;;  %v7939_v8 = vsel %vm633_vm1, %v7807_v38, %v7927_v62  ;;  %v695_v10 = vshll.u32 %v7379_v53, 16  ;;  %v3506_v11 = vrot.slane %v3504_v56, 1  ;;  %v7375_v38 = vld [vmem:[%s7774_s9 + $0x8] sm:$0xff] }
  0x30   : > { %7077 = vmatmul.msk.bf16.vlgmr.msra.gmra.mxu0 %vm3599_vm2, %v3399_v0  ;;  %9930 = vst [vmem:[#allocation7_spill] sm:$0xff] %v7939_v8  ;;  %v7942_v14 = vor.u32 %v3541_v49, %v7862_v6  ;;  %v3554_v16 = vshll.u32 %v7939_v8, 16  ;;  %v7945_v17 = vor.u32 %v653_v29, %v652_v3  ;;  %v7949_v21 = vsel %vm3387_vm3, %v7925_v59, %v3456_v60 }
  0x31   : > { %9931 = vst [vmem:[#allocation8_spill] sm:$0xff] %v7949_v21  ;;  %v7951_v22 = vrot.slane %v692_v9, 7  ;;  %v726_v26 = vshrl.u32 %v7383_v63, 16  ;;  %v729_v27 = vshll.u32 %v7383_v63, 16  ;;  %v760_v34 = vshrl.u32 %v7387_v4, 16 }
  0x32   : > { %v3556_v30 = vrot.slane %v3554_v16, 1  ;;  %v7956_v32 = vsel %vm633_vm1, %v644_v15, %v7945_v17  ;;  %v3400_v37 = vshrl.u32 %v7908_v33, 16  ;;  %v763_v44 = vshll.u32 %v7387_v4, 16 }
  0x33   : > { %v697_v39 = vor.u32 %v695_v10, %v7951_v22  ;;  %v7960_v43 = vrot.slane %v726_v26, 7  ;;  %v7966_v45 = vsel %vm3387_vm3, %v7934_v7, %v3506_v11  ;;  %v3404_v15 = vshll.u32 %v7956_v32, 16 }
  0x34   : > { %v7970_v49 = vsel %vm3387_vm3, %v7942_v14, %v3556_v30  ;;  %v7973_v53 = vrot.slane %v760_v34, 7  ;;  %v658_v57 = vshrl.u32 %v7375_v38, 16  ;;  %v3402_v63 = vor.u32 %v3400_v37, %v3398_v55 }
  0x35   : > { %7086 = vmatmul.msk.bf16.gmra.mxu1 %vm3599_vm2, %v7949_v21  ;;  %9932 = vst [vmem:[#allocation9_spill] sm:$0xff] %v7970_v49  ;;  %v7977_v54 = vsel %vm633_vm1, %v7874_v13, %v697_v39  ;;  %v731_v56 = vor.u32 %v729_v27, %v7960_v43  ;;  %v3406_v0 = vrot.slane %v3404_v15, 1  ;;  %v3458_v4 = vshrl.u32 %v7903_v28, 16 }
  0x36   : > { %v765_v29 = vor.u32 %v763_v44, %v7973_v53  ;;  %v3462_v9 = vshll.u32 %v7977_v54, 16  ;;  %v7994_v16 = vrot.slane %v658_v57, 7  ;;  %v661_v26 = vshll.u32 %v7375_v38, 16 }
  0x37   : > { %7094 = vmatmul.msk.bf16.gmra.mxu2 %vm3599_vm2, %v7966_v45  ;;  %v7989_v13 = vsel %vm633_vm1, %v7896_v24, %v731_v56  ;;  %v3508_v27 = vshrl.u32 %v7918_v25, 16  ;;  %v3407_v34 = vsel %vm3387_vm3, %v3402_v63, %v3406_v0  ;;  %v3558_v37 = vshrl.u32 %v7939_v8, 16 }
  0x38   : > { %7102 = vmatmul.msk.bf16.gmra.mxu3 %vm3599_vm2, %v7970_v49  ;;  %v7992_v10 = vsel %vm633_vm1, %v754_v46, %v765_v29  ;;  %v3512_v55 = vshll.u32 %v7989_v13, 16  ;;  %v3460_v44 = vor.u32 %v3458_v4, %v3456_v60  ;;  %v3464_v15 = vrot.slane %v3462_v9, 1 }
  0x39   : > { %9933 = vst [vmem:[#allocation10_spill] sm:$0xff] %v7992_v10  ;;  %v3562_v39 = vshll.u32 %v7992_v10, 16  ;;  %v663_v24 = vor.u32 %v661_v26, %v7994_v16  ;;  %v3510_v46 = vor.u32 %v3508_v27, %v3506_v11  ;;  %v3560_v57 = vor.u32 %v3558_v37, %v3556_v30 }
  0x3a   : > { %v3514_v56 = vrot.slane %v3512_v55, 1  ;;  %v8004_v29 = vsel %vm3387_vm3, %v3460_v44, %v3464_v15  ;;  %v3408_v11 = vshrl.u32 %v7956_v32, 16  ;;  %v8022_v9 = vsel %vm633_vm1, %v7951_v22, %v7886_v20 }
  0x3b   : > { %v3564_v38 = vrot.slane %v3562_v39, 1  ;;  %v8007_v63 = vsel %vm633_vm1, %v652_v3, %v663_v24  ;;  %v3466_v27 = vshrl.u32 %v7977_v54, 16  ;;  %v8033_v55 = vsel %vm633_vm1, %v7960_v43, %v7912_v35 }
  0x3c   : > { %v8012_v60 = vsel %vm3387_vm3, %v3510_v46, %v3514_v56  ;;  %v3412_v30 = vshll.u32 %v8007_v63, 16  ;;  %v3410_v3 = vor.u32 %v3408_v11, %v3406_v0  ;;  %9935 = vst [vmem:[#allocation12_spill] sm:$0xff] %v8033_v55  ;;  %v8038_v20 = vsel %vm633_vm1, %v7973_v53, %v7927_v62 }
  0x3d   : > { %v8015_v4 = vsel %vm3387_vm3, %v3560_v57, %v3564_v38  ;;  %9936 = vst [vmem:[#allocation13_spill] sm:$0xff] %v8038_v20  ;;  %v3516_v37 = vshrl.u32 %v7989_v13, 16  ;;  %v3520_v0 = vshll.u32 %v8033_v55, 16  ;;  %v3566_v44 = vshrl.u32 %v7992_v10, 16  ;;  %v7388_v10 = vld [vmem:[%s7774_s9 + $0x70] sm:$0xff] }
  0x3e   : > { %9934 = vst [vmem:[#allocation11_spill] sm:$0xff] %v8015_v4  ;;  %v3414_v26 = vrot.slane %v3412_v30, 1  ;;  %v3570_v24 = vshll.u32 %v8038_v20, 16  ;;  %v3468_v46 = vor.u32 %v3466_v27, %v3464_v15  ;;  %v3524_v8 = vshrl.u32 %v8033_v55, 16 }
  0x3f   : > { %v3518_v35 = vor.u32 %v3516_v37, %v3514_v56  ;;  %v3522_v62 = vrot.slane %v3520_v0, 1  ;;  %v3568_v11 = vor.u32 %v3566_v44, %v3564_v38  ;;  %v3416_v37 = vshrl.u32 %v8007_v63, 16 }
  0x40   : > { %7078 = vmatmul.msk.bf16.gmra.mxu0 %vm3599_vm2, %v3407_v34  ;;  %v3470_v34 = vshll.u32 %v8022_v9, 16  ;;  %v8042_v39 = vsel %vm3387_vm3, %v3410_v3, %v3414_v26  ;;  %v3572_v30 = vrot.slane %v3570_v24, 1  ;;  %v8055_v3 = vsel %vm633_vm1, %v7994_v16, %v7945_v17 }
  0x41   : > { %v8060_v27 = vsel %vm3387_vm3, %v3518_v35, %v3522_v62  ;;  %v3420_v0 = vshll.u32 %v8055_v3, 16  ;;  %v3418_v17 = vor.u32 %v3416_v37, %v3414_v26  ;;  %v3474_v24 = vshrl.u32 %v8022_v9, 16 }
  0x42   : > { %v3472_v57 = vrot.slane %v3470_v34, 1  ;;  %9937 = vst [vmem:[#allocation14_spill] sm:$0xff] %v8060_v27  ;;  %v8063_v34 = vsel %vm3387_vm3, %v3568_v11, %v3572_v30  ;;  %v3574_v49 = vshrl.u32 %v8038_v20, 16  ;;  %v769_v50 = vshrl.u32 %v7388_v10, 16 }
  0x43   : > { %9938 = vst [vmem:[#allocation15_spill] sm:$0xff] %v8063_v34  ;;  %v3422_v44 = vrot.slane %v3420_v0, 1  ;;  %v3526_v58 = vor.u32 %v3524_v8, %v3522_v62  ;;  %v8107_v8 = vsel %vm633_vm1, %v7960_v43, %v7818_v42  ;;  %v834_v42 = vlaneseq }
  0x44   : > { %v8050_v12 = vsel %vm3387_vm3, %v3468_v46, %v3472_v57  ;;  %v3476_v19 = vor.u32 %v3474_v24, %v3472_v57  ;;  %v771_v0 = vrot.slane %v769_v50, 7  ;;  %v3424_v24 = vshrl.u32 %v8055_v3, 16  ;;  %9941 = vst [vmem:[#allocation18_spill] sm:$0xff] %v8107_v8 }
  0x45   : > { %7087 = vmatmul.msk.bf16.gmra.mxu1 %vm3599_vm2, %v8004_v29  ;;  %v8086_v55 = vsel %vm3387_vm3, %v3526_v58, %v3514_v56 }
  0x46   : > { %v8081_v37 = vsel %vm3387_vm3, %v3476_v19, %v3464_v15  ;;  %9939 = vst [vmem:[#allocation16_spill] sm:$0xff] %v8086_v55  ;;  %v8097_v19 = vsel %vm633_vm1, %v7951_v22, %v7804_v36  ;;  %v3426_v50 = vor.u32 %v3424_v24, %v3422_v44  ;;  %v7389_v36 = vld [vmem:[%s7774_s9 + $0x78] sm:$0xff]  ;;  %s6775_s9 = sshll.u32 %s10285_s25, 1 }
  0x47   : > { %7095 = vmatmul.msk.bf16.gmra.mxu2 %vm3599_vm2, %v8012_v60  ;;  %v3479_v58 = vshll.u32 %v8097_v19, 16  ;;  %s478_s10 = sadd.s32 %s6775_s9, %s7783_s11 }
  0x48   : > { %7103 = vmatmul.msk.bf16.gmra.mxu3 %vm3599_vm2, %v8015_v4  ;;  %v8074_v4 = vsel %vm3387_vm3, %v3418_v17, %v3422_v44  ;;  %v8116_v22 = vsel %vm3387_vm3, %v3426_v50, %v3414_v26  ;;  %s479_s13 = scalar_lea.vmem %s9805_s6, %s478_s10  ;;  %s489_s16 = scalar_lea.vmem %s9806_s7, %s478_s10 }
  0x49   : > { %9943 = vst [vmem:[#allocation20_spill] sm:$0xff] %v8116_v22  ;;  %v3481_v56 = vrot.slane %v3479_v58, 1 }
  0x4b   : > { %v8128_v26 = vsel %vm3387_vm3, %v3468_v46, %v3481_v56 }
  0x50   : > { %7079 = vmatmul.msk.bf16.gmra.mxu0 %vm3599_vm2, %v8042_v39 }
  0x55   : > { %7088 = vmatmul.msk.bf16.gmra.mxu1 %vm3599_vm2, %v8050_v12 }
  0x57   : > { %7096 = vmatmul.msk.bf16.gmra.mxu2 %vm3599_vm2, %v8060_v27  ;;  %v3576_v27 = vor.u32 %v3574_v49, %v3572_v30 }
  0x58   : > { %7104 = vmatmul.msk.bf16.gmra.mxu3 %vm3599_vm2, %v8063_v34  ;;  %v772_v34 = vshll.u32 %v7388_v10, 16  ;;  %v3529_v10 = vshll.u32 %v8107_v8, 16 }
  0x59   : > { %v8089_v57 = vsel %vm3387_vm3, %v3576_v27, %v3564_v38  ;;  %v777_v38 = vshrl.u32 %v7389_v36, 16  ;;  %v780_v27 = vshll.u32 %v7389_v36, 16 }
  0x5a   : > { %9940 = vst [vmem:[#allocation17_spill] sm:$0xff] %v8089_v57  ;;  %v8092_v20 = vor.u32 %v772_v34, %v771_v0  ;;  %v3531_v43 = vrot.slane %v3529_v10, 1  ;;  %v8132_v34 = vshrl.u32 %v834_v42, 7  ;;  %v3533_v42 = vshrl.u32 %v8107_v8, 16 }
  0x5b   : > { %v8130_v30 = vrot.slane %v777_v38, 7 }
  0x5c   : > { %v8112_v49 = vsel %vm633_vm1, %v7973_v53, %v8092_v20  ;;  %v8125_v53 = vsel %vm633_vm1, %v7994_v16, %v7801_v31  ;;  %9945 = vst [vmem:[#allocation22_spill] sm:$0xff] %v8132_v34  ;;  %v6857_v24 = vadd.s32 4294967295, %v8132_v34  ;;  %v8139_v50 = vsel %vm3387_vm3, %v3518_v35, %v3531_v43 }
  0x5d   : > { %9942 = vst [vmem:[#allocation19_spill] sm:$0xff] %v8112_v49  ;;  %v3579_v15 = vshll.u32 %v8112_v49, 16  ;;  %v3429_v44 = vshll.u32 %v8125_v53, 16  ;;  %v782_v16 = vor.u32 %v780_v27, %v8130_v30  ;;  %v3583_v27 = vshrl.u32 %v8112_v49, 16 }
  0x5e   : > { %9944 = vst [vmem:[#allocation21_spill] sm:$0xff] %v8130_v30  ;;  %v982_v46 = vsub.s32 0, %v6857_v24  ;;  %vm981_vm6 = vcmp.lt.s32.totalorder %v6857_v24, 0 }
  0x5f   : > { %v3581_v62 = vrot.slane %v3579_v15, 1  ;;  %9946 = vst [vmem:[#allocation23_spill] sm:$0xff] %v8139_v50  ;;  %v3431_v58 = vrot.slane %v3429_v44, 1  ;;  %v3483_v15 = vshrl.u32 %v8097_v19, 16  ;;  %v8151_v35 = vsel %vm633_vm1, %v771_v0, %v782_v16 }
  0x60   : > { %7080 = vmatmul.msk.bf16.gmra.mxu0 %vm3599_vm2, %v8074_v4  ;;  %v983_v36 = vsel %vm981_vm6, %v982_v46, %v6857_v24  ;;  %9948 = vst [vmem:[#allocation25_spill] sm:$0xff] %v8151_v35  ;;  %v3535_v0 = vor.u32 %v3533_v42, %v3531_v43  ;;  %v839_v46 = vadd.s32 32, %v8132_v34 }
  0x61   : > { %v8142_v31 = vsel %vm3387_vm3, %v3568_v11, %v3581_v62  ;;  %v985_v10 = vand.u32 31, %v983_v36  ;;  %v8154_v38 = vsel %vm3387_vm3, %v3418_v17, %v3431_v58  ;;  %v3585_v24 = vor.u32 %v3583_v27, %v3581_v62 }
  0x62   : > { %9947 = vst [vmem:[#allocation24_spill] sm:$0xff] %v8142_v31  ;;  %v6861_v62 = vadd.s32 4294967295, %v839_v46  ;;  %v7306_v46 = vld [vmem:[%s9802_s3 + $0xe] sm:$0x3] }
  0x63   : > { %v986_v11 = vsub.s32 0, %v985_v10  ;;  %9949 = vst [vmem:[#allocation26_spill] sm:$0xff] %v8154_v38 }
  0x65   : > { %7089 = vmatmul.msk.bf16.gmra.mxu1 %vm3599_vm2, %v8081_v37 }
  0x67   : > { %7097 = vmatmul.msk.bf16.gmra.mxu2 %vm3599_vm2, %v8086_v55 }
  0x68   : > { %7105 = vmatmul.msk.bf16.gmra.mxu3 %vm3599_vm2, %v8089_v57  ;;  %v3587_v57 = vshll.u32 %v8151_v35, 16 }
  0x6a   : > { %v8161_v16 = vrot.slane %v3587_v57, 1  ;;  %v3433_v57 = vshrl.u32 %v8125_v53, 16 }
  0x6c   : > { %9950 = vst [vmem:[#allocation27_spill] sm:$0xff] %v8161_v16  ;;  %v8176_v43 = vsel %vm3387_vm3, %v3585_v24, %v8161_v16 }
  0x6d   : > { %9952 = vst [vmem:[#allocation29_spill] sm:$0xff] %v8176_v43 }
  0x70   : > { %7081 = vmatmul.msk.bf16.gmra.mxu0 %vm3599_vm2, %v8116_v22 }
  0x75   : > { %7090 = vmatmul.msk.bf16.gmra.mxu1 %vm3599_vm2, %v8128_v26 }
  0x77   : > { %7098 = vmatmul.msk.bf16.gmra.mxu2 %vm3599_vm2, %v8139_v50  ;;  %v987_v50 = vsel %vm981_vm6, %v986_v11, %v985_v10 }
  0x78   : > { %7106 = vmatmul.msk.bf16.gmra.mxu3 %vm3599_vm2, %v8142_v31  ;;  %v3485_v31 = vor.u32 %v3483_v15, %v3481_v56  ;;  %vm1492_vm7 = vcmp.ne.s32.totalorder %v987_v50, 0  ;;  %vm1565_vm8 = vcmp.lt.s32.totalorder %v987_v50, 0  ;;  %v1711_v44 = vadd.s32 32, %v987_v50 }
  0x79   : > { %vm1638_vm9 = vmand %vm1565_vm8, %vm1492_vm7  ;;  %v8172_v56 = vsel %vm3387_vm3, %v3535_v0, %v7862_v6  ;;  %v8186_v6 = vsel %vm633_vm1, %v8130_v30, %v8092_v20  ;;  %v3591_v15 = vshrl.u32 %v8151_v35, 16  ;;  %v7273_v20 = vld [vmem:[%s9802_s3 + $0xc] sm:$0x3] }
  0x7a   : > { %v8165_v17 = vsel %vm3387_vm3, %v3485_v31, %v7849_v61  ;;  %v1784_v36 = vsel %vm1638_vm9, %v1711_v44, %v987_v50  ;;  %9951 = vst [vmem:[#allocation28_spill] sm:$0xff] %v8172_v56  ;;  %v3435_v61 = vor.u32 %v3433_v57, %v3431_v58  ;;  %v1013_v50 = vand.u32 31, %v6861_v62 }
  0x7b   : > { %vm2613_vm10 = vcmp.eq.s32.totalorder %v1784_v36, 0  ;;  %9953 = vst [vmem:[#allocation30_spill] sm:$0xff] %v8186_v6  ;;  %v9834_v31 = vmov 0   ;;  %vm1857_vm14 = vcmp.eq.s32.totalorder %v1784_v36, 31  ;;  %v3595_v42 = vshll.u32 %v8186_v6, 16 }
  0x7c   : > { %vm2832_vm13 = vmpackc.low %vm2613_vm10, %vm2613_vm10  ;;  %v2146_v10 = vsel %vm2074_vm12, 65537, %v9834_v31  ;;  %v8192_v11 = vsel %vm3387_vm3, %v3435_v61, %v7837_v51  ;;  %vm8199_vm4 = vcmp.eq.s32.totalorder %v1013_v50, 31  ;;  %v5326_v0 = vsel %vm3696_vm0, %v7273_v20, 0  ;;  %v7240_v36 = vld [vmem:[%s9802_s3 + $0xa] sm:$0x3] }
  0x7d   : > { %9954 = vst [vmem:[#allocation31_spill] sm:$0xff] %v8192_v11  ;;  %v2905_v58 = vsel %vm2832_vm13, 65537, %v9834_v31  ;;  %v2218_v27 = vunpack.c.l.b16 %v2146_v10  ;;  %vm2073_vm15 = vmpackc.low %vm1857_vm14, %vm1857_vm14  ;;  %5335 = vmatpush.bf16.msra.mxu2 %v5326_v0  ;;  %v8207_v51 = vor.u32 %v3591_v15, %v8161_v16  ;;  %v8215_v57 = vrot.slane %v3595_v42, 1 }
  0x7e   : > { %v2978_v24 = vunpack.c.l.b16 %v2905_v58  ;;  %v2145_v62 = vsel %vm2073_vm15, 65537, %v9834_v31  ;;  %vm2077_vm6 = vmpackc.low %vm8199_vm4, %vm8199_vm4  ;;  %v5586_v61 = vsel %vm3696_vm0, %v7306_v46, 0  ;;  %v5082_v10 = vsel %vm3696_vm0, %v7240_v36, 0 }
  0x7f   : > { %9957 = vst [vmem:[#allocation32_spill] sm:$0xff] %v8207_v51  ;;  %v6931_v15 = vunpack.i.l.s16 %v2218_v27  ;;  %v8224_v58 = vunpack.c.l.b16 %v9834_v31  ;;  %v8227_v20 = vunpack.c.h.b16 %v9834_v31  ;;  %v8232_v42 = vsel %vm3387_vm3, %v7934_v7, %v7853_v1  ;;  %5595 = vmatpush.bf16.msra.mxu3 %v5586_v61  ;;  %5091 = vmatpush.bf16.msra.mxu1 %v5082_v10  ;;  %v7339_v1 = vld [vmem:[%s9802_s3 + $0x10] sm:$0x3] }
  0x80   : > { %7082 = vmatmul.msk.bf16.gmra.mxu0 %vm3599_vm2, %v8154_v38  ;;  %9958 = vst [vmem:[#allocation33_spill] sm:$0xff] %v8215_v57  ;;  %v2217_v44 = vunpack.c.l.b16 %v2145_v62  ;;  %v7002_v0 = vunpack.i.l.s16 %v2978_v24  ;;  %v2149_v46 = vsel %vm2077_vm6, 65537, %v9834_v31  ;;  %v8240_v27 = vsel %vm3387_vm3, %v7942_v14, %v7855_v2 }
  0x81   : > { %9959 = vst [vmem:[#allocation34_spill] sm:$0xff] %v8224_v58  ;;  %v8245_v36 = vsel %vm3387_vm3, %v8207_v51, %v8215_v57  ;;  %vm8251_vm7 = vcmp.ne.s32.totalorder %v6931_v15, %v8227_v20  ;;  %v9963_v7 = vmov 0  ;;  %vm2336_vm8 = vcmp.ne.s32.totalorder %v6931_v15, %v8224_v58 }
  0x82   : > { %9960 = vst [vmem:[#allocation35_spill] sm:$0xff] %v8227_v20  ;;  %v9964_v7 = vsel %vm8251_vm7, 4294967295, %v9963_v7  ;;  %v5836_v24 = vsel %vm3696_vm0, %v7339_v1, 0  ;;  %v2221_v2 = vunpack.c.l.b16 %v2149_v46  ;;  %vm2617_vm9 = vcmp.eq.s32.totalorder %v1013_v50, 0  ;;  %vm8264_vm11 = vmpackc.low %vm8251_vm7, %vm2336_vm8 }
  0x83   : > { %9961 = vst [vmem:[#allocation36_spill] sm:$0xff] %v8240_v27  ;;  %5845 = vmatpush.bf16.msra.mxu0 %v5836_v24  ;;  %v6930_v14 = vunpack.i.l.s16 %v2217_v44  ;;  %vm3092_vm10 = vcmp.ne.s32.totalorder %v7002_v0, %v8224_v58  ;;  %v9966_v62 = vmov 0  ;;  %vm2836_vm12 = vmpackc.low %vm2617_vm9, %vm2617_vm9  ;;  %v8274_v61 = vsel %vm3387_vm3, %v7925_v59, %v7839_v52 }
  0x84   : > { %9962 = vst [vmem:[#allocation37_spill] sm:$0xff] %v8245_v36  ;;  %v9967_v62 = vsel %vm8264_vm11, 4294967295, %v9966_v62  ;;  %vm3094_vm0 = vmpackc.low %vm8251_vm7, %vm3092_vm10  ;;  %v6934_v50 = vunpack.i.l.s16 %v2221_v2  ;;  %v2909_v10 = vsel %vm2836_vm12, 65537, %v9834_v31  ;;  %v2578_v15 = vsel %vm8264_vm11, 0, %v7908_v33 }
  0x85   : > { %7091 = vmatmul.msk.bf16.gmra.mxu1 %vm3599_vm2, %v8165_v17  ;;  %9965 = vst [vmem:[#allocation38_spill] sm:$0xff] %v9964_v7  ;;  %vm2329_vm13 = vcmp.ne.s32.totalorder %v6930_v14, %v8224_v58  ;;  %v3347_v44 = vsel %vm3094_vm0, 0, %v7894_v23  ;;  %v2982_v0 = vunpack.c.l.b16 %v2909_v10  ;;  %v4174_v52 = vrot.slane %v2578_v15, 1 }
  0x86   : > { %9968 = vst [vmem:[#allocation39_spill] sm:$0xff] %v9967_v62  ;;  %vm2331_vm14 = vmpackc.low %vm8251_vm7, %vm2329_vm13  ;;  %vm2343_vm15 = vcmp.ne.s32.totalorder %v6934_v50, %v8224_v58  ;;  %v4173_v46 = vrot.slane %v3347_v44, 1  ;;  %vm4172_vm4 = vcmask 1046528   ;;  %v843_v33 = vadd.s32 64, %v8132_v34 }
  0x87   : > { %7099 = vmatmul.msk.bf16.gmra.mxu2 %vm3599_vm2, %v8172_v56  ;;  %9969 = vst [vmem:[#allocation40_spill] sm:$0xff] %v8274_v61  ;;  %v2577_v1 = vsel %vm2331_vm14, 0, %v7894_v23  ;;  %vm2345_vm6 = vmpackc.low %vm8251_vm7, %vm2343_vm15  ;;  %v7006_v24 = vunpack.i.l.s16 %v2982_v0 }
  0x88   : > { %7107 = vmatmul.msk.bf16.gmra.mxu3 %vm3599_vm2, %v8176_v43  ;;  %v4175_v2 = vsel %vm4172_vm4, %v4173_v46, %v4174_v52  ;;  %v2579_v14 = vsel %vm2345_vm6, 0, %v7956_v32  ;;  %v6865_v50 = vadd.s32 4294967295, %v843_v33 }
  0x89   : > { %vm3106_vm8 = vcmp.ne.s32.totalorder %v7006_v24, %v8224_v58 }
  0x8a   : > { %v1041_v10 = vand.u32 31, %v6865_v50  ;;  %vm3108_vm9 = vmpackc.low %vm8251_vm7, %vm3106_vm8  ;;  %v9974_v50 = vmov 0  }
  0x8b   : > { %v3349_v46 = vsel %vm3108_vm9, 0, %v7956_v32 }
  0x8c   : > { %vm1865_vm10 = vcmp.eq.s32.totalorder %v1041_v10, 31  ;;  %vm2621_vm0 = vcmp.eq.s32.totalorder %v1041_v10, 0 }
  0x8d   : > { %vm2081_vm12 = vmpackc.low %vm1865_vm10, %vm1865_vm10 }
  0x8e   : > { %v2153_v20 = vsel %vm2081_vm12, 65537, %v9974_v50  ;;  %vm2840_vm13 = vmpackc.low %vm2621_vm0, %vm2621_vm0 }
  0x90   : > { %7083 = vmatmul.msk.bf16.gmra.mxu0 %vm3599_vm2, %v8192_v11 }
  0x95   : > { %7092 = vmatmul.msk.bf16.gmra.mxu1 %vm3599_vm2, %v8232_v42 }
  0x97   : > { %7100 = vmatmul.msk.bf16.gmra.mxu2 %vm3599_vm2, %v8240_v27 }
  0x98   : > { %7108 = vmatmul.msk.bf16.gmra.mxu3 %vm3599_vm2, %v8245_v36 }
  0xa0   : > { %7084 = vmatmul.msk.bf16.gmra.mxu0 %vm3599_vm2, %v8274_v61 }
  0xa2   : > { %v8286_v59 = vpop.f32.mrf.mxu1 }
  0xa5   : > { %7109 = vmatmul.msk.bf16.vlgmr.msrb.gmra.mxu1 %vm3599_vm2, %v2577_v1  ;;  %v4176_v1 = vrot.slane %v3349_v46, 1  ;;  %v2225_v46 = vunpack.c.l.b16 %v2153_v20 }
  0xa7   : > { %7142 = vmatmul.msk.bf16.vlgmr.msrb.gmra.mxu2 %vm3599_vm2, %v4175_v2  ;;  %v4177_v32 = vsel %vm4172_vm4, %v4174_v52, %v4176_v1  ;;  %v6938_v52 = vunpack.i.l.s16 %v2225_v46  ;;  %v847_v46 = vadd.s32 96, %v8132_v34 }
  0xa8   : > { %7175 = vmatmul.msk.bf16.vlgmr.msrb.gmra.mxu3 %vm3599_vm2, %v2579_v14 }
  0xa9   : > { %vm2357_vm14 = vcmp.ne.s32.totalorder %v6938_v52, %v8224_v58  ;;  %v6869_v6 = vadd.s32 4294967295, %v847_v46 }
  0xaa   : > { %v8298_v23 = vpop.f32.mrf.mxu1  ;;  %v8300_v44 = vpop.f32.mrf.mxu2  ;;  %vm2359_vm15 = vmpackc.low %vm8251_vm7, %vm2357_vm14 }
  0xab   : > { %9970 = vst [vmem:[#allocation41_spill] sm:$0xff] %v8300_v44  ;;  %v8302_v31 = vpop.f32.mrf.mxu3 }
  0xac   : > { %9971 = vst [vmem:[#allocation42_spill] sm:$0xff] %v8302_v31 }
  0xad   : > { %v8306_v0 = vpop.f32.mrf.mxu0 }
  0xb0   : > { %7208 = vmatmul.msk.bf16.vlgmr.msrb.gmra.mxu0 %vm3599_vm2, %v8042_v39  ;;  %v8325_v39 = vsel %vm8264_vm11, 0, %v8007_v63  ;;  %v2913_v63 = vsel %vm2840_vm13, 65537, %v9974_v50 }
  0xb1   : > { %9975 = vst [vmem:[#allocation45_spill] sm:$0xff] %v8325_v39  ;;  %v2986_v20 = vunpack.c.l.b16 %v2913_v63  ;;  %v8343_v10 = vrot.slane %v8325_v39, 1  ;;  %v8362_v63 = vsel %vm2359_vm15, 0, %v8055_v3 }
  0xb2   : > { %v8311_v33 = vpop.f32.mrf.mxu1  ;;  %v8313_v24 = vpop.f32.mrf.mxu2  ;;  %9981 = vst [vmem:[#allocation51_spill] sm:$0xff] %v8362_v63 }
  0xb3   : > { %9972 = vst [vmem:[#allocation43_spill] sm:$0xff] %v8313_v24  ;;  %v8315_v2 = vpop.f32.mrf.mxu3  ;;  %v7010_v57 = vunpack.i.l.s16 %v2986_v20  ;;  %v8461_v24 = vsel %vm8264_vm11, 0, %v7811_v40 }
  0xb4   : > { %9973 = vst [vmem:[#allocation44_spill] sm:$0xff] %v8315_v2 }
  0xb5   : > { %v8318_v31 = vpop.f32.mrf.mxu0  ;;  %7110 = vmatmul.msk.bf16.gmra.mxu1 %vm3599_vm2, %v2578_v15  ;;  %vm3120_vm6 = vcmp.ne.s32.totalorder %v7010_v57, %v8224_v58 }
  0xb6   : > { %vm3122_vm8 = vmpackc.low %vm8251_vm7, %vm3120_vm6 }
  0xb7   : > { %7143 = vmatmul.msk.bf16.gmra.mxu2 %vm3599_vm2, %v4177_v32  ;;  %v3351_v46 = vsel %vm3122_vm8, 0, %v8055_v3 }
  0xb8   : > { %7176 = vmatmul.msk.bf16.gmra.mxu3 %vm3599_vm2, %v8325_v39 }
  0xb9   : > { %v10137_v7 = vld [vmem:[#allocation51_spill] sm:$0xff] }
  0xba   : > { %v8330_v2 = vpop.f32.mrf.mxu1  ;;  %v8332_v51 = vpop.f32.mrf.mxu2 }
  0xbb   : > { %9976 = vst [vmem:[#allocation46_spill] sm:$0xff] %v8332_v51  ;;  %v8334_v15 = vpop.f32.mrf.mxu3 }
  0xbc   : > { %9977 = vst [vmem:[#allocation47_spill] sm:$0xff] %v8334_v15 }
  0xbd   : > { %v8336_v30 = vpop.f32.mrf.mxu0 }
  0xc0   : > { %7209 = vmatmul.msk.bf16.gmra.mxu0 %vm3599_vm2, %v8074_v4  ;;  %v8359_v4 = vsel %vm4172_vm4, %v4176_v1, %v8343_v10 }
  0xc1   : > { %9980 = vst [vmem:[#allocation50_spill] sm:$0xff] %v8359_v4 }
  0xc2   : > { %v8345_v32 = vpop.f32.mrf.mxu1  ;;  %v8350_v15 = vpop.f32.mrf.mxu2 }
  0xc3   : > { %9978 = vst [vmem:[#allocation48_spill] sm:$0xff] %v8350_v15  ;;  %v8352_v16 = vpop.f32.mrf.mxu3 }
  0xc4   : > { %9979 = vst [vmem:[#allocation49_spill] sm:$0xff] %v8352_v16  ;;  %v1069_v16 = vand.u32 31, %v6869_v6 }
  0xc5   : > { %v8354_v52 = vpop.f32.mrf.mxu0  ;;  %7111 = vmatmul.msk.bf16.gmra.mxu1 %vm3599_vm2, %v2579_v14 }
  0xc6   : > { %vm1869_vm9 = vcmp.eq.s32.totalorder %v1069_v16, 31  ;;  %vm2625_vm12 = vcmp.eq.s32.totalorder %v1069_v16, 0 }
  0xc7   : > { %7144 = vmatmul.msk.bf16.gmra.mxu2 %vm3599_vm2, %v8359_v4  ;;  %v4180_v4 = vrot.slane %v3351_v46, 1  ;;  %vm2085_vm10 = vmpackc.low %vm1869_vm9, %vm1869_vm9 }
  0xc8   : > { %7177 = vmatmul.msk.bf16.gmra.mxu3 %vm3599_vm2, %v8362_v63  ;;  %vm2844_vm0 = vmpackc.low %vm2625_vm12, %vm2625_vm12 }
  0xc9   : > { %v8395_v3 = vsel %vm4172_vm4, %v8343_v10, %v4180_v4  ;;  %v2917_v15 = vsel %vm2844_vm0, 65537, %v9974_v50 }
  0xca   : > { %v8369_v20 = vpop.f32.mrf.mxu1  ;;  %v8371_v14 = vpop.f32.mrf.mxu2  ;;  %9986 = vst [vmem:[#allocation56_spill] sm:$0xff] %v8395_v3  ;;  %v2990_v16 = vunpack.c.l.b16 %v2917_v15  ;;  %v8428_v15 = vsel %vm4172_vm4, %v4180_v4, %v8343_v10 }
  0xcb   : > { %9982 = vst [vmem:[#allocation52_spill] sm:$0xff] %v8371_v14  ;;  %v8373_v36 = vpop.f32.mrf.mxu3 }
  0xcc   : > { %9983 = vst [vmem:[#allocation53_spill] sm:$0xff] %v8373_v36  ;;  %v2157_v36 = vsel %vm2085_vm10, 65537, %v9974_v50 }
  0xcd   : > { %v8377_v1 = vpop.f32.mrf.mxu0  ;;  %9993 = vst [vmem:[#allocation63_spill] sm:$0xff] %v8428_v15 }
  0xd0   : > { %7210 = vmatmul.msk.bf16.gmra.mxu0 %vm3599_vm2, %v8116_v22  ;;  %v2229_v22 = vunpack.c.l.b16 %v2157_v36 }
  0xd2   : > { %v8382_v57 = vpop.f32.mrf.mxu1  ;;  %v8384_v6 = vpop.f32.mrf.mxu2 }
  0xd3   : > { %9984 = vst [vmem:[#allocation54_spill] sm:$0xff] %v8384_v6  ;;  %v8386_v35 = vpop.f32.mrf.mxu3  ;;  %v6942_v6 = vunpack.i.l.s16 %v2229_v22 }
  0xd4   : > { %9985 = vst [vmem:[#allocation55_spill] sm:$0xff] %v8386_v35 }
  0xd5   : > { %v8389_v43 = vpop.f32.mrf.mxu0  ;;  %7112 = vmatmul.msk.bf16.gmra.mxu1 %vm3599_vm2, %v8325_v39  ;;  %vm2371_vm13 = vcmp.ne.s32.totalorder %v6942_v6, %v8224_v58 }
  0xd6   : > { %vm2373_vm14 = vmpackc.low %vm8251_vm7, %vm2371_vm13 }
  0xd7   : > { %7145 = vmatmul.msk.bf16.gmra.mxu2 %vm3599_vm2, %v8395_v3  ;;  %v851_v3 = vadd.s32 128, %v8132_v34  ;;  %v8431_v6 = vsel %vm2373_vm14, 0, %v8125_v53 }
  0xd8   : > { %7178 = vmatmul.msk.bf16.gmra.mxu3 %vm3599_vm2, %v8325_v39  ;;  %9994 = vst [vmem:[#allocation64_spill] sm:$0xff] %v8431_v6 }
  0xda   : > { %v8401_v46 = vpop.f32.mrf.mxu1  ;;  %v8403_v35 = vpop.f32.mrf.mxu2 }
  0xdb   : > { %9987 = vst [vmem:[#allocation57_spill] sm:$0xff] %v8401_v46  ;;  %v8405_v49 = vpop.f32.mrf.mxu3 }
  0xdc   : > { %9988 = vst [vmem:[#allocation58_spill] sm:$0xff] %v8403_v35 }
  0xdd   : > { %9989 = vst [vmem:[#allocation59_spill] sm:$0xff] %v8405_v49  ;;  %v8407_v14 = vpop.f32.mrf.mxu0  ;;  %v7014_v49 = vunpack.i.l.s16 %v2990_v16 }
  0xdf   : > { %vm3134_vm15 = vcmp.ne.s32.totalorder %v7014_v49, %v8224_v58 }
  0xe0   : > { %7211 = vmatmul.msk.bf16.gmra.mxu0 %vm3599_vm2, %v8154_v38  ;;  %v6873_v38 = vadd.s32 4294967295, %v851_v3  ;;  %vm3136_vm6 = vmpackc.low %vm8251_vm7, %vm3134_vm15 }
  0xe1   : > { %v3353_v3 = vsel %vm3136_vm6, 0, %v8125_v53 }
  0xe2   : > { %v8413_v36 = vpop.f32.mrf.mxu1  ;;  %v8418_v35 = vpop.f32.mrf.mxu2 }
  0xe3   : > { %9990 = vst [vmem:[#allocation60_spill] sm:$0xff] %v8413_v36  ;;  %v8420_v22 = vpop.f32.mrf.mxu3 }
  0xe4   : > { %9991 = vst [vmem:[#allocation61_spill] sm:$0xff] %v8418_v35 }
  0xe5   : > { %9992 = vst [vmem:[#allocation62_spill] sm:$0xff] %v8420_v22  ;;  %v8422_v51 = vpop.f32.mrf.mxu0  ;;  %7113 = vmatmul.msk.bf16.gmra.mxu1 %vm3599_vm2, %v8362_v63  ;;  %v1097_v22 = vand.u32 31, %v6873_v38 }
  0xe7   : > { %7146 = vmatmul.msk.bf16.gmra.mxu2 %vm3599_vm2, %v8428_v15  ;;  %vm1873_vm8 = vcmp.eq.s32.totalorder %v1097_v22, 31  ;;  %v4184_v15 = vrot.slane %v3353_v3, 1  ;;  %vm2629_vm10 = vcmp.eq.s32.totalorder %v1097_v22, 0  ;;  %v8488_v22 = vrot.slane %v8461_v24, 1 }
  0xe8   : > { %7179 = vmatmul.msk.bf16.gmra.mxu3 %vm3599_vm2, %v8431_v6  ;;  %vm2089_vm9 = vmpackc.low %vm1873_vm8, %vm1873_vm8 }
  0xe9   : > { %v8469_v3 = vsel %vm4172_vm4, %v8343_v10, %v4184_v15  ;;  %vm2848_vm12 = vmpackc.low %vm2629_vm10, %vm2629_vm10 }
  0xea   : > { %v8438_v16 = vpop.f32.mrf.mxu1  ;;  %v8440_v63 = vpop.f32.mrf.mxu2  ;;  %10001 = vst [vmem:[#allocation71_spill] sm:$0xff] %v8469_v3  ;;  %v2921_v10 = vsel %vm2848_vm12, 65537, %v9974_v50 }
  0xeb   : > { %9995 = vst [vmem:[#allocation65_spill] sm:$0xff] %v8438_v16  ;;  %v8442_v35 = vpop.f32.mrf.mxu3 }
  0xec   : > { %9996 = vst [vmem:[#allocation66_spill] sm:$0xff] %v8440_v63 }
  0xed   : > { %9997 = vst [vmem:[#allocation67_spill] sm:$0xff] %v8442_v35  ;;  %v8446_v4 = vpop.f32.mrf.mxu0  ;;  %v2161_v35 = vsel %vm2089_vm9, 65537, %v9974_v50 }
  0xf0   : > { %7212 = vmatmul.msk.bf16.gmra.mxu0 %vm3599_vm2, %v8192_v11  ;;  %v2233_v11 = vunpack.c.l.b16 %v2161_v35  ;;  %v2994_v35 = vunpack.c.l.b16 %v2921_v10  ;;  %v8505_v10 = vsel %vm4172_vm4, %v4184_v15, %v8488_v22 }
  0xf1   : > { %10008 = vst [vmem:[#allocation78_spill] sm:$0xff] %v8505_v10 }
  0xf2   : > { %v8451_v49 = vpop.f32.mrf.mxu1  ;;  %v8453_v38 = vpop.f32.mrf.mxu2 }
  0xf3   : > { %9998 = vst [vmem:[#allocation68_spill] sm:$0xff] %v8451_v49  ;;  %v8455_v63 = vpop.f32.mrf.mxu3 }
  0xf4   : > { %9999 = vst [vmem:[#allocation69_spill] sm:$0xff] %v8453_v38 }
  0xf5   : > { %10000 = vst [vmem:[#allocation70_spill] sm:$0xff] %v8455_v63  ;;  %v8463_v53 = vpop.f32.mrf.mxu0  ;;  %7114 = vmatmul.msk.bf16.gmra.mxu1 %vm3599_vm2, %v8325_v39  ;;  %v6946_v39 = vunpack.i.l.s16 %v2233_v11  ;;  %v855_v11 = vadd.s32 160, %v8132_v34 }
  0xf7   : > { %7147 = vmatmul.msk.bf16.gmra.mxu2 %vm3599_vm2, %v8469_v3  ;;  %vm2385_vm0 = vcmp.ne.s32.totalorder %v6946_v39, %v8224_v58 }
  0xf8   : > { %7180 = vmatmul.msk.bf16.gmra.mxu3 %vm3599_vm2, %v8461_v24  ;;  %vm2387_vm13 = vmpackc.low %vm8251_vm7, %vm2385_vm0 }
  0xfa   : > { %v8475_v63 = vpop.f32.mrf.mxu1  ;;  %v8477_v40 = vpop.f32.mrf.mxu2 }
  0xfb   : > { %10002 = vst [vmem:[#allocation72_spill] sm:$0xff] %v8475_v63  ;;  %v8479_v38 = vpop.f32.mrf.mxu3  ;;  %v7018_v63 = vunpack.i.l.s16 %v2994_v35 }
  0xfc   : > { %10003 = vst [vmem:[#allocation73_spill] sm:$0xff] %v8477_v40 }
  0xfd   : > { %10004 = vst [vmem:[#allocation74_spill] sm:$0xff] %v8479_v38  ;;  %v8481_v44 = vpop.f32.mrf.mxu0  ;;  %vm3148_vm14 = vcmp.ne.s32.totalorder %v7018_v63, %v8224_v58 }
  0xfe   : > { %vm3150_vm15 = vmpackc.low %vm8251_vm7, %vm3148_vm14 }
 0x100   : > { %7213 = vmatmul.msk.bf16.gmra.mxu0 %vm3599_vm2, %v8274_v61  ;;  %v8508_v61 = vsel %vm2387_vm13, 0, %v7816_v41 }
 0x101   : > { %10009 = vst [vmem:[#allocation79_spill] sm:$0xff] %v8508_v61 }
 0x102   : > { %v8490_v3 = vpop.f32.mrf.mxu1  ;;  %v8495_v38 = vpop.f32.mrf.mxu2 }
 0x103   : > { %10005 = vst [vmem:[#allocation75_spill] sm:$0xff] %v8490_v3  ;;  %v8497_v40 = vpop.f32.mrf.mxu3  ;;  %v6877_v3 = vadd.s32 4294967295, %v855_v11  ;;  %v3355_v11 = vsel %vm3150_vm15, 0, %v7816_v41 }
 0x104   : > { %10006 = vst [vmem:[#allocation76_spill] sm:$0xff] %v8495_v38 }
 0x105   : > { %10007 = vst [vmem:[#allocation77_spill] sm:$0xff] %v8497_v40  ;;  %v8499_v39 = vpop.f32.mrf.mxu0  ;;  %7115 = vmatmul.msk.bf16.gmra.mxu1 %vm3599_vm2, %v8431_v6  ;;  %v1125_v40 = vand.u32 31, %v6877_v3 }
 0x107   : > { %7148 = vmatmul.msk.bf16.gmra.mxu2 %vm3599_vm2, %v8505_v10  ;;  %vm1877_vm6 = vcmp.eq.s32.totalorder %v1125_v40, 31  ;;  %v4188_v10 = vrot.slane %v3355_v11, 1  ;;  %vm2633_vm9 = vcmp.eq.s32.totalorder %v1125_v40, 0 }
 0x108   : > { %7181 = vmatmul.msk.bf16.gmra.mxu3 %vm3599_vm2, %v8508_v61  ;;  %vm2093_vm8 = vmpackc.low %vm1877_vm6, %vm1877_vm6 }
 0x109   : > { %v8541_v41 = vsel %vm4172_vm4, %v8488_v22, %v4188_v10  ;;  %vm2852_vm10 = vmpackc.low %vm2633_vm9, %vm2633_vm9 }
 0x10a   : > { %v8515_v35 = vpop.f32.mrf.mxu1  ;;  %v8517_v6 = vpop.f32.mrf.mxu2  ;;  %10016 = vst [vmem:[#allocation86_spill] sm:$0xff] %v8541_v41  ;;  %v2925_v49 = vsel %vm2852_vm10, 65537, %v9974_v50 }
 0x10b   : > { %10010 = vst [vmem:[#allocation80_spill] sm:$0xff] %v8515_v35  ;;  %v8519_v38 = vpop.f32.mrf.mxu3 }
 0x10c   : > { %10011 = vst [vmem:[#allocation81_spill] sm:$0xff] %v8517_v6 }
 0x10d   : > { %10012 = vst [vmem:[#allocation82_spill] sm:$0xff] %v8519_v38  ;;  %v8523_v15 = vpop.f32.mrf.mxu0  ;;  %v2165_v38 = vsel %vm2093_vm8, 65537, %v9974_v50 }
 0x110   : > { %7214 = vmatmul.msk.bf16.gmra.mxu0 %vm3599_vm2, %v7860_v5  ;;  %v2237_v5 = vunpack.c.l.b16 %v2165_v38  ;;  %v2998_v38 = vunpack.c.l.b16 %v2925_v49 }
 0x112   : > { %v8528_v63 = vpop.f32.mrf.mxu1  ;;  %v8530_v3 = vpop.f32.mrf.mxu2 }
 0x113   : > { %10013 = vst [vmem:[#allocation83_spill] sm:$0xff] %v8528_v63  ;;  %v8532_v6 = vpop.f32.mrf.mxu3  ;;  %v6950_v63 = vunpack.i.l.s16 %v2237_v5  ;;  %v7022_v5 = vunpack.i.l.s16 %v2998_v38 }
 0x114   : > { %10014 = vst [vmem:[#allocation84_spill] sm:$0xff] %v8530_v3 }
 0x115   : > { %10015 = vst [vmem:[#allocation85_spill] sm:$0xff] %v8532_v6  ;;  %v8535_v35 = vpop.f32.mrf.mxu0  ;;  %7116 = vmatmul.msk.bf16.gmra.mxu1 %vm3599_vm2, %v8461_v24  ;;  %vm2399_vm12 = vcmp.ne.s32.totalorder %v6950_v63, %v8224_v58  ;;  %v8572_v63 = vsel %vm4172_vm4, %v4188_v10, %v8488_v22  ;;  %vm3162_vm13 = vcmp.ne.s32.totalorder %v7022_v5, %v8224_v58 }
 0x116   : > { %vm2401_vm0 = vmpackc.low %vm8251_vm7, %vm2399_vm12  ;;  %10022 = vst [vmem:[#allocation92_spill] sm:$0xff] %v8572_v63 }
 0x117   : > { %7149 = vmatmul.msk.bf16.gmra.mxu2 %vm3599_vm2, %v8541_v41  ;;  %v859_v41 = vadd.s32 192, %v8132_v34  ;;  %v8575_v49 = vsel %vm2401_vm0, 0, %v7903_v28  ;;  %vm3164_vm14 = vmpackc.low %vm8251_vm7, %vm3162_vm13 }
 0x118   : > { %7182 = vmatmul.msk.bf16.gmra.mxu3 %vm3599_vm2, %v8461_v24  ;;  %v3357_v36 = vsel %vm3164_vm14, 0, %v7903_v28  ;;  %v8595_v28 = vsel %vm8264_vm11, 0, %v7977_v54 }
 0x119   : > { %v4192_v5 = vrot.slane %v3357_v36, 1 }
 0x11a   : > { %v8547_v11 = vpop.f32.mrf.mxu1  ;;  %v8549_v6 = vpop.f32.mrf.mxu2 }
 0x11b   : > { %10017 = vst [vmem:[#allocation87_spill] sm:$0xff] %v8547_v11  ;;  %v8551_v3 = vpop.f32.mrf.mxu3 }
 0x11c   : > { %10018 = vst [vmem:[#allocation88_spill] sm:$0xff] %v8549_v6 }
 0x11d   : > { %10019 = vst [vmem:[#allocation89_spill] sm:$0xff] %v8551_v3  ;;  %v8553_v27 = vpop.f32.mrf.mxu0 }
 0x120   : > { %7215 = vmatmul.msk.bf16.gmra.mxu0 %vm3599_vm2, %v7949_v21  ;;  %v6881_v21 = vadd.s32 4294967295, %v859_v41 }
 0x122   : > { %v3977_v40 = vpop.f32.mrf.mxu1  ;;  %v8562_v6 = vpop.f32.mrf.mxu2 }
 0x123   : > { %10020 = vst [vmem:[#allocation90_spill] sm:$0xff] %v8562_v6  ;;  %v8564_v3 = vpop.f32.mrf.mxu3  ;;  %v3978_v38 = vadd.f32 %v3977_v40, %v8306_v0 }
 0x124   : > { %10021 = vst [vmem:[#allocation91_spill] sm:$0xff] %v8564_v3 }
 0x125   : > { %v8566_v11 = vpop.f32.mrf.mxu0  ;;  %7117 = vmatmul.msk.bf16.gmra.mxu1 %vm3599_vm2, %v8508_v61  ;;  %v1153_v61 = vand.u32 31, %v6881_v21 }
 0x127   : > { %7150 = vmatmul.msk.bf16.gmra.mxu2 %vm3599_vm2, %v8572_v63  ;;  %vm1881_vm15 = vcmp.eq.s32.totalorder %v1153_v61, 31  ;;  %vm2637_vm8 = vcmp.eq.s32.totalorder %v1153_v61, 0 }
 0x128   : > { %7183 = vmatmul.msk.bf16.gmra.mxu3 %vm3599_vm2, %v8575_v49  ;;  %vm2097_vm6 = vmpackc.low %vm1881_vm15, %vm1881_vm15 }
 0x129   : > { %vm2856_vm9 = vmpackc.low %vm2637_vm8, %vm2637_vm8 }
 0x12a   : > { %v3979_v3 = vpop.f32.mrf.mxu1  ;;  %v4346_v6 = vpop.f32.mrf.mxu2 }
 0x12b   : > { %v4590_v16 = vpop.f32.mrf.mxu3  ;;  %v4506_v10 = vadd.f32 %v4346_v6, %v3978_v38  ;;  %v3980_v21 = vadd.f32 %v3979_v3, %v8318_v31  ;;  %v2169_v6 = vsel %vm2097_vm6, 65537, %v9974_v50 }
 0x12c   : > { %v2241_v36 = vunpack.c.l.b16 %v2169_v6 }
 0x12d   : > { %v4843_v56 = vpop.f32.mrf.mxu0  ;;  %v4750_v41 = vadd.f32 %v4590_v16, %v4506_v10 }
 0x12f   : > { %v8588_v63 = vadd.f32 %v4843_v56, %v4750_v41  ;;  %v8601_v56 = vsel %vm4172_vm4, %v8488_v22, %v4192_v5 }
 0x130   : > { %7216 = vmatmul.msk.bf16.gmra.mxu0 %vm3599_vm2, %v8004_v29 }
 0x132   : > { %v3982_v0 = vpop.f32.mrf.mxu1  ;;  %v4348_v40 = vpop.f32.mrf.mxu2 }
 0x133   : > { %v4592_v8 = vpop.f32.mrf.mxu3  ;;  %v4507_v46 = vadd.f32 %v4348_v40, %v3980_v21  ;;  %v3983_v54 = vadd.f32 %v3982_v0, %v8336_v30  ;;  %v6954_v21 = vunpack.i.l.s16 %v2241_v36  ;;  %v8617_v30 = vrot.slane %v8595_v28, 1 }
 0x135   : > { %v4845_v16 = vpop.f32.mrf.mxu0  ;;  %7118 = vmatmul.msk.bf16.gmra.mxu1 %vm3599_vm2, %v8461_v24  ;;  %v4751_v31 = vadd.f32 %v4592_v8, %v4507_v46  ;;  %v2929_v8 = vsel %vm2856_vm9, 65537, %v9974_v50  ;;  %vm2413_vm10 = vcmp.ne.s32.totalorder %v6954_v21, %v8224_v58 }
 0x136   : > { %v3002_v46 = vunpack.c.l.b16 %v2929_v8  ;;  %vm2415_vm12 = vmpackc.low %vm8251_vm7, %vm2413_vm10 }
 0x137   : > { %7151 = vmatmul.msk.bf16.gmra.mxu2 %vm3599_vm2, %v8601_v56  ;;  %v8607_v3 = vadd.f32 %v4845_v16, %v4751_v31  ;;  %v863_v31 = vadd.s32 224, %v8132_v34 }
 0x138   : > { %7184 = vmatmul.msk.bf16.gmra.mxu3 %vm3599_vm2, %v8595_v28 }
 0x13a   : > { %v3984_v38 = vpop.f32.mrf.mxu1  ;;  %v4351_v10 = vpop.f32.mrf.mxu2 }
 0x13b   : > { %v4595_v41 = vpop.f32.mrf.mxu3  ;;  %v4508_v22 = vadd.f32 %v4351_v10, %v3983_v54  ;;  %v3985_v0 = vadd.f32 %v3984_v38, %v8354_v52  ;;  %v8630_v52 = vsel %vm2415_vm12, 0, %v8022_v9 }
 0x13d   : > { %v4848_v40 = vpop.f32.mrf.mxu0  ;;  %v4752_v61 = vadd.f32 %v4595_v41, %v4508_v22  ;;  %v7026_v41 = vunpack.i.l.s16 %v3002_v46  ;;  %v8627_v22 = vsel %vm4172_vm4, %v4192_v5, %v8617_v30 }
 0x13f   : > { %v8614_v6 = vadd.f32 %v4848_v40, %v4752_v61  ;;  %v6885_v40 = vadd.s32 4294967295, %v863_v31  ;;  %vm3176_vm0 = vcmp.ne.s32.totalorder %v7026_v41, %v8224_v58 }
 0x140   : > { %7217 = vmatmul.msk.bf16.gmra.mxu0 %vm3599_vm2, %v8050_v12  ;;  %vm3178_vm13 = vmpackc.low %vm8251_vm7, %vm3176_vm0 }
 0x141   : > { %10023 = vst [vmem:[#allocation93_spill] sm:$0xff] %v8614_v6  ;;  %v1181_v5 = vand.u32 31, %v6885_v40  ;;  %v3359_v6 = vsel %vm3178_vm13, 0, %v8022_v9 }
 0x142   : > { %v3987_v16 = vpop.f32.mrf.mxu1  ;;  %v4353_v36 = vpop.f32.mrf.mxu2 }
 0x143   : > { %v4597_v54 = vpop.f32.mrf.mxu3  ;;  %v4509_v10 = vadd.f32 %v4353_v36, %v3985_v0  ;;  %v3988_v61 = vadd.f32 %v3987_v16, %v8377_v1  ;;  %vm1885_vm14 = vcmp.eq.s32.totalorder %v1181_v5, 31  ;;  %vm2641_vm6 = vcmp.eq.s32.totalorder %v1181_v5, 0 }
 0x144   : > { %vm2101_vm15 = vmpackc.low %vm1885_vm14, %vm1885_vm14 }
 0x145   : > { %v4850_v21 = vpop.f32.mrf.mxu0  ;;  %7119 = vmatmul.msk.bf16.gmra.mxu1 %vm3599_vm2, %v8575_v49  ;;  %v4753_v38 = vadd.f32 %v4597_v54, %v4509_v10  ;;  %vm2860_vm8 = vmpackc.low %vm2641_vm6, %vm2641_vm6 }
 0x147   : > { %7152 = vmatmul.msk.bf16.gmra.mxu2 %vm3599_vm2, %v8627_v22  ;;  %v8637_v8 = vadd.f32 %v4850_v21, %v4753_v38  ;;  %v4196_v21 = vrot.slane %v3359_v6, 1 }
 0x148   : > { %7185 = vmatmul.msk.bf16.gmra.mxu3 %vm3599_vm2, %v8630_v52 }
 0x149   : > { %10024 = vst [vmem:[#allocation94_spill] sm:$0xff] %v8637_v8  ;;  %v8653_v9 = vsel %vm4172_vm4, %v8617_v30, %v4196_v21 }
 0x14a   : > { %v3989_v46 = vpop.f32.mrf.mxu1  ;;  %v4356_v0 = vpop.f32.mrf.mxu2 }
 0x14b   : > { %v4600_v36 = vpop.f32.mrf.mxu3  ;;  %v4510_v31 = vadd.f32 %v4356_v0, %v3988_v61  ;;  %v3990_v1 = vadd.f32 %v3989_v46, %v8389_v43  ;;  %v2173_v61 = vsel %vm2101_vm15, 65537, %v9974_v50 }
 0x14d   : > { %v4853_v54 = vpop.f32.mrf.mxu0  ;;  %v4754_v10 = vadd.f32 %v4600_v36, %v4510_v31  ;;  %v2245_v31 = vunpack.c.l.b16 %v2173_v61 }
 0x14f   : > { %v8645_v41 = vadd.f32 %v4853_v54, %v4754_v10 }
 0x150   : > { %7218 = vmatmul.msk.bf16.gmra.mxu0 %vm3599_vm2, %v8081_v37 }
 0x151   : > { %10025 = vst [vmem:[#allocation95_spill] sm:$0xff] %v8645_v41 }
 0x152   : > { %v3992_v16 = vpop.f32.mrf.mxu1  ;;  %v4358_v38 = vpop.f32.mrf.mxu2 }
 0x153   : > { %v4602_v40 = vpop.f32.mrf.mxu3  ;;  %v4511_v8 = vadd.f32 %v4358_v38, %v3990_v1  ;;  %v3993_v6 = vadd.f32 %v3992_v16, %v8407_v14  ;;  %v6958_v1 = vunpack.i.l.s16 %v2245_v31 }
 0x155   : > { %v4855_v0 = vpop.f32.mrf.mxu0  ;;  %7120 = vmatmul.msk.bf16.gmra.mxu1 %vm3599_vm2, %v8595_v28  ;;  %v4755_v36 = vadd.f32 %v4602_v40, %v4511_v8  ;;  %v2933_v8 = vsel %vm2860_vm8, 65537, %v9974_v50  ;;  %vm2427_vm9 = vcmp.ne.s32.totalorder %v6958_v1, %v8224_v58 }
 0x156   : > { %v3006_v40 = vunpack.c.l.b16 %v2933_v8  ;;  %vm2429_vm10 = vmpackc.low %vm8251_vm7, %vm2427_vm9 }
 0x157   : > { %7153 = vmatmul.msk.bf16.gmra.mxu2 %vm3599_vm2, %v8653_v9  ;;  %v8659_v43 = vadd.f32 %v4855_v0, %v4755_v36  ;;  %v867_v0 = vadd.s32 256, %v8132_v34 }
 0x158   : > { %7186 = vmatmul.msk.bf16.gmra.mxu3 %vm3599_vm2, %v8595_v28 }
 0x159   : > { %v6889_v1 = vadd.s32 4294967295, %v867_v0 }
 0x15a   : > { %v3994_v46 = vpop.f32.mrf.mxu1  ;;  %v4361_v54 = vpop.f32.mrf.mxu2 }
 0x15b   : > { %v4605_v10 = vpop.f32.mrf.mxu3  ;;  %v4512_v38 = vadd.f32 %v4361_v54, %v3993_v6  ;;  %v3995_v14 = vadd.f32 %v3994_v46, %v8422_v51  ;;  %v7030_v54 = vunpack.i.l.s16 %v3006_v40  ;;  %v8679_v51 = vsel %vm2429_vm10, 0, %v8097_v19 }
 0x15d   : > { %v4858_v41 = vpop.f32.mrf.mxu0  ;;  %v4756_v5 = vadd.f32 %v4605_v10, %v4512_v38  ;;  %vm3190_vm12 = vcmp.ne.s32.totalorder %v7030_v54, %v8224_v58 }
 0x15e   : > { %vm3192_vm0 = vmpackc.low %vm8251_vm7, %vm3190_vm12 }
 0x15f   : > { %v8666_v61 = vadd.f32 %v4858_v41, %v4756_v5  ;;  %v8676_v41 = vsel %vm4172_vm4, %v4196_v21, %v8617_v30  ;;  %v1209_v21 = vand.u32 31, %v6889_v1 }
 0x160   : > { %7219 = vmatmul.msk.bf16.gmra.mxu0 %vm3599_vm2, %v8128_v26 }
 0x161   : > { %vm1889_vm13 = vcmp.eq.s32.totalorder %v1209_v21, 31  ;;  %vm2645_vm15 = vcmp.eq.s32.totalorder %v1209_v21, 0 }
 0x162   : > { %v3997_v16 = vpop.f32.mrf.mxu1  ;;  %v4363_v36 = vpop.f32.mrf.mxu2  ;;  %vm2105_vm14 = vmpackc.low %vm1889_vm13, %vm1889_vm13 }
 0x163   : > { %v4607_v31 = vpop.f32.mrf.mxu3  ;;  %v4513_v6 = vadd.f32 %v4363_v36, %v3995_v14  ;;  %v3998_v8 = vadd.f32 %v3997_v16, %v8446_v4  ;;  %vm2864_vm6 = vmpackc.low %vm2645_vm15, %vm2645_vm15 }
 0x165   : > { %v4860_v10 = vpop.f32.mrf.mxu0  ;;  %7121 = vmatmul.msk.bf16.gmra.mxu1 %vm3599_vm2, %v8630_v52  ;;  %v4757_v46 = vadd.f32 %v4607_v31, %v4513_v6  ;;  %v3361_v6 = vsel %vm3192_vm0, 0, %v8097_v19  ;;  %v8701_v19 = vsel %vm8264_vm11, 0, %v7824_v47 }
 0x167   : > { %7154 = vmatmul.msk.bf16.gmra.mxu2 %vm3599_vm2, %v8676_v41  ;;  %v8686_v38 = vadd.f32 %v4860_v10, %v4757_v46  ;;  %v4200_v10 = vrot.slane %v3361_v6, 1 }
 0x168   : > { %7187 = vmatmul.msk.bf16.gmra.mxu3 %vm3599_vm2, %v8679_v51 }
 0x169   : > { %10026 = vst [vmem:[#allocation96_spill] sm:$0xff] %v8686_v38 }
 0x16a   : > { %v3999_v5 = vpop.f32.mrf.mxu1  ;;  %v4366_v40 = vpop.f32.mrf.mxu2 }
 0x16b   : > { %v4610_v14 = vpop.f32.mrf.mxu3  ;;  %v4514_v0 = vadd.f32 %v4366_v40, %v3998_v8  ;;  %v4000_v4 = vadd.f32 %v3999_v5, %v8463_v53  ;;  %v2177_v8 = vsel %vm2105_vm14, 65537, %v9974_v50 }
 0x16c   : > { %v2249_v5 = vunpack.c.l.b16 %v2177_v8 }
 0x16d   : > { %v4863_v36 = vpop.f32.mrf.mxu0  ;;  %v4758_v31 = vadd.f32 %v4610_v14, %v4514_v0  ;;  %v8707_v14 = vsel %vm4172_vm4, %v8617_v30, %v4200_v10 }
 0x16f   : > { %v8694_v54 = vadd.f32 %v4863_v36, %v4758_v31 }
 0x170   : > { %7220 = vmatmul.msk.bf16.gmra.mxu0 %vm3599_vm2, %v8165_v17 }
 0x172   : > { %v4002_v16 = vpop.f32.mrf.mxu1  ;;  %v4368_v46 = vpop.f32.mrf.mxu2 }
 0x173   : > { %v4612_v1 = vpop.f32.mrf.mxu3  ;;  %v4515_v38 = vadd.f32 %v4368_v46, %v4000_v4  ;;  %v4003_v47 = vadd.f32 %v4002_v16, %v8481_v44  ;;  %v6962_v4 = vunpack.i.l.s16 %v2249_v5  ;;  %v8723_v44 = vrot.slane %v8701_v19, 1 }
 0x175   : > { %v4865_v40 = vpop.f32.mrf.mxu0  ;;  %7122 = vmatmul.msk.bf16.gmra.mxu1 %vm3599_vm2, %v8595_v28  ;;  %v4759_v53 = vadd.f32 %v4612_v1, %v4515_v38  ;;  %v2937_v38 = vsel %vm2864_vm6, 65537, %v9974_v50  ;;  %vm2441_vm8 = vcmp.ne.s32.totalorder %v6962_v4, %v8224_v58 }
 0x176   : > { %v3010_v1 = vunpack.c.l.b16 %v2937_v38  ;;  %vm2443_vm9 = vmpackc.low %vm8251_vm7, %vm2441_vm8 }
 0x177   : > { %7155 = vmatmul.msk.bf16.gmra.mxu2 %vm3599_vm2, %v8707_v14  ;;  %v8713_v0 = vadd.f32 %v4865_v40, %v4759_v53  ;;  %v871_v53 = vadd.s32 288, %v8132_v34 }
 0x178   : > { %7188 = vmatmul.msk.bf16.gmra.mxu3 %vm3599_vm2, %v8701_v19 }
 0x17a   : > { %v4004_v36 = vpop.f32.mrf.mxu1  ;;  %v4371_v31 = vpop.f32.mrf.mxu2 }
 0x17b   : > { %v4615_v6 = vpop.f32.mrf.mxu3  ;;  %v4516_v30 = vadd.f32 %v4371_v31, %v4003_v47  ;;  %v4005_v16 = vadd.f32 %v4004_v36, %v8499_v39  ;;  %v8736_v39 = vsel %vm2443_vm9, 0, %v7829_v48 }
 0x17d   : > { %v4868_v46 = vpop.f32.mrf.mxu0  ;;  %v4760_v21 = vadd.f32 %v4615_v6, %v4516_v30  ;;  %v7034_v6 = vunpack.i.l.s16 %v3010_v1  ;;  %v8733_v30 = vsel %vm4172_vm4, %v4200_v10, %v8723_v44 }
 0x17f   : > { %v8720_v8 = vadd.f32 %v4868_v46, %v4760_v21  ;;  %v6893_v46 = vadd.s32 4294967295, %v871_v53  ;;  %vm3204_vm10 = vcmp.ne.s32.totalorder %v7034_v6, %v8224_v58 }
 0x180   : > { %7221 = vmatmul.msk.bf16.gmra.mxu0 %vm3599_vm2, %v8232_v42  ;;  %vm3206_vm12 = vmpackc.low %vm8251_vm7, %vm3204_vm10 }
 0x181   : > { %10027 = vst [vmem:[#allocation97_spill] sm:$0xff] %v8720_v8  ;;  %v1237_v10 = vand.u32 31, %v6893_v46  ;;  %v3363_v8 = vsel %vm3206_vm12, 0, %v7829_v48 }
 0x182   : > { %v4007_v40 = vpop.f32.mrf.mxu1  ;;  %v4373_v5 = vpop.f32.mrf.mxu2 }
 0x183   : > { %v4617_v47 = vpop.f32.mrf.mxu3  ;;  %v4517_v31 = vadd.f32 %v4373_v5, %v4005_v16  ;;  %v4008_v21 = vadd.f32 %v4007_v40, %v8523_v15  ;;  %vm1893_vm0 = vcmp.eq.s32.totalorder %v1237_v10, 31  ;;  %vm2649_vm14 = vcmp.eq.s32.totalorder %v1237_v10, 0 }
 0x184   : > { %vm2109_vm13 = vmpackc.low %vm1893_vm0, %vm1893_vm0 }
 0x185   : > { %v4870_v4 = vpop.f32.mrf.mxu0  ;;  %7123 = vmatmul.msk.bf16.gmra.mxu1 %vm3599_vm2, %v8679_v51  ;;  %v4761_v36 = vadd.f32 %v4617_v47, %v4517_v31  ;;  %vm2868_vm15 = vmpackc.low %vm2649_vm14, %vm2649_vm14 }
 0x187   : > { %7156 = vmatmul.msk.bf16.gmra.mxu2 %vm3599_vm2, %v8733_v30  ;;  %v8743_v38 = vadd.f32 %v4870_v4, %v4761_v36  ;;  %v4204_v4 = vrot.slane %v3363_v8, 1 }
 0x188   : > { %7189 = vmatmul.msk.bf16.gmra.mxu3 %vm3599_vm2, %v8736_v39 }
 0x189   : > { %10028 = vst [vmem:[#allocation98_spill] sm:$0xff] %v8743_v38  ;;  %v8759_v48 = vsel %vm4172_vm4, %v8723_v44, %v4204_v4 }
 0x18a   : > { %v4009_v1 = vpop.f32.mrf.mxu1  ;;  %v4376_v16 = vpop.f32.mrf.mxu2 }
 0x18b   : > { %v4620_v5 = vpop.f32.mrf.mxu3  ;;  %v4518_v53 = vadd.f32 %v4376_v16, %v4008_v21  ;;  %v4010_v15 = vadd.f32 %v4009_v1, %v8535_v35  ;;  %v2181_v21 = vsel %vm2109_vm13, 65537, %v9974_v50 }
 0x18d   : > { %v4873_v47 = vpop.f32.mrf.mxu0  ;;  %v4762_v31 = vadd.f32 %v4620_v5, %v4518_v53  ;;  %v2253_v53 = vunpack.c.l.b16 %v2181_v21 }
 0x18f   : > { %v8751_v6 = vadd.f32 %v4873_v47, %v4762_v31 }
 0x190   : > { %7222 = vmatmul.msk.bf16.gmra.mxu0 %vm3599_vm2, %v7879_v18 }
 0x191   : > { %10029 = vst [vmem:[#allocation99_spill] sm:$0xff] %v8751_v6 }
 0x192   : > { %v4012_v40 = vpop.f32.mrf.mxu1  ;;  %v4378_v36 = vpop.f32.mrf.mxu2 }
 0x193   : > { %v4622_v46 = vpop.f32.mrf.mxu3  ;;  %v4519_v38 = vadd.f32 %v4378_v36, %v4010_v15  ;;  %v4013_v8 = vadd.f32 %v4012_v40, %v8553_v27  ;;  %v6966_v15 = vunpack.i.l.s16 %v2253_v53 }
 0x195   : > { %v4875_v16 = vpop.f32.mrf.mxu0  ;;  %7124 = vmatmul.msk.bf16.gmra.mxu1 %vm3599_vm2, %v8701_v19  ;;  %v4763_v5 = vadd.f32 %v4622_v46, %v4519_v38  ;;  %v2941_v38 = vsel %vm2868_vm15, 65537, %v9974_v50  ;;  %vm2455_vm6 = vcmp.ne.s32.totalorder %v6966_v15, %v8224_v58 }
 0x196   : > { %v3014_v46 = vunpack.c.l.b16 %v2941_v38  ;;  %vm2457_vm8 = vmpackc.low %vm8251_vm7, %vm2455_vm6 }
 0x197   : > { %7157 = vmatmul.msk.bf16.gmra.mxu2 %vm3599_vm2, %v8759_v48  ;;  %v8765_v35 = vadd.f32 %v4875_v16, %v4763_v5  ;;  %v875_v16 = vadd.s32 320, %v8132_v34 }
 0x198   : > { %7190 = vmatmul.msk.bf16.gmra.mxu3 %vm3599_vm2, %v8701_v19 }
 0x199   : > { %v6897_v15 = vadd.s32 4294967295, %v875_v16 }
 0x19a   : > { %v4014_v1 = vpop.f32.mrf.mxu1  ;;  %v4381_v47 = vpop.f32.mrf.mxu2 }
 0x19b   : > { %v4625_v31 = vpop.f32.mrf.mxu3  ;;  %v4520_v36 = vadd.f32 %v4381_v47, %v4013_v8  ;;  %v4015_v27 = vadd.f32 %v4014_v1, %v8566_v11  ;;  %v7038_v47 = vunpack.i.l.s16 %v3014_v46  ;;  %v8785_v11 = vsel %vm2457_vm8, 0, %v7918_v25 }
 0x19d   : > { %v4878_v6 = vpop.f32.mrf.mxu0  ;;  %v4764_v10 = vadd.f32 %v4625_v31, %v4520_v36  ;;  %vm3218_vm9 = vcmp.ne.s32.totalorder %v7038_v47, %v8224_v58 }
 0x19e   : > { %vm3220_vm10 = vmpackc.low %vm8251_vm7, %vm3218_vm9 }
 0x19f   : > { %v8772_v21 = vadd.f32 %v4878_v6, %v4764_v10  ;;  %v8782_v6 = vsel %vm4172_vm4, %v4204_v4, %v8723_v44  ;;  %v1265_v4 = vand.u32 31, %v6897_v15 }
 0x1a0   : > { %7223 = vmatmul.msk.bf16.gmra.mxu0 %vm3599_vm2, %v7966_v45 }
 0x1a1   : > { %vm1897_vm12 = vcmp.eq.s32.totalorder %v1265_v4, 31  ;;  %vm2653_vm13 = vcmp.eq.s32.totalorder %v1265_v4, 0 }
 0x1a2   : > { %v4017_v40 = vpop.f32.mrf.mxu1  ;;  %v4383_v5 = vpop.f32.mrf.mxu2  ;;  %vm2113_vm0 = vmpackc.low %vm1897_vm12, %vm1897_vm12 }
 0x1a3   : > { %v4627_v53 = vpop.f32.mrf.mxu3  ;;  %v4521_v8 = vadd.f32 %v4383_v5, %v4015_v27  ;;  %v4018_v38 = vadd.f32 %v4017_v40, %v8286_v59  ;;  %vm2872_vm14 = vmpackc.low %vm2653_vm13, %vm2653_vm13 }
 0x1a5   : > { %v4880_v31 = vpop.f32.mrf.mxu0  ;;  %7125 = vmatmul.msk.bf16.gmra.mxu1 %vm3599_vm2, %v8736_v39  ;;  %v4765_v1 = vadd.f32 %v4627_v53, %v4521_v8  ;;  %v3365_v8 = vsel %vm3220_vm10, 0, %v7918_v25  ;;  %v8807_v25 = vsel %vm8264_vm11, 0, %v7989_v13 }
 0x1a7   : > { %7158 = vmatmul.msk.bf16.gmra.mxu2 %vm3599_vm2, %v8782_v6  ;;  %v8792_v36 = vadd.f32 %v4880_v31, %v4765_v1  ;;  %v4208_v31 = vrot.slane %v3365_v8, 1 }
 0x1a8   : > { %7191 = vmatmul.msk.bf16.gmra.mxu3 %vm3599_vm2, %v8785_v11 }
 0x1a9   : > { %10030 = vst [vmem:[#allocation100_spill] sm:$0xff] %v8792_v36 }
 0x1aa   : > { %v4019_v10 = vpop.f32.mrf.mxu1  ;;  %v4386_v46 = vpop.f32.mrf.mxu2 }
 0x1ab   : > { %v4630_v27 = vpop.f32.mrf.mxu3  ;;  %v4522_v16 = vadd.f32 %v4386_v46, %v4018_v38  ;;  %v4020_v59 = vadd.f32 %v4019_v10, %v8298_v23  ;;  %v2185_v38 = vsel %vm2113_vm0, 65537, %v9974_v50 }
 0x1ac   : > { %v2257_v10 = vunpack.c.l.b16 %v2185_v38 }
 0x1ad   : > { %v4883_v5 = vpop.f32.mrf.mxu0  ;;  %v4766_v53 = vadd.f32 %v4630_v27, %v4522_v16  ;;  %v8813_v27 = vsel %vm4172_vm4, %v8723_v44, %v4208_v31 }
 0x1af   : > { %v8800_v47 = vadd.f32 %v4883_v5, %v4766_v53 }
 0x1b0   : > { %7224 = vmatmul.msk.bf16.gmra.mxu0 %vm3599_vm2, %v8012_v60 }
 0x1b1   : > { %10031 = vst [vmem:[#allocation101_spill] sm:$0xff] %v8800_v47 }
 0x1b2   : > { %v4022_v40 = vpop.f32.mrf.mxu1  ;;  %v4388_v1 = vpop.f32.mrf.mxu2 }
 0x1b3   : > { %v4632_v15 = vpop.f32.mrf.mxu3  ;;  %v4523_v36 = vadd.f32 %v4388_v1, %v4020_v59  ;;  %v4023_v13 = vadd.f32 %v4022_v40, %v8311_v33  ;;  %v6970_v59 = vunpack.i.l.s16 %v2257_v10  ;;  %v8829_v33 = vrot.slane %v8807_v25, 1 }
 0x1b4   : > { %v879_v10 = vadd.s32 352, %v8132_v34 }
 0x1b5   : > { %v4885_v46 = vpop.f32.mrf.mxu0  ;;  %7126 = vmatmul.msk.bf16.gmra.mxu1 %vm3599_vm2, %v8701_v19  ;;  %v4767_v23 = vadd.f32 %v4632_v15, %v4523_v36  ;;  %v2945_v36 = vsel %vm2872_vm14, 65537, %v9974_v50  ;;  %vm2469_vm15 = vcmp.ne.s32.totalorder %v6970_v59, %v8224_v58  ;;  %v10033_v15 = vld [vmem:[#allocation14_spill] sm:$0xff] }
 0x1b6   : > { %v3018_v38 = vunpack.c.l.b16 %v2945_v36  ;;  %vm2471_vm6 = vmpackc.low %vm8251_vm7, %vm2469_vm15  ;;  %v10035_v36 = vld [vmem:[#allocation12_spill] sm:$0xff] }
 0x1b7   : > { %7159 = vmatmul.msk.bf16.gmra.mxu2 %vm3599_vm2, %v8813_v27  ;;  %v8819_v16 = vadd.f32 %v4885_v46, %v4767_v23 }
 0x1b8   : > { %7192 = vmatmul.msk.bf16.gmra.mxu3 %vm3599_vm2, %v8807_v25  ;;  %v7042_v59 = vunpack.i.l.s16 %v3018_v38 }
 0x1b9   : > { %10032 = vst [vmem:[#allocation102_spill] sm:$0xff] %v8819_v16 }
 0x1ba   : > { %v4024_v5 = vpop.f32.mrf.mxu1  ;;  %v4391_v53 = vpop.f32.mrf.mxu2  ;;  %vm3232_vm8 = vcmp.ne.s32.totalorder %v7042_v59, %v8224_v58 }
 0x1bb   : > { %v4635_v8 = vpop.f32.mrf.mxu3  ;;  %v4524_v44 = vadd.f32 %v4391_v53, %v4023_v13  ;;  %v4025_v40 = vadd.f32 %v4024_v5, %v8330_v2  ;;  %v8842_v2 = vsel %vm2471_vm6, 0, %v10035_v36  ;;  %vm3234_vm9 = vmpackc.low %vm8251_vm7, %vm3232_vm8 }
 0x1bc   : > { %10036 = vst [vmem:[#allocation12_spill] sm:$0xff] %v8842_v2  ;;  %v3367_v47 = vsel %vm3234_vm9, 0, %v10035_v36 }
 0x1bd   : > { %v4888_v1 = vpop.f32.mrf.mxu0  ;;  %v4768_v4 = vadd.f32 %v4635_v8, %v4524_v44 }
 0x1bf   : > { %v8826_v46 = vadd.f32 %v4888_v1, %v4768_v4  ;;  %v8839_v1 = vsel %vm4172_vm4, %v4208_v31, %v8829_v33  ;;  %v6901_v4 = vadd.s32 4294967295, %v879_v10 }
 0x1c0   : > { %7225 = vmatmul.msk.bf16.gmra.mxu0 %vm3599_vm2, %v10033_v15 }
 0x1c1   : > { %10034 = vst [vmem:[#allocation14_spill] sm:$0xff] %v8826_v46  ;;  %v1293_v31 = vand.u32 31, %v6901_v4 }
 0x1c2   : > { %v4027_v23 = vpop.f32.mrf.mxu1  ;;  %v4393_v13 = vpop.f32.mrf.mxu2 }
 0x1c3   : > { %v4637_v53 = vpop.f32.mrf.mxu3  ;;  %v4525_v8 = vadd.f32 %v4393_v13, %v4025_v40  ;;  %v4028_v40 = vadd.f32 %v4027_v23, %v8345_v32  ;;  %vm1901_vm10 = vcmp.eq.s32.totalorder %v1293_v31, 31  ;;  %vm2657_vm0 = vcmp.eq.s32.totalorder %v1293_v31, 0 }
 0x1c4   : > { %vm2117_vm12 = vmpackc.low %vm1901_vm10, %vm1901_vm10 }
 0x1c5   : > { %v4890_v44 = vpop.f32.mrf.mxu0  ;;  %7127 = vmatmul.msk.bf16.gmra.mxu1 %vm3599_vm2, %v8785_v11  ;;  %v4769_v5 = vadd.f32 %v4637_v53, %v4525_v8  ;;  %vm2876_vm13 = vmpackc.low %vm2657_vm0, %vm2657_vm0 }
 0x1c7   : > { %7160 = vmatmul.msk.bf16.gmra.mxu2 %vm3599_vm2, %v8839_v1  ;;  %v8849_v38 = vadd.f32 %v4890_v44, %v4769_v5  ;;  %v4212_v44 = vrot.slane %v3367_v47, 1 }
 0x1c8   : > { %7193 = vmatmul.msk.bf16.gmra.mxu3 %vm3599_vm2, %v8842_v2 }
 0x1c9   : > { %10037 = vst [vmem:[#allocation103_spill] sm:$0xff] %v8849_v38 }
 0x1ca   : > { %v4029_v13 = vpop.f32.mrf.mxu1  ;;  %v4396_v46 = vpop.f32.mrf.mxu2 }
 0x1cb   : > { %v4640_v16 = vpop.f32.mrf.mxu3  ;;  %v4526_v10 = vadd.f32 %v4396_v46, %v4028_v40  ;;  %v4030_v32 = vadd.f32 %v4029_v13, %v8369_v20  ;;  %v2189_v46 = vsel %vm2117_vm12, 65537, %v9974_v50 }
 0x1cd   : > { %v4893_v53 = vpop.f32.mrf.mxu0  ;;  %v4770_v8 = vadd.f32 %v4640_v16, %v4526_v10  ;;  %v8865_v16 = vsel %vm4172_vm4, %v8829_v33, %v4212_v44  ;;  %v2261_v10 = vunpack.c.l.b16 %v2189_v46 }
 0x1ce   : > { %10039 = vst [vmem:[#allocation105_spill] sm:$0xff] %v8865_v16 }
 0x1cf   : > { %v8857_v59 = vadd.f32 %v4893_v53, %v4770_v8 }
 0x1d0   : > { %7226 = vmatmul.msk.bf16.gmra.mxu0 %vm3599_vm2, %v8086_v55  ;;  %v10049_v55 = vld [vmem:[#allocation28_spill] sm:$0xff] }
 0x1d1   : > { %10038 = vst [vmem:[#allocation104_spill] sm:$0xff] %v8857_v59 }
 0x1d2   : > { %v4032_v23 = vpop.f32.mrf.mxu1  ;;  %v4398_v5 = vpop.f32.mrf.mxu2 }
 0x1d3   : > { %v4642_v4 = vpop.f32.mrf.mxu3  ;;  %v4527_v38 = vadd.f32 %v4398_v5, %v4030_v32  ;;  %v4033_v47 = vadd.f32 %v4032_v23, %v8382_v57  ;;  %v6974_v32 = vunpack.i.l.s16 %v2261_v10  ;;  %v883_v10 = vadd.s32 384, %v8132_v34 }
 0x1d5   : > { %v4895_v40 = vpop.f32.mrf.mxu0  ;;  %7128 = vmatmul.msk.bf16.gmra.mxu1 %vm3599_vm2, %v8807_v25  ;;  %v4771_v36 = vadd.f32 %v4642_v4, %v4527_v38  ;;  %v2949_v38 = vsel %vm2876_vm13, 65537, %v9974_v50  ;;  %vm2483_vm14 = vcmp.ne.s32.totalorder %v6974_v32, %v8224_v58  ;;  %v10041_v4 = vld [vmem:[#allocation23_spill] sm:$0xff]  ;;  %v10045_v32 = vld [vmem:[#allocation18_spill] sm:$0xff] }
 0x1d6   : > { %v3022_v46 = vunpack.c.l.b16 %v2949_v38  ;;  %vm2485_vm15 = vmpackc.low %vm8251_vm7, %vm2483_vm14 }
 0x1d7   : > { %7161 = vmatmul.msk.bf16.gmra.mxu2 %vm3599_vm2, %v8865_v16  ;;  %v8871_v20 = vadd.f32 %v4895_v40, %v4771_v36  ;;  %v10043_v36 = vld [vmem:[#allocation57_spill] sm:$0xff] }
 0x1d8   : > { %7194 = vmatmul.msk.bf16.gmra.mxu3 %vm3599_vm2, %v8807_v25 }
 0x1d9   : > { %10040 = vst [vmem:[#allocation106_spill] sm:$0xff] %v8871_v20 }
 0x1da   : > { %v4034_v13 = vpop.f32.mrf.mxu1  ;;  %v4401_v53 = vpop.f32.mrf.mxu2 }
 0x1db   : > { %v4645_v8 = vpop.f32.mrf.mxu3  ;;  %v4528_v5 = vadd.f32 %v4401_v53, %v4033_v47  ;;  %v4035_v57 = vadd.f32 %v4034_v13, %v10043_v36  ;;  %v8891_v13 = vsel %vm2485_vm15, 0, %v10045_v32  ;;  %v10048_v36 = vld [vmem:[#allocation60_spill] sm:$0xff] }
 0x1dc   : > { %10046 = vst [vmem:[#allocation18_spill] sm:$0xff] %v8891_v13 }
 0x1dd   : > { %v4898_v59 = vpop.f32.mrf.mxu0  ;;  %v4772_v31 = vadd.f32 %v4645_v8, %v4528_v5  ;;  %v7046_v8 = vunpack.i.l.s16 %v3022_v46 }
 0x1df   : > { %v8878_v40 = vadd.f32 %v4898_v59, %v4772_v31  ;;  %v8888_v59 = vsel %vm4172_vm4, %v4212_v44, %v8829_v33  ;;  %v6905_v31 = vadd.s32 4294967295, %v883_v10  ;;  %vm3246_vm6 = vcmp.ne.s32.totalorder %v7046_v8, %v8224_v58 }
 0x1e0   : > { %7227 = vmatmul.msk.bf16.gmra.mxu0 %vm3599_vm2, %v10041_v4  ;;  %10044 = vst [vmem:[#allocation57_spill] sm:$0xff] %v8888_v59  ;;  %vm3248_vm8 = vmpackc.low %vm8251_vm7, %vm3246_vm6 }
 0x1e1   : > { %10042 = vst [vmem:[#allocation107_spill] sm:$0xff] %v8878_v40  ;;  %v1321_v44 = vand.u32 31, %v6905_v31 }
 0x1e2   : > { %v4037_v23 = vpop.f32.mrf.mxu1  ;;  %v4403_v47 = vpop.f32.mrf.mxu2 }
 0x1e3   : > { %v4647_v53 = vpop.f32.mrf.mxu3  ;;  %v4529_v20 = vadd.f32 %v4403_v47, %v4035_v57  ;;  %v4038_v57 = vadd.f32 %v4037_v23, %v10048_v36  ;;  %vm1905_vm9 = vcmp.eq.s32.totalorder %v1321_v44, 31  ;;  %v10051_v23 = vld [vmem:[#allocation65_spill] sm:$0xff]  ;;  %vm2661_vm12 = vcmp.eq.s32.totalorder %v1321_v44, 0  ;;  %v10057_v44 = vld [vmem:[#allocation36_spill] sm:$0xff] }
 0x1e4   : > { %vm2121_vm10 = vmpackc.low %vm1905_vm9, %vm1905_vm9 }
 0x1e5   : > { %v4900_v5 = vpop.f32.mrf.mxu0  ;;  %7129 = vmatmul.msk.bf16.gmra.mxu1 %vm3599_vm2, %v8842_v2  ;;  %v4773_v38 = vadd.f32 %v4647_v53, %v4529_v20  ;;  %vm2880_vm0 = vmpackc.low %vm2661_vm12, %vm2661_vm12 }
 0x1e7   : > { %7162 = vmatmul.msk.bf16.gmra.mxu2 %vm3599_vm2, %v8888_v59  ;;  %v8898_v46 = vadd.f32 %v4900_v5, %v4773_v38  ;;  %v3369_v59 = vsel %vm3248_vm8, 0, %v10045_v32 }
 0x1e8   : > { %7195 = vmatmul.msk.bf16.gmra.mxu3 %vm3599_vm2, %v8891_v13  ;;  %v4216_v5 = vrot.slane %v3369_v59, 1 }
 0x1e9   : > { %10047 = vst [vmem:[#allocation108_spill] sm:$0xff] %v8898_v46 }
 0x1ea   : > { %v4039_v47 = vpop.f32.mrf.mxu1  ;;  %v4406_v40 = vpop.f32.mrf.mxu2  ;;  %v8919_v59 = vsel %vm4172_vm4, %v8829_v33, %v4216_v5 }
 0x1eb   : > { %v4650_v4 = vpop.f32.mrf.mxu3  ;;  %v4530_v20 = vadd.f32 %v4406_v40, %v4038_v57  ;;  %v4040_v38 = vadd.f32 %v4039_v47, %v10051_v23  ;;  %v2193_v40 = vsel %vm2121_vm10, 65537, %v9974_v50  ;;  %v10052_v57 = vld [vmem:[#allocation3_spill] sm:$0xff] }
 0x1ec   : > { %10054 = vst [vmem:[#allocation3_spill] sm:$0xff] %v8919_v59 }
 0x1ed   : > { %v4903_v10 = vpop.f32.mrf.mxu0  ;;  %v4774_v53 = vadd.f32 %v4650_v4, %v4530_v20  ;;  %v8913_v4 = vsel %vm8264_vm11, 0, %v10052_v57  ;;  %v2265_v20 = vunpack.c.l.b16 %v2193_v40 }
 0x1ee   : > { %10053 = vst [vmem:[#allocation65_spill] sm:$0xff] %v8913_v4 }
 0x1ef   : > { %v8906_v8 = vadd.f32 %v4903_v10, %v4774_v53  ;;  %v10056_v53 = vld [vmem:[#allocation68_spill] sm:$0xff] }
 0x1f0   : > { %7228 = vmatmul.msk.bf16.gmra.mxu0 %vm3599_vm2, %v10049_v55 }
 0x1f1   : > { %10050 = vst [vmem:[#allocation60_spill] sm:$0xff] %v8906_v8  ;;  %v6978_v8 = vunpack.i.l.s16 %v2265_v20  ;;  %v887_v20 = vadd.s32 416, %v8132_v34 }
 0x1f2   : > { %v4042_v31 = vpop.f32.mrf.mxu1  ;;  %v4408_v36 = vpop.f32.mrf.mxu2 }
 0x1f3   : > { %v4652_v46 = vpop.f32.mrf.mxu3  ;;  %v4531_v2 = vadd.f32 %v4408_v36, %v4040_v38  ;;  %v4043_v23 = vadd.f32 %v4042_v31, %v10056_v53  ;;  %vm2497_vm13 = vcmp.ne.s32.totalorder %v6978_v8, %v8224_v58  ;;  %v8935_v31 = vrot.slane %v8913_v4, 1 }
 0x1f4   : > { %vm2499_vm14 = vmpackc.low %vm8251_vm7, %vm2497_vm13 }
 0x1f5   : > { %v4905_v32 = vpop.f32.mrf.mxu0  ;;  %7130 = vmatmul.msk.bf16.gmra.mxu1 %vm3599_vm2, %v8807_v25  ;;  %v4775_v47 = vadd.f32 %v4652_v46, %v4531_v2  ;;  %v2953_v2 = vsel %vm2880_vm0, 65537, %v9974_v50 }
 0x1f6   : > { %v3026_v40 = vunpack.c.l.b16 %v2953_v2  ;;  %v10061_v2 = vld [vmem:[#allocation2_spill] sm:$0xff] }
 0x1f7   : > { %7163 = vmatmul.msk.bf16.gmra.mxu2 %vm3599_vm2, %v8919_v59  ;;  %v8925_v10 = vadd.f32 %v4905_v32, %v4775_v47  ;;  %v10059_v47 = vld [vmem:[#allocation72_spill] sm:$0xff]  ;;  %v10065_v59 = vld [vmem:[#allocation6_spill] sm:$0xff] }
 0x1f8   : > { %7196 = vmatmul.msk.bf16.gmra.mxu3 %vm3599_vm2, %v8913_v4 }
 0x1f9   : > { %10055 = vst [vmem:[#allocation109_spill] sm:$0xff] %v8925_v10 }
 0x1fa   : > { %v4044_v38 = vpop.f32.mrf.mxu1  ;;  %v4411_v36 = vpop.f32.mrf.mxu2 }
 0x1fb   : > { %v4655_v57 = vpop.f32.mrf.mxu3  ;;  %v4532_v33 = vadd.f32 %v4411_v36, %v4043_v23  ;;  %v4045_v53 = vadd.f32 %v4044_v38, %v10059_v47  ;;  %v8948_v38 = vsel %vm2499_vm14, 0, %v10061_v2  ;;  %v6909_v47 = vadd.s32 4294967295, %v887_v20 }
 0x1fc   : > { %10062 = vst [vmem:[#allocation2_spill] sm:$0xff] %v8948_v38 }
 0x1fd   : > { %v4908_v55 = vpop.f32.mrf.mxu0  ;;  %v4776_v46 = vadd.f32 %v4655_v57, %v4532_v33  ;;  %v7050_v57 = vunpack.i.l.s16 %v3026_v40 }
 0x1ff   : > { %v8932_v32 = vadd.f32 %v4908_v55, %v4776_v46  ;;  %v8945_v55 = vsel %vm4172_vm4, %v4216_v5, %v8935_v31  ;;  %vm3260_vm15 = vcmp.ne.s32.totalorder %v7050_v57, %v8224_v58  ;;  %v1349_v5 = vand.u32 31, %v6909_v47 }
 0x200   : > { %7229 = vmatmul.msk.bf16.gmra.mxu0 %vm3599_vm2, %v10057_v44  ;;  %10060 = vst [vmem:[#allocation72_spill] sm:$0xff] %v8945_v55  ;;  %vm3262_vm6 = vmpackc.low %vm8251_vm7, %vm3260_vm15 }
 0x201   : > { %10058 = vst [vmem:[#allocation68_spill] sm:$0xff] %v8932_v32  ;;  %vm1909_vm8 = vcmp.eq.s32.totalorder %v1349_v5, 31  ;;  %vm2665_vm10 = vcmp.eq.s32.totalorder %v1349_v5, 0  ;;  %v10071_v5 = vld [vmem:[#allocation9_spill] sm:$0xff] }
 0x202   : > { %v4047_v10 = vpop.f32.mrf.mxu1  ;;  %v4413_v23 = vpop.f32.mrf.mxu2  ;;  %vm2125_vm9 = vmpackc.low %vm1909_vm8, %vm1909_vm8 }
 0x203   : > { %v4657_v36 = vpop.f32.mrf.mxu3  ;;  %v4533_v8 = vadd.f32 %v4413_v23, %v4045_v53  ;;  %v10064_v53 = vld [vmem:[#allocation75_spill] sm:$0xff]  ;;  %vm2884_vm12 = vmpackc.low %vm2665_vm10, %vm2665_vm10 }
 0x204   : > { %v4048_v23 = vadd.f32 %v4047_v10, %v10064_v53  ;;  %v10067_v10 = vld [vmem:[#allocation80_spill] sm:$0xff] }
 0x205   : > { %v4910_v33 = vpop.f32.mrf.mxu0  ;;  %7131 = vmatmul.msk.bf16.gmra.mxu1 %vm3599_vm2, %v8891_v13  ;;  %v4777_v46 = vadd.f32 %v4657_v36, %v4533_v8 }
 0x207   : > { %7164 = vmatmul.msk.bf16.gmra.mxu2 %vm3599_vm2, %v8945_v55  ;;  %v8955_v40 = vadd.f32 %v4910_v33, %v4777_v46  ;;  %v3371_v55 = vsel %vm3262_vm6, 0, %v10061_v2 }
 0x208   : > { %7197 = vmatmul.msk.bf16.gmra.mxu3 %vm3599_vm2, %v8948_v38  ;;  %v4220_v33 = vrot.slane %v3371_v55, 1  ;;  %v10070_v55 = vld [vmem:[#allocation83_spill] sm:$0xff] }
 0x209   : > { %10063 = vst [vmem:[#allocation110_spill] sm:$0xff] %v8955_v40 }
 0x20a   : > { %v4049_v32 = vpop.f32.mrf.mxu1  ;;  %v4416_v44 = vpop.f32.mrf.mxu2 }
 0x20b   : > { %v4660_v13 = vpop.f32.mrf.mxu3  ;;  %v4534_v20 = vadd.f32 %v4416_v44, %v4048_v23  ;;  %v4050_v46 = vadd.f32 %v4049_v32, %v10067_v10  ;;  %v2197_v44 = vsel %vm2125_vm9, 65537, %v9974_v50 }
 0x20d   : > { %v4913_v36 = vpop.f32.mrf.mxu0  ;;  %v4778_v8 = vadd.f32 %v4660_v13, %v4534_v20  ;;  %v8971_v13 = vsel %vm4172_vm4, %v8935_v31, %v4220_v33  ;;  %v2269_v20 = vunpack.c.l.b16 %v2197_v44 }
 0x20e   : > { %10068 = vst [vmem:[#allocation80_spill] sm:$0xff] %v8971_v13 }
 0x20f   : > { %v8963_v57 = vadd.f32 %v4913_v36, %v4778_v8 }
 0x210   : > { %7230 = vmatmul.msk.bf16.gmra.mxu0 %vm3599_vm2, %v10065_v59 }
 0x211   : > { %10066 = vst [vmem:[#allocation75_spill] sm:$0xff] %v8963_v57 }
 0x212   : > { %v4052_v47 = vpop.f32.mrf.mxu1  ;;  %v4418_v53 = vpop.f32.mrf.mxu2 }
 0x213   : > { %v4662_v40 = vpop.f32.mrf.mxu3  ;;  %v4535_v16 = vadd.f32 %v4418_v53, %v4050_v46  ;;  %v4053_v36 = vadd.f32 %v4052_v47, %v10070_v55  ;;  %v6982_v53 = vunpack.i.l.s16 %v2269_v20  ;;  %v891_v20 = vadd.s32 448, %v8132_v34 }
 0x215   : > { %v4915_v23 = vpop.f32.mrf.mxu0  ;;  %7132 = vmatmul.msk.bf16.gmra.mxu1 %vm3599_vm2, %v8913_v4  ;;  %v4779_v2 = vadd.f32 %v4662_v40, %v4535_v16  ;;  %v2957_v16 = vsel %vm2884_vm12, 65537, %v9974_v50  ;;  %vm2511_vm0 = vcmp.ne.s32.totalorder %v6982_v53, %v8224_v58  ;;  %v10075_v53 = vld [vmem:[#allocation7_spill] sm:$0xff] }
 0x216   : > { %v3030_v44 = vunpack.c.l.b16 %v2957_v16  ;;  %vm2513_vm13 = vmpackc.low %vm8251_vm7, %vm2511_vm0 }
 0x217   : > { %7165 = vmatmul.msk.bf16.gmra.mxu2 %vm3599_vm2, %v8971_v13  ;;  %v8977_v32 = vadd.f32 %v4915_v23, %v4779_v2  ;;  %v10073_v2 = vld [vmem:[#allocation87_spill] sm:$0xff] }
 0x218   : > { %7198 = vmatmul.msk.bf16.gmra.mxu3 %vm3599_vm2, %v8913_v4 }
 0x219   : > { %10069 = vst [vmem:[#allocation111_spill] sm:$0xff] %v8977_v32 }
 0x21a   : > { %v4054_v8 = vpop.f32.mrf.mxu1  ;;  %v4421_v10 = vpop.f32.mrf.mxu2 }
 0x21b   : > { %v4665_v46 = vpop.f32.mrf.mxu3  ;;  %v4536_v57 = vadd.f32 %v4421_v10, %v4053_v36  ;;  %v4055_v47 = vadd.f32 %v4054_v8, %v10073_v2  ;;  %v8997_v8 = vsel %vm2513_vm13, 0, %v10075_v53  ;;  %v10078_v2 = vld [vmem:[#allocation41_spill] sm:$0xff] }
 0x21c   : > { %10076 = vst [vmem:[#allocation7_spill] sm:$0xff] %v8997_v8 }
 0x21d   : > { %v4918_v59 = vpop.f32.mrf.mxu0  ;;  %v4780_v40 = vadd.f32 %v4665_v46, %v4536_v57  ;;  %v7054_v57 = vunpack.i.l.s16 %v3030_v44 }
 0x21f   : > { %v8984_v23 = vadd.f32 %v4918_v59, %v4780_v40  ;;  %v8994_v59 = vsel %vm4172_vm4, %v4220_v33, %v8935_v31  ;;  %v6913_v40 = vadd.s32 4294967295, %v891_v20  ;;  %vm3274_vm14 = vcmp.ne.s32.totalorder %v7054_v57, %v8224_v58 }
 0x220   : > { %7231 = vmatmul.msk.bf16.gmra.mxu0 %vm3599_vm2, %v10071_v5  ;;  %10074 = vst [vmem:[#allocation87_spill] sm:$0xff] %v8994_v59  ;;  %vm3276_vm15 = vmpackc.low %vm8251_vm7, %vm3274_vm14 }
 0x221   : > { %10072 = vst [vmem:[#allocation83_spill] sm:$0xff] %v8984_v23  ;;  %v1377_v33 = vand.u32 31, %v6913_v40 }
 0x222   : > { %v4057_v55 = vpop.f32.mrf.mxu1  ;;  %v4423_v36 = vpop.f32.mrf.mxu2 }
 0x223   : > { %v4667_v10 = vpop.f32.mrf.mxu3  ;;  %v4537_v32 = vadd.f32 %v4423_v36, %v4055_v47  ;;  %v4058_v47 = vadd.f32 %v4057_v55, %v10078_v2  ;;  %vm1913_vm6 = vcmp.eq.s32.totalorder %v1377_v33, 31  ;;  %v10081_v55 = vld [vmem:[#allocation43_spill] sm:$0xff]  ;;  %vm2669_vm9 = vcmp.eq.s32.totalorder %v1377_v33, 0 }
 0x224   : > { %vm2129_vm8 = vmpackc.low %vm1913_vm6, %vm1913_vm6  ;;  %v10086_v33 = vld [vmem:[#allocation15_spill] sm:$0xff] }
 0x225   : > { %v4920_v46 = vpop.f32.mrf.mxu0  ;;  %7133 = vmatmul.msk.bf16.gmra.mxu1 %vm3599_vm2, %v8948_v38  ;;  %v4781_v16 = vadd.f32 %v4667_v10, %v4537_v32  ;;  %v10079_v38 = vld [vmem:[#allocation11_spill] sm:$0xff]  ;;  %vm2888_vm10 = vmpackc.low %vm2669_vm9, %vm2669_vm9 }
 0x227   : > { %7166 = vmatmul.msk.bf16.gmra.mxu2 %vm3599_vm2, %v8994_v59  ;;  %v9004_v44 = vadd.f32 %v4920_v46, %v4781_v16  ;;  %v3373_v59 = vsel %vm3276_vm15, 0, %v10075_v53 }
 0x228   : > { %7199 = vmatmul.msk.bf16.gmra.mxu3 %vm3599_vm2, %v8997_v8  ;;  %v4224_v46 = vrot.slane %v3373_v59, 1 }
 0x229   : > { %10077 = vst [vmem:[#allocation112_spill] sm:$0xff] %v9004_v44 }
 0x22a   : > { %v4059_v36 = vpop.f32.mrf.mxu1  ;;  %v4426_v23 = vpop.f32.mrf.mxu2  ;;  %v9025_v59 = vsel %vm4172_vm4, %v8935_v31, %v4224_v46 }
 0x22b   : > { %v4670_v5 = vpop.f32.mrf.mxu3  ;;  %v4538_v32 = vadd.f32 %v4426_v23, %v4058_v47  ;;  %v4060_v16 = vadd.f32 %v4059_v36, %v10081_v55  ;;  %v2201_v23 = vsel %vm2129_vm8, 65537, %v9974_v50  ;;  %v10082_v47 = vld [vmem:[#allocation10_spill] sm:$0xff]  ;;  %10083 = vst [vmem:[#allocation43_spill] sm:$0xff] %v9025_v59 }
 0x22d   : > { %v4923_v20 = vpop.f32.mrf.mxu0  ;;  %v4782_v10 = vadd.f32 %v4670_v5, %v4538_v32  ;;  %v9019_v5 = vsel %vm8264_vm11, 0, %v10082_v47  ;;  %v2273_v32 = vunpack.c.l.b16 %v2201_v23 }
 0x22f   : > { %v9012_v57 = vadd.f32 %v4923_v20, %v4782_v10  ;;  %v10085_v10 = vld [vmem:[#allocation46_spill] sm:$0xff] }
 0x230   : > { %7232 = vmatmul.msk.bf16.gmra.mxu0 %vm3599_vm2, %v10079_v38 }
 0x231   : > { %10080 = vst [vmem:[#allocation41_spill] sm:$0xff] %v9012_v57  ;;  %v6986_v57 = vunpack.i.l.s16 %v2273_v32  ;;  %v895_v32 = vadd.s32 480, %v8132_v34 }
 0x232   : > { %v4062_v40 = vpop.f32.mrf.mxu1  ;;  %v4428_v2 = vpop.f32.mrf.mxu2 }
 0x233   : > { %v4672_v44 = vpop.f32.mrf.mxu3  ;;  %v4539_v13 = vadd.f32 %v4428_v2, %v4060_v16  ;;  %v4063_v55 = vadd.f32 %v4062_v40, %v10085_v10  ;;  %vm2525_vm12 = vcmp.ne.s32.totalorder %v6986_v57, %v8224_v58  ;;  %v9041_v40 = vrot.slane %v9019_v5, 1 }
 0x234   : > { %vm2527_vm0 = vmpackc.low %vm8251_vm7, %vm2525_vm12 }
 0x235   : > { %v4925_v53 = vpop.f32.mrf.mxu0  ;;  %7134 = vmatmul.msk.bf16.gmra.mxu1 %vm3599_vm2, %v8913_v4  ;;  %v4783_v36 = vadd.f32 %v4672_v44, %v4539_v13  ;;  %v2961_v13 = vsel %vm2888_vm10, 65537, %v9974_v50 }
 0x236   : > { %v3034_v23 = vunpack.c.l.b16 %v2961_v13  ;;  %v10090_v13 = vld [vmem:[#allocation13_spill] sm:$0xff] }
 0x237   : > { %7167 = vmatmul.msk.bf16.gmra.mxu2 %vm3599_vm2, %v9025_v59  ;;  %v9031_v20 = vadd.f32 %v4925_v53, %v4783_v36  ;;  %v10088_v36 = vld [vmem:[#allocation48_spill] sm:$0xff]  ;;  %v10094_v59 = vld [vmem:[#allocation17_spill] sm:$0xff] }
 0x238   : > { %7200 = vmatmul.msk.bf16.gmra.mxu3 %vm3599_vm2, %v9019_v5 }
 0x239   : > { %10084 = vst [vmem:[#allocation10_spill] sm:$0xff] %v9031_v20 }
 0x23a   : > { %v4064_v16 = vpop.f32.mrf.mxu1  ;;  %v4431_v2 = vpop.f32.mrf.mxu2 }
 0x23b   : > { %v4675_v47 = vpop.f32.mrf.mxu3  ;;  %v4540_v31 = vadd.f32 %v4431_v2, %v4063_v55  ;;  %v4065_v10 = vadd.f32 %v4064_v16, %v10088_v36  ;;  %v9054_v16 = vsel %vm2527_vm0, 0, %v10090_v13  ;;  %v6917_v36 = vadd.s32 4294967295, %v895_v32 }
 0x23c   : > { %10091 = vst [vmem:[#allocation13_spill] sm:$0xff] %v9054_v16 }
 0x23d   : > { %v4928_v38 = vpop.f32.mrf.mxu0  ;;  %v4784_v44 = vadd.f32 %v4675_v47, %v4540_v31  ;;  %v7058_v47 = vunpack.i.l.s16 %v3034_v23 }
 0x23f   : > { %v9038_v53 = vadd.f32 %v4928_v38, %v4784_v44  ;;  %v9051_v38 = vsel %vm4172_vm4, %v4224_v46, %v9041_v40  ;;  %vm3288_vm13 = vcmp.ne.s32.totalorder %v7058_v47, %v8224_v58  ;;  %v1405_v46 = vand.u32 31, %v6917_v36 }
 0x240   : > { %7233 = vmatmul.msk.bf16.gmra.mxu0 %vm3599_vm2, %v10086_v33  ;;  %10089 = vst [vmem:[#allocation48_spill] sm:$0xff] %v9051_v38  ;;  %vm3290_vm14 = vmpackc.low %vm8251_vm7, %vm3288_vm13 }
 0x241   : > { %10087 = vst [vmem:[#allocation46_spill] sm:$0xff] %v9038_v53  ;;  %vm1917_vm15 = vcmp.eq.s32.totalorder %v1405_v46, 31  ;;  %vm2673_vm8 = vcmp.eq.s32.totalorder %v1405_v46, 0  ;;  %v10099_v46 = vld [vmem:[#allocation24_spill] sm:$0xff] }
 0x242   : > { %v4067_v20 = vpop.f32.mrf.mxu1  ;;  %v4433_v55 = vpop.f32.mrf.mxu2  ;;  %vm2133_vm6 = vmpackc.low %vm1917_vm15, %vm1917_vm15 }
 0x243   : > { %v4677_v2 = vpop.f32.mrf.mxu3  ;;  %v4541_v57 = vadd.f32 %v4433_v55, %v4065_v10  ;;  %v10093_v10 = vld [vmem:[#allocation52_spill] sm:$0xff]  ;;  %vm2892_vm9 = vmpackc.low %vm2673_vm8, %vm2673_vm8 }
 0x244   : > { %v4068_v55 = vadd.f32 %v4067_v20, %v10093_v10  ;;  %v10096_v20 = vld [vmem:[#allocation54_spill] sm:$0xff] }
 0x245   : > { %v4930_v31 = vpop.f32.mrf.mxu0  ;;  %7135 = vmatmul.msk.bf16.gmra.mxu1 %vm3599_vm2, %v8997_v8  ;;  %v4785_v44 = vadd.f32 %v4677_v2, %v4541_v57 }
 0x247   : > { %7168 = vmatmul.msk.bf16.gmra.mxu2 %vm3599_vm2, %v9051_v38  ;;  %v9061_v23 = vadd.f32 %v4930_v31, %v4785_v44  ;;  %v3375_v38 = vsel %vm3290_vm14, 0, %v10090_v13 }
 0x248   : > { %7201 = vmatmul.msk.bf16.gmra.mxu3 %vm3599_vm2, %v9054_v16  ;;  %v4228_v31 = vrot.slane %v3375_v38, 1  ;;  %v10098_v38 = vld [vmem:[#allocation58_spill] sm:$0xff] }
 0x249   : > { %10092 = vst [vmem:[#allocation113_spill] sm:$0xff] %v9061_v23 }
 0x24a   : > { %v4069_v53 = vpop.f32.mrf.mxu1  ;;  %v4436_v33 = vpop.f32.mrf.mxu2 }
 0x24b   : > { %v4680_v8 = vpop.f32.mrf.mxu3  ;;  %v4542_v32 = vadd.f32 %v4436_v33, %v4068_v55  ;;  %v4070_v44 = vadd.f32 %v4069_v53, %v10096_v20  ;;  %v2205_v33 = vsel %vm2133_vm6, 65537, %v9974_v50 }
 0x24d   : > { %v4933_v2 = vpop.f32.mrf.mxu0  ;;  %v4786_v57 = vadd.f32 %v4680_v8, %v4542_v32  ;;  %v9077_v8 = vsel %vm4172_vm4, %v9041_v40, %v4228_v31  ;;  %v2277_v32 = vunpack.c.l.b16 %v2205_v33 }
 0x24f   : > { %v9069_v47 = vadd.f32 %v4933_v2, %v4786_v57 }
 0x250   : > { %7234 = vmatmul.msk.bf16.gmra.mxu0 %vm3599_vm2, %v10094_v59 }
 0x251   : > { %10095 = vst [vmem:[#allocation52_spill] sm:$0xff] %v9069_v47 }
 0x252   : > { %v4072_v36 = vpop.f32.mrf.mxu1  ;;  %v4438_v10 = vpop.f32.mrf.mxu2 }
 0x253   : > { %v4682_v23 = vpop.f32.mrf.mxu3  ;;  %v4543_v4 = vadd.f32 %v4438_v10, %v4070_v44  ;;  %v4073_v2 = vadd.f32 %v4072_v36, %v10098_v38  ;;  %v6990_v10 = vunpack.i.l.s16 %v2277_v32  ;;  %v899_v32 = vadd.s32 512, %v8132_v34 }
 0x255   : > { %v4935_v55 = vpop.f32.mrf.mxu0  ;;  %7136 = vmatmul.msk.bf16.gmra.mxu1 %vm3599_vm2, %v9019_v5  ;;  %v4787_v13 = vadd.f32 %v4682_v23, %v4543_v4  ;;  %v2965_v4 = vsel %vm2892_vm9, 65537, %v9974_v50  ;;  %vm2539_vm10 = vcmp.ne.s32.totalorder %v6990_v10, %v8224_v58  ;;  %v10103_v10 = vld [vmem:[#allocation19_spill] sm:$0xff] }
 0x256   : > { %v3038_v33 = vunpack.c.l.b16 %v2965_v4  ;;  %vm2541_vm12 = vmpackc.low %vm8251_vm7, %vm2539_vm10 }
 0x257   : > { %7169 = vmatmul.msk.bf16.gmra.mxu2 %vm3599_vm2, %v9077_v8  ;;  %v9083_v53 = vadd.f32 %v4935_v55, %v4787_v13  ;;  %v10101_v13 = vld [vmem:[#allocation61_spill] sm:$0xff] }
 0x258   : > { %7202 = vmatmul.msk.bf16.gmra.mxu3 %vm3599_vm2, %v9019_v5 }
 0x259   : > { %10097 = vst [vmem:[#allocation54_spill] sm:$0xff] %v9083_v53 }
 0x25a   : > { %v4074_v57 = vpop.f32.mrf.mxu1  ;;  %v4441_v20 = vpop.f32.mrf.mxu2 }
 0x25b   : > { %v4685_v44 = vpop.f32.mrf.mxu3  ;;  %v4544_v47 = vadd.f32 %v4441_v20, %v4073_v2  ;;  %v4075_v36 = vadd.f32 %v4074_v57, %v10101_v13  ;;  %v9103_v57 = vsel %vm2541_vm12, 0, %v10103_v10  ;;  %v10106_v13 = vld [vmem:[#allocation66_spill] sm:$0xff] }
 0x25c   : > { %10104 = vst [vmem:[#allocation19_spill] sm:$0xff] %v9103_v57 }
 0x25d   : > { %v4938_v59 = vpop.f32.mrf.mxu0  ;;  %v4788_v23 = vadd.f32 %v4685_v44, %v4544_v47  ;;  %v7062_v47 = vunpack.i.l.s16 %v3038_v33 }
 0x25f   : > { %v9090_v55 = vadd.f32 %v4938_v59, %v4788_v23  ;;  %v9100_v59 = vsel %vm4172_vm4, %v4228_v31, %v9041_v40  ;;  %v6921_v23 = vadd.s32 4294967295, %v899_v32  ;;  %vm3302_vm0 = vcmp.ne.s32.totalorder %v7062_v47, %v8224_v58 }
 0x260   : > { %7235 = vmatmul.msk.bf16.gmra.mxu0 %vm3599_vm2, %v10099_v46  ;;  %10102 = vst [vmem:[#allocation61_spill] sm:$0xff] %v9100_v59  ;;  %vm3304_vm13 = vmpackc.low %vm8251_vm7, %vm3302_vm0 }
 0x261   : > { %10100 = vst [vmem:[#allocation58_spill] sm:$0xff] %v9090_v55  ;;  %v1433_v31 = vand.u32 31, %v6921_v23  ;;  %v3377_v46 = vsel %vm3304_vm13, 0, %v10103_v10  ;;  %v10111_v10 = vld [vmem:[#allocation25_spill] sm:$0xff] }
 0x262   : > { %v4077_v38 = vpop.f32.mrf.mxu1  ;;  %v4443_v2 = vpop.f32.mrf.mxu2 }
 0x263   : > { %v4687_v20 = vpop.f32.mrf.mxu3  ;;  %v4545_v53 = vadd.f32 %v4443_v2, %v4075_v36  ;;  %v4078_v36 = vadd.f32 %v4077_v38, %v10106_v13  ;;  %vm1921_vm14 = vcmp.eq.s32.totalorder %v1433_v31, 31  ;;  %v10109_v38 = vld [vmem:[#allocation69_spill] sm:$0xff]  ;;  %vm2677_vm6 = vcmp.eq.s32.totalorder %v1433_v31, 0 }
 0x264   : > { %vm2137_vm15 = vmpackc.low %vm1921_vm14, %vm1921_vm14 }
 0x265   : > { %v4940_v44 = vpop.f32.mrf.mxu0  ;;  %7137 = vmatmul.msk.bf16.gmra.mxu1 %vm3599_vm2, %v9054_v16  ;;  %v4789_v4 = vadd.f32 %v4687_v20, %v4545_v53  ;;  %vm2896_vm8 = vmpackc.low %vm2677_vm6, %vm2677_vm6 }
 0x267   : > { %7170 = vmatmul.msk.bf16.gmra.mxu2 %vm3599_vm2, %v9100_v59  ;;  %v9110_v33 = vadd.f32 %v4940_v44, %v4789_v4  ;;  %v10107_v59 = vld [vmem:[#allocation29_spill] sm:$0xff]  ;;  %v4232_v44 = vrot.slane %v3377_v46, 1  ;;  %v9131_v46 = vsel %vm8264_vm11, 0, %v10111_v10 }
 0x268   : > { %7203 = vmatmul.msk.bf16.gmra.mxu3 %vm3599_vm2, %v9103_v57 }
 0x269   : > { %10105 = vst [vmem:[#allocation114_spill] sm:$0xff] %v9110_v33 }
 0x26a   : > { %v4079_v2 = vpop.f32.mrf.mxu1  ;;  %v4446_v55 = vpop.f32.mrf.mxu2 }
 0x26b   : > { %v4690_v34 = vpop.f32.mrf.mxu3  ;;  %v4546_v53 = vadd.f32 %v4446_v55, %v4078_v36  ;;  %v4080_v4 = vadd.f32 %v4079_v2, %v10109_v38  ;;  %v2209_v55 = vsel %vm2137_vm15, 65537, %v9974_v50 }
 0x26d   : > { %v4943_v32 = vpop.f32.mrf.mxu0  ;;  %v4790_v20 = vadd.f32 %v4690_v34, %v4546_v53  ;;  %v9126_v34 = vsel %vm4172_vm4, %v9041_v40, %v4232_v44  ;;  %v2281_v53 = vunpack.c.l.b16 %v2209_v55 }
 0x26e   : > { %10110 = vst [vmem:[#allocation69_spill] sm:$0xff] %v9126_v34 }
 0x26f   : > { %v9118_v47 = vadd.f32 %v4943_v32, %v4790_v20  ;;  %v10113_v20 = vld [vmem:[#allocation73_spill] sm:$0xff]  ;;  %v6994_v10 = vunpack.i.l.s16 %v2281_v53  ;;  %v10116_v53 = vld [vmem:[#allocation76_spill] sm:$0xff] }
 0x270   : > { %7236 = vmatmul.msk.bf16.gmra.mxu0 %vm3599_vm2, %v10107_v59 }
 0x271   : > { %10108 = vst [vmem:[#allocation66_spill] sm:$0xff] %v9118_v47  ;;  %vm2553_vm9 = vcmp.ne.s32.totalorder %v6994_v10, %v8224_v58 }
 0x272   : > { %v4082_v23 = vpop.f32.mrf.mxu1  ;;  %v4448_v13 = vpop.f32.mrf.mxu2  ;;  %vm2555_vm10 = vmpackc.low %vm8251_vm7, %vm2553_vm9 }
 0x273   : > { %v4692_v33 = vpop.f32.mrf.mxu3  ;;  %v4547_v16 = vadd.f32 %v4448_v13, %v4080_v4  ;;  %v4083_v40 = vadd.f32 %v4082_v23, %v10113_v20  ;;  %v10114_v23 = vld [vmem:[#allocation37_spill] sm:$0xff] }
 0x275   : > { %v4945_v36 = vpop.f32.mrf.mxu0  ;;  %7138 = vmatmul.msk.bf16.gmra.mxu1 %vm3599_vm2, %v9019_v5  ;;  %v4791_v2 = vadd.f32 %v4692_v33, %v4547_v16  ;;  %v2969_v33 = vsel %vm2896_vm8, 65537, %v9974_v50 }
 0x276   : > { %v3042_v55 = vunpack.c.l.b16 %v2969_v33  ;;  %v10118_v33 = vld [vmem:[#allocation30_spill] sm:$0xff] }
 0x277   : > { %7171 = vmatmul.msk.bf16.gmra.mxu2 %vm3599_vm2, %v9126_v34  ;;  %v9137_v32 = vadd.f32 %v4945_v36, %v4791_v2  ;;  %v9154_v2 = vrot.slane %v9131_v46, 1 }
 0x278   : > { %7204 = vmatmul.msk.bf16.gmra.mxu3 %vm3599_vm2, %v9131_v46  ;;  %v7066_v10 = vunpack.i.l.s16 %v3042_v55 }
 0x279   : > { %10112 = vst [vmem:[#allocation25_spill] sm:$0xff] %v9137_v32 }
 0x27a   : > { %v4084_v38 = vpop.f32.mrf.mxu1  ;;  %v4451_v4 = vpop.f32.mrf.mxu2  ;;  %vm3316_vm12 = vcmp.ne.s32.totalorder %v7066_v10, %v8224_v58 }
 0x27b   : > { %v4695_v13 = vpop.f32.mrf.mxu3  ;;  %v4548_v62 = vadd.f32 %v4451_v4, %v4083_v40  ;;  %v7392_v40 = vld [vmem:[%s9146_s15] sm:$0xff]  ;;  %vm3318_vm0 = vmpackc.low %vm8251_vm7, %vm3316_vm12 }
 0x27d   : > { %v4948_v16 = vpop.f32.mrf.mxu0  ;;  %v4792_v31 = vadd.f32 %v4695_v13, %v4548_v62  ;;  %v4085_v62 = vadd.f32 %v4084_v38, %v10116_v53  ;;  %v4816_v38 = vshrl.u32 %v10118_v33, 16 }
 0x27f   : > { %v9151_v36 = vadd.f32 %v4948_v16, %v4792_v31  ;;  %v9164_v16 = vsel %vm4172_vm4, %v4232_v44, %v9154_v2  ;;  %v9167_v31 = vsel %vm2555_vm10, 0, %v10118_v33 }
 0x280   : > { %7237 = vmatmul.msk.bf16.gmra.mxu0 %vm3599_vm2, %v10114_v23  ;;  %10117 = vst [vmem:[#allocation76_spill] sm:$0xff] %v9164_v16 }
 0x281   : > { %10115 = vst [vmem:[#allocation73_spill] sm:$0xff] %v9151_v36  ;;  %v786_v36 = vshrl.u32 %v7392_v40, 16 }
 0x282   : > { %v4087_v20 = vpop.f32.mrf.mxu1  ;;  %v4453_v4 = vpop.f32.mrf.mxu2  ;;  %10119 = vst [vmem:[#allocation30_spill] sm:$0xff] %v9167_v31 }
 0x283   : > { %v4697_v13 = vpop.f32.mrf.mxu3  ;;  %v4549_v32 = vadd.f32 %v4453_v4, %v4085_v62  ;;  %v10121_v62 = vld [vmem:[#allocation33_spill] sm:$0xff]  ;;  %v9179_v59 = vrot.slane %v786_v36, 7 }
 0x284   : > { %v4818_v44 = vor.u32 %v4816_v38, %v10121_v62  ;;  %v10122_v4 = vld [vmem:[#allocation81_spill] sm:$0xff]  ;;  %v3379_v38 = vsel %vm3318_vm0, 0, %v10118_v33 }
 0x285   : > { %v4950_v47 = vpop.f32.mrf.mxu0  ;;  %7139 = vmatmul.msk.bf16.gmra.mxu1 %vm3599_vm2, %v9103_v57  ;;  %v4793_v53 = vadd.f32 %v4697_v13, %v4549_v32  ;;  %v4088_v50 = vadd.f32 %v4087_v20, %v10122_v4  ;;  %10123 = vst [vmem:[#allocation33_spill] sm:$0xff] %v9179_v59  ;;  %v789_v57 = vshll.u32 %v7392_v40, 16  ;;  %v9193_v40 = vrot.slane %v3379_v38, 1  ;;  %v10127_v4 = vld [vmem:[#allocation21_spill] sm:$0xff]  ;;  %v10131_v38 = vld [vmem:[#allocation88_spill] sm:$0xff] }
 0x287   : > { %7172 = vmatmul.msk.bf16.gmra.mxu2 %vm3599_vm2, %v9164_v16  ;;  %v9175_v55 = vadd.f32 %v4950_v47, %v4793_v53  ;;  %v791_v20 = vor.u32 %v789_v57, %v9179_v59  ;;  %v10126_v53 = vld [vmem:[#allocation84_spill] sm:$0xff]  ;;  %v9205_v57 = vsel %vm4172_vm4, %v9154_v2, %v9193_v40 }
 0x288   : > { %7205 = vmatmul.msk.bf16.gmra.mxu3 %vm3599_vm2, %v9167_v31  ;;  %v10124_v31 = vld [vmem:[#allocation27_spill] sm:$0xff] }
 0x289   : > { %10120 = vst [vmem:[#allocation115_spill] sm:$0xff] %v9175_v55  ;;  %v9185_v10 = vsel %vm3387_vm3, %v4818_v44, %v10124_v31  ;;  %v10132_v55 = vld [vmem:[#allocation32_spill] sm:$0xff] }
 0x28a   : > { %v4089_v23 = vpop.f32.mrf.mxu1  ;;  %v4456_v32 = vpop.f32.mrf.mxu2 }
 0x28b   : > { %v4700_v13 = vpop.f32.mrf.mxu3  ;;  %v4550_v16 = vadd.f32 %v4456_v32, %v4088_v50  ;;  %v4090_v62 = vadd.f32 %v4089_v23, %v10126_v53  ;;  %v9198_v32 = vsel %vm633_vm1, %v10127_v4, %v791_v20 }
 0x28c   : > { %10128 = vst [vmem:[#allocation27_spill] sm:$0xff] %v9198_v32 }
 0x28d   : > { %v4953_v34 = vpop.f32.mrf.mxu0  ;;  %v4794_v47 = vadd.f32 %v4700_v13, %v4550_v16 }
 0x28f   : > { %v9191_v36 = vadd.f32 %v4953_v34, %v4794_v47  ;;  %v4821_v34 = vshll.u32 %v9198_v32, 16 }
 0x290   : > { %7238 = vmatmul.msk.bf16.gmra.mxu0 %vm3599_vm2, %v9185_v10 }
 0x291   : > { %10125 = vst [vmem:[#allocation81_spill] sm:$0xff] %v9191_v36  ;;  %v9214_v47 = vrot.slane %v4821_v34, 1  ;;  %v10135_v34 = vld [vmem:[#allocation90_spill] sm:$0xff] }
 0x292   : > { %v4092_v50 = vpop.f32.mrf.mxu1  ;;  %v4458_v31 = vpop.f32.mrf.mxu2 }
 0x293   : > { %v4702_v16 = vpop.f32.mrf.mxu3  ;;  %v4551_v44 = vadd.f32 %v4458_v31, %v4090_v62  ;;  %10130 = vst [vmem:[#allocation21_spill] sm:$0xff] %v9214_v47  ;;  %v4093_v20 = vadd.f32 %v4092_v50, %v10131_v38 }
 0x295   : > { %v4955_v33 = vpop.f32.mrf.mxu0  ;;  %7140 = vmatmul.msk.bf16.gmra.mxu1 %vm3599_vm2, %v9131_v46  ;;  %v4795_v23 = vadd.f32 %v4702_v16, %v4551_v44  ;;  %v9220_v16 = vsel %vm3387_vm3, %v10132_v55, %v9214_v47  ;;  %v10138_v55 = vld [vmem:[#allocation20_spill] sm:$0xff]  ;;  %v10141_v47 = vld [vmem:[#allocation63_spill] sm:$0xff] }
 0x296   : > { %10133 = vst [vmem:[#allocation88_spill] sm:$0xff] %v9220_v16 }
 0x297   : > { %7173 = vmatmul.msk.bf16.gmra.mxu2 %vm3599_vm2, %v9205_v57  ;;  %v9212_v13 = vadd.f32 %v4955_v33, %v4795_v23 }
 0x298   : > { %7206 = vmatmul.msk.bf16.gmra.mxu3 %vm3599_vm2, %v9131_v46 }
 0x299   : > { %10129 = vst [vmem:[#allocation84_spill] sm:$0xff] %v9212_v13 }
 0x29a   : > { %v4094_v53 = vpop.f32.mrf.mxu1  ;;  %v4461_v62 = vpop.f32.mrf.mxu2 }
 0x29b   : > { %v4705_v4 = vpop.f32.mrf.mxu3  ;;  %v4552_v31 = vadd.f32 %v4461_v62, %v4093_v20  ;;  %v4095_v23 = vadd.f32 %v4094_v53, %v10135_v34  ;;  %v10136_v20 = vld [vmem:[#allocation50_spill] sm:$0xff] }
 0x29d   : > { %v4958_v36 = vpop.f32.mrf.mxu0  ;;  %v4796_v44 = vadd.f32 %v4705_v4, %v4552_v31 }
 0x29f   : > { %v9224_v33 = vadd.f32 %v4958_v36, %v4796_v44  ;;  %v10140_v36 = vld [vmem:[#allocation42_spill] sm:$0xff] }
 0x2a0   : > { %7239 = vmatmul.msk.bf16.gmra.mxu0 %vm3599_vm2, %v9220_v16 }
 0x2a1   : > { %10134 = vst [vmem:[#allocation32_spill] sm:$0xff] %v9224_v33 }
 0x2a2   : > { %v4097_v13 = vpop.f32.mrf.mxu1  ;;  %v4463_v50 = vpop.f32.mrf.mxu2 }
 0x2a3   : > { %v4707_v38 = vpop.f32.mrf.mxu3  ;;  %v4553_v59 = vadd.f32 %v4463_v50, %v4095_v23  ;;  %v4098_v31 = vadd.f32 %v4097_v13, %v10140_v36  ;;  %v10145_v36 = vld [vmem:[#allocation45_spill] sm:$0xff] }
 0x2a5   : > { %v4960_v32 = vpop.f32.mrf.mxu0  ;;  %7241 = vmatmul.msk.bf16.vlgmr.msra.gmra.mxu1 %vm3599_vm2, %v10136_v20  ;;  %v4797_v62 = vadd.f32 %v4707_v38, %v4553_v59  ;;  %v10143_v38 = vld [vmem:[#allocation44_spill] sm:$0xff] }
 0x2a7   : > { %7274 = vmatmul.msk.bf16.vlgmr.msra.gmra.mxu2 %vm3599_vm2, %v10137_v7  ;;  %v9233_v4 = vadd.f32 %v4960_v32, %v4797_v62 }
 0x2a8   : > { %7307 = vmatmul.msk.bf16.vlgmr.msra.gmra.mxu3 %vm3599_vm2, %v10138_v55 }
 0x2a9   : > { %10139 = vst [vmem:[#allocation90_spill] sm:$0xff] %v9233_v4  ;;  %v10144_v4 = vld [vmem:[#allocation56_spill] sm:$0xff] }
 0x2aa   : > { %v4099_v53 = vpop.f32.mrf.mxu1  ;;  %v4466_v44 = vpop.f32.mrf.mxu2 }
 0x2ab   : > { %v4710_v34 = vpop.f32.mrf.mxu3  ;;  %v4554_v33 = vadd.f32 %v4466_v44, %v4098_v31  ;;  %v4100_v7 = vadd.f32 %v4099_v53, %v10143_v38  ;;  %v10148_v44 = vld [vmem:[#allocation47_spill] sm:$0xff] }
 0x2ad   : > { %v4963_v23 = vpop.f32.mrf.mxu0  ;;  %v4798_v50 = vadd.f32 %v4710_v34, %v4554_v33  ;;  %v10146_v33 = vld [vmem:[#allocation26_spill] sm:$0xff] }
 0x2af   : > { %v9238_v59 = vadd.f32 %v4963_v23, %v4798_v50 }
 0x2b0   : > { %7340 = vmatmul.msk.bf16.vlgmr.msra.gmra.mxu0 %vm3599_vm2, %v10141_v47 }
 0x2b1   : > { %10142 = vst [vmem:[#allocation50_spill] sm:$0xff] %v9238_v59  ;;  %v10149_v59 = vld [vmem:[#allocation71_spill] sm:$0xff] }
 0x2b2   : > { %v4102_v20 = vpop.f32.mrf.mxu1  ;;  %v4468_v16 = vpop.f32.mrf.mxu2 }
 0x2b3   : > { %v4712_v55 = vpop.f32.mrf.mxu3  ;;  %v4555_v32 = vadd.f32 %v4468_v16, %v4100_v7  ;;  %v4103_v34 = vadd.f32 %v4102_v20, %v10148_v44  ;;  %v10152_v44 = vld [vmem:[#allocation64_spill] sm:$0xff] }
 0x2b5   : > { %v4965_v62 = vpop.f32.mrf.mxu0  ;;  %7242 = vmatmul.msk.bf16.gmra.mxu1 %vm3599_vm2, %v10144_v4  ;;  %v4799_v13 = vadd.f32 %v4712_v55, %v4555_v32  ;;  %v10151_v55 = vld [vmem:[#allocation49_spill] sm:$0xff] }
 0x2b7   : > { %7275 = vmatmul.msk.bf16.gmra.mxu2 %vm3599_vm2, %v10145_v36  ;;  %v9247_v31 = vadd.f32 %v4965_v62, %v4799_v13 }
 0x2b8   : > { %7308 = vmatmul.msk.bf16.gmra.mxu3 %vm3599_vm2, %v10146_v33 }
 0x2b9   : > { %10147 = vst [vmem:[#allocation51_spill] sm:$0xff] %v9247_v31 }
 0x2ba   : > { %v4104_v53 = vpop.f32.mrf.mxu1  ;;  %v4471_v23 = vpop.f32.mrf.mxu2 }
 0x2bb   : > { %v4715_v50 = vpop.f32.mrf.mxu3  ;;  %v4556_v38 = vadd.f32 %v4471_v23, %v4103_v34  ;;  %v4105_v32 = vadd.f32 %v4104_v53, %v10151_v55  ;;  %v10153_v34 = vld [vmem:[#allocation31_spill] sm:$0xff] }
 0x2bd   : > { %v4968_v16 = vpop.f32.mrf.mxu0  ;;  %v4800_v7 = vadd.f32 %v4715_v50, %v4556_v38  ;;  %v10155_v50 = vld [vmem:[#allocation53_spill] sm:$0xff] }
 0x2bf   : > { %v9252_v4 = vadd.f32 %v4968_v16, %v4800_v7 }
 0x2c0   : > { %7341 = vmatmul.msk.bf16.gmra.mxu0 %vm3599_vm2, %v10149_v59 }
 0x2c1   : > { %10150 = vst [vmem:[#allocation20_spill] sm:$0xff] %v9252_v4  ;;  %v10156_v4 = vld [vmem:[#allocation78_spill] sm:$0xff] }
 0x2c2   : > { %v4107_v36 = vpop.f32.mrf.mxu1  ;;  %v4473_v58 = vpop.f32.mrf.mxu2 }
 0x2c3   : > { %v4717_v33 = vpop.f32.mrf.mxu3  ;;  %v4557_v62 = vadd.f32 %v4473_v58, %v4105_v32  ;;  %v4108_v38 = vadd.f32 %v4107_v36, %v10155_v50  ;;  %v10159_v50 = vld [vmem:[#allocation40_spill] sm:$0xff] }
 0x2c5   : > { %v4970_v13 = vpop.f32.mrf.mxu0  ;;  %7243 = vmatmul.msk.bf16.gmra.mxu1 %vm3599_vm2, %v10141_v47  ;;  %v4801_v20 = vadd.f32 %v4717_v33, %v4557_v62  ;;  %v10158_v33 = vld [vmem:[#allocation55_spill] sm:$0xff] }
 0x2c7   : > { %7276 = vmatmul.msk.bf16.gmra.mxu2 %vm3599_vm2, %v10152_v44  ;;  %v9261_v23 = vadd.f32 %v4970_v13, %v4801_v20 }
 0x2c8   : > { %7309 = vmatmul.msk.bf16.gmra.mxu3 %vm3599_vm2, %v10153_v34 }
 0x2c9   : > { %10154 = vst [vmem:[#allocation42_spill] sm:$0xff] %v9261_v23 }
 0x2ca   : > { %v4109_v53 = vpop.f32.mrf.mxu1  ;;  %v4476_v16 = vpop.f32.mrf.mxu2 }
 0x2cb   : > { %v4720_v7 = vpop.f32.mrf.mxu3  ;;  %v4558_v55 = vadd.f32 %v4476_v16, %v4108_v38  ;;  %v4110_v62 = vadd.f32 %v4109_v53, %v10158_v33  ;;  %v10161_v16 = vld [vmem:[#allocation59_spill] sm:$0xff] }
 0x2cd   : > { %v4973_v58 = vpop.f32.mrf.mxu0  ;;  %v4802_v32 = vadd.f32 %v4720_v7, %v4558_v55 }
 0x2cf   : > { %v9266_v47 = vadd.f32 %v4973_v58, %v4802_v32 }
 0x2d0   : > { %7342 = vmatmul.msk.bf16.gmra.mxu0 %vm3599_vm2, %v10156_v4 }
 0x2d1   : > { %10157 = vst [vmem:[#allocation63_spill] sm:$0xff] %v9266_v47 }
 0x2d2   : > { %v4112_v44 = vpop.f32.mrf.mxu1  ;;  %v4478_v31 = vpop.f32.mrf.mxu2 }
 0x2d3   : > { %v4722_v34 = vpop.f32.mrf.mxu3  ;;  %v4559_v13 = vadd.f32 %v4478_v31, %v4110_v62  ;;  %v4113_v7 = vadd.f32 %v4112_v44, %v10161_v16  ;;  %v10162_v62 = vld [vmem:[#allocation86_spill] sm:$0xff]  ;;  %v10165_v16 = vld [vmem:[#allocation79_spill] sm:$0xff] }
 0x2d5   : > { %v4975_v20 = vpop.f32.mrf.mxu0  ;;  %7244 = vmatmul.msk.bf16.gmra.mxu1 %vm3599_vm2, %v10149_v59  ;;  %v4803_v36 = vadd.f32 %v4722_v34, %v4559_v13  ;;  %v10164_v34 = vld [vmem:[#allocation62_spill] sm:$0xff] }
 0x2d7   : > { %7277 = vmatmul.msk.bf16.gmra.mxu2 %vm3599_vm2, %v8461_v24  ;;  %v9275_v38 = vadd.f32 %v4975_v20, %v4803_v36 }
 0x2d8   : > { %7310 = vmatmul.msk.bf16.gmra.mxu3 %vm3599_vm2, %v10159_v50 }
 0x2d9   : > { %10160 = vst [vmem:[#allocation44_spill] sm:$0xff] %v9275_v38 }
 0x2da   : > { %v4114_v53 = vpop.f32.mrf.mxu1  ;;  %v4481_v55 = vpop.f32.mrf.mxu2 }
 0x2db   : > { %v4725_v58 = vpop.f32.mrf.mxu3  ;;  %v4560_v32 = vadd.f32 %v4481_v55, %v4113_v7  ;;  %v4115_v13 = vadd.f32 %v4114_v53, %v10164_v34  ;;  %v10166_v7 = vld [vmem:[#allocation4_spill] sm:$0xff] }
 0x2dd   : > { %v4978_v31 = vpop.f32.mrf.mxu0  ;;  %v4804_v33 = vadd.f32 %v4725_v58, %v4560_v32  ;;  %v10167_v58 = vld [vmem:[#allocation67_spill] sm:$0xff] }
 0x2df   : > { %v9280_v59 = vadd.f32 %v4978_v31, %v4804_v33 }
 0x2e0   : > { %7343 = vmatmul.msk.bf16.gmra.mxu0 %vm3599_vm2, %v10162_v62 }
 0x2e1   : > { %10163 = vst [vmem:[#allocation56_spill] sm:$0xff] %v9280_v59  ;;  %v10168_v59 = vld [vmem:[#allocation92_spill] sm:$0xff] }
 0x2e2   : > { %v4117_v47 = vpop.f32.mrf.mxu1  ;;  %v4483_v23 = vpop.f32.mrf.mxu2 }
 0x2e3   : > { %v4727_v50 = vpop.f32.mrf.mxu3  ;;  %v4561_v20 = vadd.f32 %v4483_v23, %v4115_v13  ;;  %v4118_v32 = vadd.f32 %v4117_v47, %v10167_v58  ;;  %v10170_v58 = vld [vmem:[#allocation8_spill] sm:$0xff] }
 0x2e5   : > { %v4980_v36 = vpop.f32.mrf.mxu0  ;;  %7245 = vmatmul.msk.bf16.gmra.mxu1 %vm3599_vm2, %v10156_v4  ;;  %v4805_v44 = vadd.f32 %v4727_v50, %v4561_v20  ;;  %v10169_v50 = vld [vmem:[#allocation70_spill] sm:$0xff] }
 0x2e7   : > { %7278 = vmatmul.msk.bf16.gmra.mxu2 %vm3599_vm2, %v10165_v16  ;;  %v9289_v55 = vadd.f32 %v4980_v36, %v4805_v44 }
 0x2e8   : > { %7311 = vmatmul.msk.bf16.gmra.mxu3 %vm3599_vm2, %v10166_v7 }
 0x2ea   : > { %v4119_v53 = vpop.f32.mrf.mxu1  ;;  %v4486_v31 = vpop.f32.mrf.mxu2 }
 0x2eb   : > { %v4730_v33 = vpop.f32.mrf.mxu3  ;;  %v4562_v34 = vadd.f32 %v4486_v31, %v4118_v32  ;;  %v4120_v20 = vadd.f32 %v4119_v53, %v10169_v50  ;;  %v10171_v31 = vld [vmem:[#allocation74_spill] sm:$0xff] }
 0x2ed   : > { %v4983_v23 = vpop.f32.mrf.mxu0  ;;  %v4806_v13 = vadd.f32 %v4730_v33, %v4562_v34 }
 0x2ef   : > { %v9294_v4 = vadd.f32 %v4983_v23, %v4806_v13 }
 0x2f0   : > { %7344 = vmatmul.msk.bf16.gmra.mxu0 %vm3599_vm2, %v10168_v59 }
 0x2f2   : > { %v4122_v16 = vpop.f32.mrf.mxu1  ;;  %v4488_v38 = vpop.f32.mrf.mxu2 }
 0x2f3   : > { %v4732_v7 = vpop.f32.mrf.mxu3  ;;  %v4563_v36 = vadd.f32 %v4488_v38, %v4120_v20  ;;  %v4123_v33 = vadd.f32 %v4122_v16, %v10171_v31  ;;  %v10172_v20 = vld [vmem:[#allocation77_spill] sm:$0xff] }
 0x2f5   : > { %v4985_v44 = vpop.f32.mrf.mxu0  ;;  %7246 = vmatmul.msk.bf16.gmra.mxu1 %vm3599_vm2, %v10162_v62  ;;  %v4807_v47 = vadd.f32 %v4732_v7, %v4563_v36 }
 0x2f7   : > { %7279 = vmatmul.msk.bf16.gmra.mxu2 %vm3599_vm2, %v8461_v24  ;;  %v9303_v32 = vadd.f32 %v4985_v44, %v4807_v47 }
 0x2f8   : > { %7312 = vmatmul.msk.bf16.gmra.mxu3 %vm3599_vm2, %v10170_v58 }
 0x2fa   : > { %v4124_v53 = vpop.f32.mrf.mxu1  ;;  %v4491_v34 = vpop.f32.mrf.mxu2 }
 0x2fb   : > { %v4735_v23 = vpop.f32.mrf.mxu3  ;;  %v4564_v13 = vadd.f32 %v4491_v34, %v4123_v33  ;;  %v4125_v24 = vadd.f32 %v4124_v53, %v10172_v20  ;;  %v10173_v33 = vld [vmem:[#allocation82_spill] sm:$0xff] }
 0x2fd   : > { %v4988_v38 = vpop.f32.mrf.mxu0  ;;  %v4808_v50 = vadd.f32 %v4735_v23, %v4564_v13 }
 0x2ff   : > { %v9308_v62 = vadd.f32 %v4988_v38, %v4808_v50 }
 0x300   : > { %7345 = vmatmul.msk.bf16.gmra.mxu0 %vm3599_vm2, %v8601_v56 }
 0x302   : > { %v4127_v7 = vpop.f32.mrf.mxu1  ;;  %v4493_v36 = vpop.f32.mrf.mxu2 }
 0x303   : > { %v4737_v58 = vpop.f32.mrf.mxu3  ;;  %v4565_v44 = vadd.f32 %v4493_v36, %v4125_v24  ;;  %v4128_v34 = vadd.f32 %v4127_v7, %v10173_v33  ;;  %v10174_v24 = vld [vmem:[#allocation85_spill] sm:$0xff] }
 0x304   : > { %v10175_v33 = vld [vmem:[#allocation89_spill] sm:$0xff] }
 0x305   : > { %v4990_v47 = vpop.f32.mrf.mxu0  ;;  %7247 = vmatmul.msk.bf16.gmra.mxu1 %vm3599_vm2, %v10168_v59  ;;  %v4809_v16 = vadd.f32 %v4737_v58, %v4565_v44 }
 0x307   : > { %7280 = vmatmul.msk.bf16.gmra.mxu2 %vm3599_vm2, %v8575_v49  ;;  %v9317_v31 = vadd.f32 %v4990_v47, %v4809_v16 }
 0x308   : > { %7313 = vmatmul.msk.bf16.gmra.mxu3 %vm3599_vm2, %v8004_v29 }
 0x30a   : > { %v4129_v53 = vpop.f32.mrf.mxu1  ;;  %v4496_v23 = vpop.f32.mrf.mxu2 }
 0x30b   : > { %v4740_v13 = vpop.f32.mrf.mxu3  ;;  %v4566_v38 = vadd.f32 %v4496_v23, %v4128_v34  ;;  %v4130_v49 = vadd.f32 %v4129_v53, %v10174_v24  ;;  %v10176_v24 = vld [vmem:[#allocation91_spill] sm:$0xff] }
 0x30d   : > { %v4993_v50 = vpop.f32.mrf.mxu0  ;;  %v4810_v20 = vadd.f32 %v4740_v13, %v4566_v38 }
 0x30f   : > { %v9322_v59 = vadd.f32 %v4993_v50, %v4810_v20 }
 0x310   : > { %7346 = vmatmul.msk.bf16.gmra.mxu0 %vm3599_vm2, %v8627_v22 }
 0x312   : > { %v4132_v36 = vpop.f32.mrf.mxu1  ;;  %v4498_v58 = vpop.f32.mrf.mxu2 }
 0x313   : > { %v4742_v29 = vpop.f32.mrf.mxu3  ;;  %v4567_v44 = vadd.f32 %v4498_v58, %v4130_v49  ;;  %v4133_v34 = vadd.f32 %v4132_v36, %v10175_v33 }
 0x315   : > { %v4995_v47 = vpop.f32.mrf.mxu0  ;;  %7248 = vmatmul.msk.bf16.gmra.mxu1 %vm3599_vm2, %v8601_v56  ;;  %v4811_v7 = vadd.f32 %v4742_v29, %v4567_v44 }
 0x317   : > { %7281 = vmatmul.msk.bf16.gmra.mxu2 %vm3599_vm2, %v8595_v28  ;;  %v9331_v16 = vadd.f32 %v4995_v47, %v4811_v7 }
 0x318   : > { %7314 = vmatmul.msk.bf16.gmra.mxu3 %vm3599_vm2, %v8050_v12 }
 0x31a   : > { %v4134_v53 = vpop.f32.mrf.mxu1  ;;  %v4501_v23 = vpop.f32.mrf.mxu2 }
 0x31b   : > { %v4745_v13 = vpop.f32.mrf.mxu3  ;;  %v4568_v38 = vadd.f32 %v4501_v23, %v4133_v34  ;;  %v4135_v49 = vadd.f32 %v4134_v53, %v10176_v24 }
 0x31d   : > { %v4998_v50 = vpop.f32.mrf.mxu0  ;;  %v4812_v20 = vadd.f32 %v4745_v13, %v4568_v38 }
 0x31f   : > { %v9336_v56 = vadd.f32 %v4998_v50, %v4812_v20 }
 0x320   : > { %7347 = vmatmul.msk.bf16.gmra.mxu0 %vm3599_vm2, %v8653_v9 }
 0x322   : > { %v5093_v58 = vpop.f32.mrf.mxu1  ;;  %v4503_v12 = vpop.f32.mrf.mxu2 }
 0x323   : > { %v4747_v29 = vpop.f32.mrf.mxu3  ;;  %v4569_v44 = vadd.f32 %v4503_v12, %v4135_v49  ;;  %v5253_v33 = vadd.f32 %v5093_v58, %v8588_v63  ;;  %v9356_v63 = vld [vmem:[%s9803_s4] ss:$0 sm:$0xff] }
 0x325   : > { %v5000_v47 = vpop.f32.mrf.mxu0  ;;  %7249 = vmatmul.msk.bf16.gmra.mxu1 %vm3599_vm2, %v8627_v22  ;;  %v4813_v36 = vadd.f32 %v4747_v29, %v4569_v44 }
 0x327   : > { %7282 = vmatmul.msk.bf16.gmra.mxu2 %vm3599_vm2, %v8630_v52  ;;  %v9346_v7 = vadd.f32 %v5000_v47, %v4813_v36  ;;  %v10177_v47 = vld [vmem:[#allocation93_spill] sm:$0xff] }
 0x328   : > { %7315 = vmatmul.msk.bf16.gmra.mxu3 %vm3599_vm2, %v8081_v37 }
 0x32a   : > { %v5095_v34 = vpop.f32.mrf.mxu1  ;;  %v5337_v53 = vpop.f32.mrf.mxu2 }
 0x32b   : > { %v5597_v23 = vpop.f32.mrf.mxu3  ;;  %v5497_v13 = vadd.f32 %v5337_v53, %v5253_v33  ;;  %v5254_v52 = vadd.f32 %v5095_v34, %v8607_v3 }
 0x32d   : > { %v5847_v38 = vpop.f32.mrf.mxu0  ;;  %v5757_v22 = vadd.f32 %v5597_v23, %v5497_v13 }
 0x32f   : > { %v6007_v50 = vadd.f32 %v5847_v38, %v5757_v22 }
 0x330   : > { %7348 = vmatmul.msk.bf16.gmra.mxu0 %vm3599_vm2, %v8676_v41 }
 0x331   : > { %v6075_v3 = vadd.f32 %v9356_v63, %v6007_v50 }
 0x332   : > { %v5098_v37 = vpop.f32.mrf.mxu1  ;;  %v5339_v20 = vpop.f32.mrf.mxu2 }
 0x333   : > { %v5599_v24 = vpop.f32.mrf.mxu3  ;;  %v5498_v49 = vadd.f32 %v5339_v20, %v5254_v52  ;;  %v5255_v36 = vadd.f32 %v5098_v37, %v10177_v47  ;;  %v6337_v34 = vmul.f32 %v6075_v3, %v6075_v3  ;;  %v10178_v20 = vld [vmem:[#allocation94_spill] sm:$0xff] }
 0x335   : > { %v5849_v58 = vpop.f32.mrf.mxu0  ;;  %7250 = vmatmul.msk.bf16.gmra.mxu1 %vm3599_vm2, %v8653_v9  ;;  %v5758_v12 = vadd.f32 %v5599_v24, %v5498_v49 }
 0x337   : > { %v6008_v29 = vadd.f32 %v5849_v58, %v5758_v12  ;;  %7283 = vmatmul.msk.bf16.gmra.mxu2 %vm3599_vm2, %v8595_v28 }
 0x338   : > { %7316 = vmatmul.msk.bf16.gmra.mxu3 %vm3599_vm2, %v8128_v26 }
 0x339   : > { %v6076_v44 = vadd.f32 %v9356_v63, %v6008_v29 }
 0x33a   : > { %v5100_v33 = vpop.f32.mrf.mxu1  ;;  %v5342_v9 = vpop.f32.mrf.mxu2 }
 0x33b   : > { %v5602_v53 = vpop.f32.mrf.mxu3  ;;  %v7397_v23 = vpack.c.bf16 %v6076_v44, %v6075_v3  ;;  %v6267_v13 = vadd.f32 %v6076_v44, %v6075_v3  ;;  %v6338_v28 = vmul.f32 %v6076_v44, %v6076_v44  ;;  %v5499_v38 = vadd.f32 %v5342_v9, %v5255_v36 }
 0x33c   : > { %v5256_v24 = vadd.f32 %v5100_v33, %v10178_v20 }
 0x33d   : > { %v5852_v22 = vpop.f32.mrf.mxu0  ;;  %7398 = vst [vmem:[%s9370_s22] sm:$0xff] %v7397_v23   ;;  %v6401_v26 = vadd.f32 %v6338_v28, %v6337_v34  ;;  %v5759_v52 = vadd.f32 %v5602_v53, %v5499_v38  ;;  %v10179_v53 = vld [vmem:[#allocation95_spill] sm:$0xff] }
 0x33f   : > { %v6009_v37 = vadd.f32 %v5852_v22, %v5759_v52 }
 0x340   : > { %7349 = vmatmul.msk.bf16.gmra.mxu0 %vm3599_vm2, %v8707_v14 }
 0x341   : > { %v6077_v50 = vadd.f32 %v9356_v63, %v6009_v37 }
 0x342   : > { %v5103_v49 = vpop.f32.mrf.mxu1  ;;  %v5344_v58 = vpop.f32.mrf.mxu2 }
 0x343   : > { %v5604_v12 = vpop.f32.mrf.mxu3  ;;  %v6268_v29 = vadd.f32 %v6267_v13, %v6077_v50  ;;  %v6339_v47 = vmul.f32 %v6077_v50, %v6077_v50  ;;  %v5500_v3 = vadd.f32 %v5344_v58, %v5256_v24  ;;  %v5257_v23 = vadd.f32 %v5103_v49, %v10179_v53 }
 0x345   : > { %v5854_v44 = vpop.f32.mrf.mxu0  ;;  %7251 = vmatmul.msk.bf16.gmra.mxu1 %vm3599_vm2, %v8676_v41  ;;  %v6402_v36 = vadd.f32 %v6401_v26, %v6339_v47  ;;  %v5760_v34 = vadd.f32 %v5604_v12, %v5500_v3 }
 0x347   : > { %v6010_v9 = vadd.f32 %v5854_v44, %v5760_v34  ;;  %7284 = vmatmul.msk.bf16.gmra.mxu2 %vm3599_vm2, %v8679_v51 }
 0x348   : > { %7317 = vmatmul.msk.bf16.gmra.mxu3 %vm3599_vm2, %v8165_v17 }
 0x349   : > { %v6078_v33 = vadd.f32 %v9356_v63, %v6010_v9 }
 0x34a   : > { %v5105_v13 = vpop.f32.mrf.mxu1  ;;  %v5347_v28 = vpop.f32.mrf.mxu2 }
 0x34b   : > { %v5607_v38 = vpop.f32.mrf.mxu3  ;;  %v7402_v22 = vpack.c.bf16 %v6078_v33, %v6077_v50  ;;  %v6269_v52 = vadd.f32 %v6268_v29, %v6078_v33  ;;  %v6340_v41 = vmul.f32 %v6078_v33, %v6078_v33  ;;  %v5501_v37 = vadd.f32 %v5347_v28, %v5257_v23 }
 0x34c   : > { %v5258_v58 = vadd.f32 %v5105_v13, %v8659_v43 }
 0x34d   : > { %v5857_v26 = vpop.f32.mrf.mxu0  ;;  %7554 = vst [vmem:[%s9370_s22 + $0x8] sm:$0xff] %v7402_v22   ;;  %v6403_v20 = vadd.f32 %v6402_v36, %v6340_v41  ;;  %v5761_v24 = vadd.f32 %v5607_v38, %v5501_v37 }
 0x34f   : > { %v6011_v51 = vadd.f32 %v5857_v26, %v5761_v24 }
 0x350   : > { %7350 = vmatmul.msk.bf16.gmra.mxu0 %vm3599_vm2, %v8733_v30 }
 0x351   : > { %v6079_v17 = vadd.f32 %v9356_v63, %v6011_v51 }
 0x352   : > { %v5108_v49 = vpop.f32.mrf.mxu1  ;;  %v5349_v12 = vpop.f32.mrf.mxu2 }
 0x353   : > { %v5609_v47 = vpop.f32.mrf.mxu3  ;;  %v6270_v3 = vadd.f32 %v6269_v52, %v6079_v17  ;;  %v6341_v50 = vmul.f32 %v6079_v17, %v6079_v17  ;;  %v5502_v29 = vadd.f32 %v5349_v12, %v5258_v58  ;;  %v5259_v33 = vadd.f32 %v5108_v49, %v8666_v61 }
 0x355   : > { %v5859_v44 = vpop.f32.mrf.mxu0  ;;  %7252 = vmatmul.msk.bf16.gmra.mxu1 %vm3599_vm2, %v8707_v14  ;;  %v6404_v36 = vadd.f32 %v6403_v20, %v6341_v50  ;;  %v5762_v34 = vadd.f32 %v5609_v47, %v5502_v29  ;;  %v10180_v20 = vld [vmem:[#allocation96_spill] sm:$0xff] }
 0x357   : > { %v6012_v9 = vadd.f32 %v5859_v44, %v5762_v34  ;;  %7285 = vmatmul.msk.bf16.gmra.mxu2 %vm3599_vm2, %v8701_v19 }
 0x358   : > { %7318 = vmatmul.msk.bf16.gmra.mxu3 %vm3599_vm2, %v8232_v42 }
 0x359   : > { %v6080_v43 = vadd.f32 %v9356_v63, %v6012_v9 }
 0x35a   : > { %v5110_v53 = vpop.f32.mrf.mxu1  ;;  %v5352_v23 = vpop.f32.mrf.mxu2 }
 0x35b   : > { %v5612_v13 = vpop.f32.mrf.mxu3  ;;  %v7407_v28 = vpack.c.bf16 %v6080_v43, %v6079_v17  ;;  %v6271_v38 = vadd.f32 %v6270_v3, %v6080_v43  ;;  %v6342_v14 = vmul.f32 %v6080_v43, %v6080_v43  ;;  %v5503_v22 = vadd.f32 %v5352_v23, %v5259_v33 }
 0x35c   : > { %v5260_v24 = vadd.f32 %v5110_v53, %v10180_v20 }
 0x35d   : > { %v5862_v52 = vpop.f32.mrf.mxu0  ;;  %7555 = vst [vmem:[%s9370_s22 + $0x10] sm:$0xff] %v7407_v28   ;;  %v6405_v41 = vadd.f32 %v6404_v36, %v6342_v14  ;;  %v5763_v37 = vadd.f32 %v5612_v13, %v5503_v22 }
 0x35f   : > { %v6013_v26 = vadd.f32 %v5862_v52, %v5763_v37 }
 0x360   : > { %7351 = vmatmul.msk.bf16.gmra.mxu0 %vm3599_vm2, %v8759_v48 }
 0x361   : > { %v6081_v42 = vadd.f32 %v9356_v63, %v6013_v26 }
 0x362   : > { %v5113_v61 = vpop.f32.mrf.mxu1  ;;  %v5354_v51 = vpop.f32.mrf.mxu2 }
 0x363   : > { %v5614_v58 = vpop.f32.mrf.mxu3  ;;  %v6272_v49 = vadd.f32 %v6271_v38, %v6081_v42  ;;  %v6343_v17 = vmul.f32 %v6081_v42, %v6081_v42  ;;  %v5504_v12 = vadd.f32 %v5354_v51, %v5260_v24  ;;  %v5261_v36 = vadd.f32 %v5113_v61, %v8694_v54  ;;  %v10181_v51 = vld [vmem:[#allocation97_spill] sm:$0xff] }
 0x365   : > { %v5864_v47 = vpop.f32.mrf.mxu0  ;;  %7253 = vmatmul.msk.bf16.gmra.mxu1 %vm3599_vm2, %v8733_v30  ;;  %v6406_v3 = vadd.f32 %v6405_v41, %v6343_v17  ;;  %v5764_v50 = vadd.f32 %v5614_v58, %v5504_v12 }
 0x367   : > { %v6014_v29 = vadd.f32 %v5864_v47, %v5764_v50  ;;  %7286 = vmatmul.msk.bf16.gmra.mxu2 %vm3599_vm2, %v8736_v39 }
 0x368   : > { %7319 = vmatmul.msk.bf16.gmra.mxu3 %vm3599_vm2, %v7879_v18 }
 0x369   : > { %v6082_v44 = vadd.f32 %v9356_v63, %v6014_v29 }
 0x36a   : > { %v5115_v34 = vpop.f32.mrf.mxu1  ;;  %v5357_v9 = vpop.f32.mrf.mxu2 }
 0x36b   : > { %v5617_v43 = vpop.f32.mrf.mxu3  ;;  %v7412_v33 = vpack.c.bf16 %v6082_v44, %v6081_v42  ;;  %v6273_v53 = vadd.f32 %v6272_v49, %v6082_v44  ;;  %v6344_v30 = vmul.f32 %v6082_v44, %v6082_v44  ;;  %v5505_v23 = vadd.f32 %v5357_v9, %v5261_v36 }
 0x36c   : > { %v5262_v14 = vadd.f32 %v5115_v34, %v8713_v0  ;;  %v10182_v34 = vld [vmem:[#allocation98_spill] sm:$0xff] }
 0x36d   : > { %v5867_v13 = vpop.f32.mrf.mxu0  ;;  %7556 = vst [vmem:[%s9370_s22 + $0x18] sm:$0xff] %v7412_v33   ;;  %v6407_v28 = vadd.f32 %v6406_v3, %v6344_v30  ;;  %v5765_v38 = vadd.f32 %v5617_v43, %v5505_v23 }
 0x36f   : > { %v6015_v39 = vadd.f32 %v5867_v13, %v5765_v38 }
 0x370   : > { %7352 = vmatmul.msk.bf16.gmra.mxu0 %vm3599_vm2, %v8782_v6 }
 0x371   : > { %v6083_v18 = vadd.f32 %v9356_v63, %v6015_v39 }
 0x372   : > { %v5118_v54 = vpop.f32.mrf.mxu1  ;;  %v5359_v22 = vpop.f32.mrf.mxu2 }
 0x373   : > { %v5619_v52 = vpop.f32.mrf.mxu3  ;;  %v6274_v41 = vadd.f32 %v6273_v53, %v6083_v18  ;;  %v6345_v37 = vmul.f32 %v6083_v18, %v6083_v18  ;;  %v5506_v26 = vadd.f32 %v5359_v22, %v5262_v14  ;;  %v5263_v58 = vadd.f32 %v5118_v54, %v10181_v51  ;;  %v10183_v54 = vld [vmem:[#allocation99_spill] sm:$0xff] }
 0x375   : > { %v5869_v42 = vpop.f32.mrf.mxu0  ;;  %7254 = vmatmul.msk.bf16.gmra.mxu1 %vm3599_vm2, %v8759_v48  ;;  %v6408_v20 = vadd.f32 %v6407_v28, %v6345_v37  ;;  %v5766_v24 = vadd.f32 %v5619_v52, %v5506_v26 }
 0x377   : > { %v6016_v61 = vadd.f32 %v5869_v42, %v5766_v24  ;;  %7287 = vmatmul.msk.bf16.gmra.mxu2 %vm3599_vm2, %v8701_v19 }
 0x378   : > { %7320 = vmatmul.msk.bf16.gmra.mxu3 %vm3599_vm2, %v7966_v45 }
 0x379   : > { %v6084_v0 = vadd.f32 %v9356_v63, %v6016_v61 }
 0x37a   : > { %v5120_v49 = vpop.f32.mrf.mxu1  ;;  %v5362_v17 = vpop.f32.mrf.mxu2 }
 0x37b   : > { %v5622_v12 = vpop.f32.mrf.mxu3  ;;  %v7417_v47 = vpack.c.bf16 %v6084_v0, %v6083_v18  ;;  %v6275_v3 = vadd.f32 %v6274_v41, %v6084_v0  ;;  %v6346_v48 = vmul.f32 %v6084_v0, %v6084_v0  ;;  %v5507_v50 = vadd.f32 %v5362_v17, %v5263_v58 }
 0x37c   : > { %v5264_v9 = vadd.f32 %v5120_v49, %v10182_v34 }
 0x37d   : > { %v5872_v29 = vpop.f32.mrf.mxu0  ;;  %7557 = vst [vmem:[%s9370_s22 + $0x20] sm:$0xff] %v7417_v47   ;;  %v6409_v44 = vadd.f32 %v6408_v20, %v6346_v48  ;;  %v5767_v36 = vadd.f32 %v5622_v12, %v5507_v50 }
 0x37f   : > { %v6017_v19 = vadd.f32 %v5872_v29, %v5767_v36 }
 0x380   : > { %7353 = vmatmul.msk.bf16.gmra.mxu0 %vm3599_vm2, %v8813_v27 }
 0x381   : > { %v6085_v45 = vadd.f32 %v9356_v63, %v6017_v19 }
 0x382   : > { %v5123_v43 = vpop.f32.mrf.mxu1  ;;  %v5364_v33 = vpop.f32.mrf.mxu2 }
 0x383   : > { %v5624_v53 = vpop.f32.mrf.mxu3  ;;  %v6276_v30 = vadd.f32 %v6275_v3, %v6085_v45  ;;  %v6347_v23 = vmul.f32 %v6085_v45, %v6085_v45  ;;  %v5508_v13 = vadd.f32 %v5364_v33, %v5264_v9  ;;  %v5265_v22 = vadd.f32 %v5123_v43, %v10183_v54 }
 0x385   : > { %v5874_v28 = vpop.f32.mrf.mxu0  ;;  %7255 = vmatmul.msk.bf16.gmra.mxu1 %vm3599_vm2, %v8782_v6  ;;  %v6410_v38 = vadd.f32 %v6409_v44, %v6347_v23  ;;  %v5768_v39 = vadd.f32 %v5624_v53, %v5508_v13  ;;  %v10184_v13 = vld [vmem:[#allocation105_spill] sm:$0xff] }
 0x387   : > { %v6018_v18 = vadd.f32 %v5874_v28, %v5768_v39  ;;  %7288 = vmatmul.msk.bf16.gmra.mxu2 %vm3599_vm2, %v8785_v11 }
 0x388   : > { %7321 = vmatmul.msk.bf16.gmra.mxu3 %vm3599_vm2, %v8012_v60 }
 0x389   : > { %v6086_v14 = vadd.f32 %v9356_v63, %v6018_v18 }
 0x38a   : > { %v5125_v52 = vpop.f32.mrf.mxu1  ;;  %v5367_v41 = vpop.f32.mrf.mxu2 }
 0x38b   : > { %v5627_v37 = vpop.f32.mrf.mxu3  ;;  %v7422_v26 = vpack.c.bf16 %v6086_v14, %v6085_v45  ;;  %v6277_v42 = vadd.f32 %v6276_v30, %v6086_v14  ;;  %v6348_v6 = vmul.f32 %v6086_v14, %v6086_v14  ;;  %v5509_v20 = vadd.f32 %v5367_v41, %v5265_v22 }
 0x38c   : > { %v5266_v51 = vadd.f32 %v5125_v52, %v8765_v35 }
 0x38d   : > { %v5877_v24 = vpop.f32.mrf.mxu0  ;;  %7558 = vst [vmem:[%s9370_s22 + $0x28] sm:$0xff] %v7422_v26   ;;  %v6411_v61 = vadd.f32 %v6410_v38, %v6348_v6  ;;  %v5769_v0 = vadd.f32 %v5627_v37, %v5509_v20  ;;  %v10185_v38 = vld [vmem:[#allocation100_spill] sm:$0xff] }
 0x38e   : > { %v10186_v6 = vld [vmem:[#allocation12_spill] sm:$0xff] }
 0x38f   : > { %v6019_v11 = vadd.f32 %v5877_v24, %v5769_v0  ;;  %v10187_v20 = vld [vmem:[#allocation16_spill] sm:$0xff] }
 0x390   : > { %7354 = vmatmul.msk.bf16.gmra.mxu0 %vm3599_vm2, %v8839_v1 }
 0x391   : > { %v6087_v60 = vadd.f32 %v9356_v63, %v6019_v11 }
 0x392   : > { %v5128_v58 = vpop.f32.mrf.mxu1  ;;  %v5369_v49 = vpop.f32.mrf.mxu2 }
 0x393   : > { %v5629_v17 = vpop.f32.mrf.mxu3  ;;  %v6278_v12 = vadd.f32 %v6277_v42, %v6087_v60  ;;  %v6349_v47 = vmul.f32 %v6087_v60, %v6087_v60  ;;  %v5510_v3 = vadd.f32 %v5369_v49, %v5266_v51  ;;  %v5267_v36 = vadd.f32 %v5128_v58, %v8772_v21 }
 0x395   : > { %v5879_v48 = vpop.f32.mrf.mxu0  ;;  %7256 = vmatmul.msk.bf16.gmra.mxu1 %vm3599_vm2, %v8813_v27  ;;  %v6412_v50 = vadd.f32 %v6411_v61, %v6349_v47  ;;  %v5770_v29 = vadd.f32 %v5629_v17, %v5510_v3  ;;  %v10188_v61 = vld [vmem:[#allocation101_spill] sm:$0xff] }
 0x397   : > { %v6020_v44 = vadd.f32 %v5879_v48, %v5770_v29  ;;  %7289 = vmatmul.msk.bf16.gmra.mxu2 %vm3599_vm2, %v8807_v25  ;;  %v10189_v48 = vld [vmem:[#allocation57_spill] sm:$0xff] }
 0x398   : > { %7322 = vmatmul.msk.bf16.gmra.mxu3 %vm3599_vm2, %v10033_v15 }
 0x399   : > { %v6088_v35 = vadd.f32 %v9356_v63, %v6020_v44  ;;  %v10190_v44 = vld [vmem:[#allocation102_spill] sm:$0xff] }
 0x39a   : > { %v5130_v19 = vpop.f32.mrf.mxu1  ;;  %v5372_v45 = vpop.f32.mrf.mxu2 }
 0x39b   : > { %v5632_v34 = vpop.f32.mrf.mxu3  ;;  %v7427_v9 = vpack.c.bf16 %v6088_v35, %v6087_v60  ;;  %v6279_v43 = vadd.f32 %v6278_v12, %v6088_v35  ;;  %v6350_v27 = vmul.f32 %v6088_v35, %v6088_v35  ;;  %v5511_v33 = vadd.f32 %v5372_v45, %v5267_v36 }
 0x39c   : > { %v5268_v39 = vadd.f32 %v5130_v19, %v10185_v38 }
 0x39d   : > { %v5882_v53 = vpop.f32.mrf.mxu0  ;;  %7559 = vst [vmem:[%s9370_s22 + $0x30] sm:$0xff] %v7427_v9   ;;  %v6413_v30 = vadd.f32 %v6412_v50, %v6350_v27  ;;  %v5771_v23 = vadd.f32 %v5632_v34, %v5511_v33 }
 0x39f   : > { %v6021_v28 = vadd.f32 %v5882_v53, %v5771_v23  ;;  %v10191_v23 = vld [vmem:[#allocation23_spill] sm:$0xff] }
 0x3a0   : > { %7355 = vmatmul.msk.bf16.gmra.mxu0 %vm3599_vm2, %v10184_v13 }
 0x3a1   : > { %v6089_v15 = vadd.f32 %v9356_v63, %v6021_v28 }
 0x3a2   : > { %v5133_v21 = vpop.f32.mrf.mxu1  ;;  %v5374_v18 = vpop.f32.mrf.mxu2 }
 0x3a3   : > { %v5634_v14 = vpop.f32.mrf.mxu3  ;;  %v6280_v54 = vadd.f32 %v6279_v43, %v6089_v15  ;;  %v6351_v22 = vmul.f32 %v6089_v15, %v6089_v15  ;;  %v5512_v52 = vadd.f32 %v5374_v18, %v5268_v39  ;;  %v5269_v0 = vadd.f32 %v5133_v21, %v10188_v61 }
 0x3a5   : > { %v5884_v41 = vpop.f32.mrf.mxu0  ;;  %7257 = vmatmul.msk.bf16.gmra.mxu1 %vm3599_vm2, %v8839_v1  ;;  %v6414_v37 = vadd.f32 %v6413_v30, %v6351_v22  ;;  %v5772_v26 = vadd.f32 %v5634_v14, %v5512_v52 }
 0x3a7   : > { %v6022_v42 = vadd.f32 %v5884_v41, %v5772_v26  ;;  %7290 = vmatmul.msk.bf16.gmra.mxu2 %vm3599_vm2, %v10186_v6  ;;  %v10193_v26 = vld [vmem:[#allocation3_spill] sm:$0xff] }
 0x3a8   : > { %7323 = vmatmul.msk.bf16.gmra.mxu3 %vm3599_vm2, %v10187_v20  ;;  %v10194_v6 = vld [vmem:[#allocation103_spill] sm:$0xff] }
 0x3a9   : > { %v6090_v24 = vadd.f32 %v9356_v63, %v6022_v42 }
 0x3aa   : > { %v5135_v11 = vpop.f32.mrf.mxu1  ;;  %v5377_v60 = vpop.f32.mrf.mxu2 }
 0x3ab   : > { %v5637_v51 = vpop.f32.mrf.mxu3  ;;  %v7432_v58 = vpack.c.bf16 %v6090_v24, %v6089_v15  ;;  %v6281_v49 = vadd.f32 %v6280_v54, %v6090_v24  ;;  %v6352_v1 = vmul.f32 %v6090_v24, %v6090_v24  ;;  %v5513_v17 = vadd.f32 %v5377_v60, %v5269_v0  ;;  %v10192_v15 = vld [vmem:[#allocation14_spill] sm:$0xff] }
 0x3ac   : > { %v5270_v35 = vadd.f32 %v5135_v11, %v10190_v44 }
 0x3ad   : > { %v5887_v12 = vpop.f32.mrf.mxu0  ;;  %7560 = vst [vmem:[%s9370_s22 + $0x38] sm:$0xff] %v7432_v58   ;;  %v6415_v47 = vadd.f32 %v6414_v37, %v6352_v1  ;;  %v5773_v3 = vadd.f32 %v5637_v51, %v5513_v17 }
 0x3af   : > { %v6023_v50 = vadd.f32 %v5887_v12, %v5773_v3  ;;  %v10195_v12 = vld [vmem:[#allocation18_spill] sm:$0xff] }
 0x3b0   : > { %7356 = vmatmul.msk.bf16.gmra.mxu0 %vm3599_vm2, %v10189_v48 }
 0x3b1   : > { %v6091_v29 = vadd.f32 %v9356_v63, %v6023_v50  ;;  %v10197_v50 = vld [vmem:[#allocation104_spill] sm:$0xff] }
 0x3b2   : > { %v5138_v36 = vpop.f32.mrf.mxu1  ;;  %v5379_v19 = vpop.f32.mrf.mxu2 }
 0x3b3   : > { %v5639_v45 = vpop.f32.mrf.mxu3  ;;  %v6282_v34 = vadd.f32 %v6281_v49, %v6091_v29  ;;  %v6353_v9 = vmul.f32 %v6091_v29, %v6091_v29  ;;  %v5514_v43 = vadd.f32 %v5379_v19, %v5270_v35  ;;  %v5271_v38 = vadd.f32 %v5138_v36, %v10192_v15 }
 0x3b5   : > { %v5889_v27 = vpop.f32.mrf.mxu0  ;;  %7258 = vmatmul.msk.bf16.gmra.mxu1 %vm3599_vm2, %v10184_v13  ;;  %v6416_v33 = vadd.f32 %v6415_v47, %v6353_v9  ;;  %v5774_v53 = vadd.f32 %v5639_v45, %v5514_v43  ;;  %v10196_v47 = vld [vmem:[#allocation28_spill] sm:$0xff] }
 0x3b7   : > { %v6024_v30 = vadd.f32 %v5889_v27, %v5774_v53  ;;  %7291 = vmatmul.msk.bf16.gmra.mxu2 %vm3599_vm2, %v8807_v25 }
 0x3b8   : > { %7324 = vmatmul.msk.bf16.gmra.mxu3 %vm3599_vm2, %v10191_v23  ;;  %v10199_v23 = vld [vmem:[#allocation106_spill] sm:$0xff] }
 0x3b9   : > { %v6092_v28 = vadd.f32 %v9356_v63, %v6024_v30 }
 0x3ba   : > { %v5140_v39 = vpop.f32.mrf.mxu1  ;;  %v5382_v21 = vpop.f32.mrf.mxu2 }
 0x3bb   : > { %v5642_v18 = vpop.f32.mrf.mxu3  ;;  %v7437_v14 = vpack.c.bf16 %v6092_v28, %v6091_v29  ;;  %v6283_v54 = vadd.f32 %v6282_v34, %v6092_v28  ;;  %v6354_v13 = vmul.f32 %v6092_v28, %v6092_v28  ;;  %v5515_v22 = vadd.f32 %v5382_v21, %v5271_v38 }
 0x3bc   : > { %v5272_v20 = vadd.f32 %v5140_v39, %v10194_v6 }
 0x3bd   : > { %v5892_v52 = vpop.f32.mrf.mxu0  ;;  %7561 = vst [vmem:[%s9370_s22 + $0x40] sm:$0xff] %v7437_v14   ;;  %v6417_v41 = vadd.f32 %v6416_v33, %v6354_v13  ;;  %v5775_v37 = vadd.f32 %v5642_v18, %v5515_v22  ;;  %v10198_v33 = vld [vmem:[#allocation72_spill] sm:$0xff] }
 0x3bf   : > { %v6025_v25 = vadd.f32 %v5892_v52, %v5775_v37  ;;  %v10201_v37 = vld [vmem:[#allocation36_spill] sm:$0xff] }
 0x3c0   : > { %7357 = vmatmul.msk.bf16.gmra.mxu0 %vm3599_vm2, %v10193_v26 }
 0x3c1   : > { %v6093_v42 = vadd.f32 %v9356_v63, %v6025_v25 }
 0x3c2   : > { %v5143_v24 = vpop.f32.mrf.mxu1  ;;  %v5384_v61 = vpop.f32.mrf.mxu2 }
 0x3c3   : > { %v5644_v0 = vpop.f32.mrf.mxu3  ;;  %v6284_v11 = vadd.f32 %v6283_v54, %v6093_v42  ;;  %v6355_v60 = vmul.f32 %v6093_v42, %v6093_v42  ;;  %v5516_v51 = vadd.f32 %v5384_v61, %v5272_v20  ;;  %v5273_v29 = vadd.f32 %v5143_v24, %v10197_v50 }
 0x3c5   : > { %v5894_v58 = vpop.f32.mrf.mxu0  ;;  %7259 = vmatmul.msk.bf16.gmra.mxu1 %vm3599_vm2, %v10189_v48  ;;  %v6418_v49 = vadd.f32 %v6417_v41, %v6355_v60  ;;  %v5776_v1 = vadd.f32 %v5644_v0, %v5516_v51  ;;  %v10200_v41 = vld [vmem:[#allocation65_spill] sm:$0xff] }
 0x3c7   : > { %v6026_v17 = vadd.f32 %v5894_v58, %v5776_v1  ;;  %7292 = vmatmul.msk.bf16.gmra.mxu2 %vm3599_vm2, %v10195_v12  ;;  %v10203_v1 = vld [vmem:[#allocation80_spill] sm:$0xff] }
 0x3c8   : > { %7325 = vmatmul.msk.bf16.gmra.mxu3 %vm3599_vm2, %v10196_v47  ;;  %v10204_v47 = vld [vmem:[#allocation108_spill] sm:$0xff] }
 0x3c9   : > { %v6094_v3 = vadd.f32 %v9356_v63, %v6026_v17 }
 0x3ca   : > { %v5145_v44 = vpop.f32.mrf.mxu1  ;;  %v5387_v35 = vpop.f32.mrf.mxu2 }
 0x3cb   : > { %v5647_v36 = vpop.f32.mrf.mxu3  ;;  %v7442_v19 = vpack.c.bf16 %v6094_v3, %v6093_v42  ;;  %v6285_v45 = vadd.f32 %v6284_v11, %v6094_v3  ;;  %v6356_v48 = vmul.f32 %v6094_v3, %v6094_v3  ;;  %v5517_v34 = vadd.f32 %v5387_v35, %v5273_v29  ;;  %v10202_v42 = vld [vmem:[#allocation107_spill] sm:$0xff] }
 0x3cc   : > { %v5274_v28 = vadd.f32 %v5145_v44, %v10199_v23 }
 0x3cd   : > { %v5897_v9 = vpop.f32.mrf.mxu0  ;;  %7562 = vst [vmem:[%s9370_s22 + $0x48] sm:$0xff] %v7442_v19   ;;  %v6419_v43 = vadd.f32 %v6418_v49, %v6356_v48  ;;  %v5777_v27 = vadd.f32 %v5647_v36, %v5517_v34 }
 0x3cf   : > { %v6027_v53 = vadd.f32 %v5897_v9, %v5777_v27  ;;  %v10206_v27 = vld [vmem:[#allocation6_spill] sm:$0xff] }
 0x3d0   : > { %7358 = vmatmul.msk.bf16.gmra.mxu0 %vm3599_vm2, %v10198_v33 }
 0x3d1   : > { %v6095_v30 = vadd.f32 %v9356_v63, %v6027_v53 }
 0x3d2   : > { %v5148_v15 = vpop.f32.mrf.mxu1  ;;  %v5389_v38 = vpop.f32.mrf.mxu2 }
 0x3d3   : > { %v5649_v39 = vpop.f32.mrf.mxu3  ;;  %v6286_v21 = vadd.f32 %v6285_v45, %v6095_v30  ;;  %v6357_v18 = vmul.f32 %v6095_v30, %v6095_v30  ;;  %v5518_v14 = vadd.f32 %v5389_v38, %v5274_v28  ;;  %v5275_v6 = vadd.f32 %v5148_v15, %v10202_v42 }
 0x3d5   : > { %v5899_v54 = vpop.f32.mrf.mxu0  ;;  %7260 = vmatmul.msk.bf16.gmra.mxu1 %vm3599_vm2, %v10193_v26  ;;  %v6420_v13 = vadd.f32 %v6419_v43, %v6357_v18  ;;  %v5778_v22 = vadd.f32 %v5649_v39, %v5518_v14  ;;  %v10205_v43 = vld [vmem:[#allocation2_spill] sm:$0xff] }
 0x3d7   : > { %v6028_v52 = vadd.f32 %v5899_v54, %v5778_v22  ;;  %7293 = vmatmul.msk.bf16.gmra.mxu2 %vm3599_vm2, %v10200_v41  ;;  %v10208_v22 = vld [vmem:[#allocation87_spill] sm:$0xff] }
 0x3d8   : > { %7326 = vmatmul.msk.bf16.gmra.mxu3 %vm3599_vm2, %v10201_v37 }
 0x3d9   : > { %v6096_v25 = vadd.f32 %v9356_v63, %v6028_v52 }
 0x3da   : > { %v5150_v20 = vpop.f32.mrf.mxu1  ;;  %v5392_v24 = vpop.f32.mrf.mxu2 }
 0x3db   : > { %v5652_v61 = vpop.f32.mrf.mxu3  ;;  %v7447_v0 = vpack.c.bf16 %v6096_v25, %v6095_v30  ;;  %v6287_v11 = vadd.f32 %v6286_v21, %v6096_v25  ;;  %v6358_v26 = vmul.f32 %v6096_v25, %v6096_v25  ;;  %v5519_v60 = vadd.f32 %v5392_v24, %v5275_v6  ;;  %v10207_v30 = vld [vmem:[#allocation60_spill] sm:$0xff]  ;;  %v10209_v25 = vld [vmem:[#allocation109_spill] sm:$0xff] }
 0x3dc   : > { %v5276_v3 = vadd.f32 %v5150_v20, %v10204_v47 }
 0x3dd   : > { %v5902_v51 = vpop.f32.mrf.mxu0  ;;  %7563 = vst [vmem:[%s9370_s22 + $0x50] sm:$0xff] %v7447_v0   ;;  %v6421_v58 = vadd.f32 %v6420_v13, %v6358_v26  ;;  %v5779_v49 = vadd.f32 %v5652_v61, %v5519_v60 }
 0x3df   : > { %v6029_v17 = vadd.f32 %v5902_v51, %v5779_v49  ;;  %v10210_v49 = vld [vmem:[#allocation9_spill] sm:$0xff] }
 0x3e0   : > { %7359 = vmatmul.msk.bf16.gmra.mxu0 %vm3599_vm2, %v10203_v1 }
 0x3e1   : > { %v6097_v12 = vadd.f32 %v9356_v63, %v6029_v17 }
 0x3e2   : > { %v5153_v50 = vpop.f32.mrf.mxu1  ;;  %v5394_v29 = vpop.f32.mrf.mxu2 }
 0x3e3   : > { %v5654_v44 = vpop.f32.mrf.mxu3  ;;  %v6288_v35 = vadd.f32 %v6287_v11, %v6097_v12  ;;  %v6359_v36 = vmul.f32 %v6097_v12, %v6097_v12  ;;  %v5520_v19 = vadd.f32 %v5394_v29, %v5276_v3  ;;  %v5277_v23 = vadd.f32 %v5153_v50, %v10207_v30 }
 0x3e5   : > { %v5904_v45 = vpop.f32.mrf.mxu0  ;;  %7261 = vmatmul.msk.bf16.gmra.mxu1 %vm3599_vm2, %v10198_v33  ;;  %v6422_v48 = vadd.f32 %v6421_v58, %v6359_v36  ;;  %v5780_v34 = vadd.f32 %v5654_v44, %v5520_v19 }
 0x3e7   : > { %v6030_v9 = vadd.f32 %v5904_v45, %v5780_v34  ;;  %7294 = vmatmul.msk.bf16.gmra.mxu2 %vm3599_vm2, %v10205_v43  ;;  %v10212_v34 = vld [vmem:[#allocation43_spill] sm:$0xff]  ;;  %v10213_v43 = vld [vmem:[#allocation110_spill] sm:$0xff] }
 0x3e8   : > { %7327 = vmatmul.msk.bf16.gmra.mxu3 %vm3599_vm2, %v10206_v27 }
 0x3e9   : > { %v6098_v53 = vadd.f32 %v9356_v63, %v6030_v9 }
 0x3ea   : > { %v5155_v28 = vpop.f32.mrf.mxu1  ;;  %v5397_v15 = vpop.f32.mrf.mxu2 }
 0x3eb   : > { %v5657_v38 = vpop.f32.mrf.mxu3  ;;  %v7452_v39 = vpack.c.bf16 %v6098_v53, %v6097_v12  ;;  %v6289_v21 = vadd.f32 %v6288_v35, %v6098_v53  ;;  %v6360_v33 = vmul.f32 %v6098_v53, %v6098_v53  ;;  %v5521_v18 = vadd.f32 %v5397_v15, %v5277_v23  ;;  %v10211_v12 = vld [vmem:[#allocation68_spill] sm:$0xff] }
 0x3ec   : > { %v5278_v42 = vadd.f32 %v5155_v28, %v10209_v25 }
 0x3ed   : > { %v5907_v14 = vpop.f32.mrf.mxu0  ;;  %7564 = vst [vmem:[%s9370_s22 + $0x58] sm:$0xff] %v7452_v39   ;;  %v6423_v54 = vadd.f32 %v6422_v48, %v6360_v33  ;;  %v5781_v13 = vadd.f32 %v5657_v38, %v5521_v18 }
 0x3ef   : > { %v6031_v52 = vadd.f32 %v5907_v14, %v5781_v13  ;;  %v10214_v14 = vld [vmem:[#allocation7_spill] sm:$0xff] }
 0x3f0   : > { %7360 = vmatmul.msk.bf16.gmra.mxu0 %vm3599_vm2, %v10208_v22 }
 0x3f1   : > { %v6099_v37 = vadd.f32 %v9356_v63, %v6031_v52  ;;  %v10216_v52 = vld [vmem:[#allocation75_spill] sm:$0xff] }
 0x3f2   : > { %v5158_v6 = vpop.f32.mrf.mxu1  ;;  %v5399_v20 = vpop.f32.mrf.mxu2 }
 0x3f3   : > { %v5659_v24 = vpop.f32.mrf.mxu3  ;;  %v6290_v61 = vadd.f32 %v6289_v21, %v6099_v37  ;;  %v6361_v0 = vmul.f32 %v6099_v37, %v6099_v37  ;;  %v5522_v11 = vadd.f32 %v5399_v20, %v5278_v42  ;;  %v5279_v47 = vadd.f32 %v5158_v6, %v10211_v12 }
 0x3f5   : > { %v5909_v26 = vpop.f32.mrf.mxu0  ;;  %7262 = vmatmul.msk.bf16.gmra.mxu1 %vm3599_vm2, %v10203_v1  ;;  %v6424_v60 = vadd.f32 %v6423_v54, %v6361_v0  ;;  %v5782_v51 = vadd.f32 %v5659_v24, %v5522_v11  ;;  %v10215_v54 = vld [vmem:[#allocation11_spill] sm:$0xff] }
 0x3f7   : > { %v6032_v58 = vadd.f32 %v5909_v26, %v5782_v51  ;;  %7295 = vmatmul.msk.bf16.gmra.mxu2 %vm3599_vm2, %v10200_v41 }
 0x3f8   : > { %7328 = vmatmul.msk.bf16.gmra.mxu3 %vm3599_vm2, %v10210_v49  ;;  %v10218_v49 = vld [vmem:[#allocation111_spill] sm:$0xff] }
 0x3f9   : > { %v6100_v17 = vadd.f32 %v9356_v63, %v6032_v58 }
 0x3fa   : > { %v5160_v3 = vpop.f32.mrf.mxu1  ;;  %v5402_v50 = vpop.f32.mrf.mxu2 }
 0x3fb   : > { %v5662_v29 = vpop.f32.mrf.mxu3  ;;  %v7457_v44 = vpack.c.bf16 %v6100_v17, %v6099_v37  ;;  %v6291_v35 = vadd.f32 %v6290_v61, %v6100_v17  ;;  %v6362_v1 = vmul.f32 %v6100_v17, %v6100_v17  ;;  %v5523_v36 = vadd.f32 %v5402_v50, %v5279_v47 }
 0x3fc   : > { %v5280_v27 = vadd.f32 %v5160_v3, %v10213_v43 }
 0x3fd   : > { %v5912_v19 = vpop.f32.mrf.mxu0  ;;  %7565 = vst [vmem:[%s9370_s22 + $0x60] sm:$0xff] %v7457_v44   ;;  %v6425_v45 = vadd.f32 %v6424_v60, %v6362_v1  ;;  %v5783_v48 = vadd.f32 %v5662_v29, %v5523_v36  ;;  %v10217_v60 = vld [vmem:[#allocation48_spill] sm:$0xff] }
 0x3ff   : > { %v6033_v41 = vadd.f32 %v5912_v19, %v5783_v48 }
 0x400   : > { %7361 = vmatmul.msk.bf16.gmra.mxu0 %vm3599_vm2, %v10212_v34 }
 0x401   : > { %v6101_v9 = vadd.f32 %v9356_v63, %v6033_v41  ;;  %v10220_v41 = vld [vmem:[#allocation83_spill] sm:$0xff] }
 0x402   : > { %v5163_v53 = vpop.f32.mrf.mxu1  ;;  %v5404_v30 = vpop.f32.mrf.mxu2 }
 0x403   : > { %v5664_v23 = vpop.f32.mrf.mxu3  ;;  %v6292_v28 = vadd.f32 %v6291_v35, %v6101_v9  ;;  %v6363_v15 = vmul.f32 %v6101_v9, %v6101_v9  ;;  %v5524_v38 = vadd.f32 %v5404_v30, %v5280_v27  ;;  %v5281_v37 = vadd.f32 %v5163_v53, %v10216_v52 }
 0x405   : > { %v5914_v39 = vpop.f32.mrf.mxu0  ;;  %7263 = vmatmul.msk.bf16.gmra.mxu1 %vm3599_vm2, %v10208_v22  ;;  %v6426_v21 = vadd.f32 %v6425_v45, %v6363_v15  ;;  %v5784_v33 = vadd.f32 %v5664_v23, %v5524_v38  ;;  %v10219_v45 = vld [vmem:[#allocation15_spill] sm:$0xff] }
 0x407   : > { %v6034_v18 = vadd.f32 %v5914_v39, %v5784_v33  ;;  %7296 = vmatmul.msk.bf16.gmra.mxu2 %vm3599_vm2, %v10214_v14 }
 0x408   : > { %7329 = vmatmul.msk.bf16.gmra.mxu3 %vm3599_vm2, %v10215_v54 }
 0x409   : > { %v6102_v13 = vadd.f32 %v9356_v63, %v6034_v18  ;;  %v10221_v18 = vld [vmem:[#allocation112_spill] sm:$0xff] }
 0x40a   : > { %v5165_v25 = vpop.f32.mrf.mxu1  ;;  %v5407_v42 = vpop.f32.mrf.mxu2 }
 0x40b   : > { %v5667_v6 = vpop.f32.mrf.mxu3  ;;  %v7462_v20 = vpack.c.bf16 %v6102_v13, %v6101_v9  ;;  %v6293_v24 = vadd.f32 %v6292_v28, %v6102_v13  ;;  %v6364_v22 = vmul.f32 %v6102_v13, %v6102_v13  ;;  %v5525_v61 = vadd.f32 %v5407_v42, %v5281_v37 }
 0x40c   : > { %v5282_v17 = vadd.f32 %v5165_v25, %v10218_v49 }
 0x40d   : > { %v5917_v0 = vpop.f32.mrf.mxu0  ;;  %7566 = vst [vmem:[%s9370_s22 + $0x68] sm:$0xff] %v7462_v20   ;;  %v6427_v11 = vadd.f32 %v6426_v21, %v6364_v22  ;;  %v5785_v26 = vadd.f32 %v5667_v6, %v5525_v61  ;;  %v10222_v61 = vld [vmem:[#allocation13_spill] sm:$0xff] }
 0x40f   : > { %v6035_v51 = vadd.f32 %v5917_v0, %v5785_v26  ;;  %v10223_v0 = vld [vmem:[#allocation17_spill] sm:$0xff] }
 0x410   : > { %7362 = vmatmul.msk.bf16.gmra.mxu0 %vm3599_vm2, %v10217_v60  ;;  %v10224_v26 = vld [vmem:[#allocation41_spill] sm:$0xff] }
 0x411   : > { %v6103_v58 = vadd.f32 %v9356_v63, %v6035_v51 }
 0x412   : > { %v5168_v12 = vpop.f32.mrf.mxu1  ;;  %v5409_v47 = vpop.f32.mrf.mxu2 }
 0x413   : > { %v5669_v3 = vpop.f32.mrf.mxu3  ;;  %v6294_v50 = vadd.f32 %v6293_v24, %v6103_v58  ;;  %v6365_v29 = vmul.f32 %v6103_v58, %v6103_v58  ;;  %v5526_v44 = vadd.f32 %v5409_v47, %v5282_v17  ;;  %v5283_v9 = vadd.f32 %v5168_v12, %v10220_v41 }
 0x415   : > { %v5919_v35 = vpop.f32.mrf.mxu0  ;;  %7264 = vmatmul.msk.bf16.gmra.mxu1 %vm3599_vm2, %v10212_v34  ;;  %v6428_v1 = vadd.f32 %v6427_v11, %v6365_v29  ;;  %v5786_v36 = vadd.f32 %v5669_v3, %v5526_v44 }
 0x417   : > { %v6036_v19 = vadd.f32 %v5919_v35, %v5786_v36  ;;  %7297 = vmatmul.msk.bf16.gmra.mxu2 %vm3599_vm2, %v9019_v5  ;;  %v10225_v35 = vld [vmem:[#allocation61_spill] sm:$0xff] }
 0x418   : > { %7330 = vmatmul.msk.bf16.gmra.mxu3 %vm3599_vm2, %v10219_v45 }
 0x419   : > { %v6104_v48 = vadd.f32 %v9356_v63, %v6036_v19  ;;  %v10226_v19 = vld [vmem:[#allocation10_spill] sm:$0xff] }
 0x41a   : > { %v5170_v43 = vpop.f32.mrf.mxu1  ;;  %v5412_v27 = vpop.f32.mrf.mxu2 }
 0x41b   : > { %v5672_v53 = vpop.f32.mrf.mxu3  ;;  %v7467_v30 = vpack.c.bf16 %v6104_v48, %v6103_v58  ;;  %v6295_v23 = vadd.f32 %v6294_v50, %v6104_v48  ;;  %v6366_v34 = vmul.f32 %v6104_v48, %v6104_v48  ;;  %v5527_v28 = vadd.f32 %v5412_v27, %v5283_v9 }
 0x41c   : > { %v5284_v14 = vadd.f32 %v5170_v43, %v10221_v18 }
 0x41d   : > { %v5922_v15 = vpop.f32.mrf.mxu0  ;;  %7567 = vst [vmem:[%s9370_s22 + $0x70] sm:$0xff] %v7467_v30   ;;  %v6429_v38 = vadd.f32 %v6428_v1, %v6366_v34  ;;  %v5787_v39 = vadd.f32 %v5672_v53, %v5527_v28 }
 0x41f   : > { %v6037_v21 = vadd.f32 %v5922_v15, %v5787_v39  ;;  %v10227_v15 = vld [vmem:[#allocation24_spill] sm:$0xff]  ;;  %v10228_v39 = vld [vmem:[#allocation46_spill] sm:$0xff] }
 0x420   : > { %7363 = vmatmul.msk.bf16.gmra.mxu0 %vm3599_vm2, %v9077_v8 }
 0x421   : > { %v6105_v33 = vadd.f32 %v9356_v63, %v6037_v21 }
 0x422   : > { %v5173_v54 = vpop.f32.mrf.mxu1  ;;  %v5414_v13 = vpop.f32.mrf.mxu2 }
 0x423   : > { %v5674_v52 = vpop.f32.mrf.mxu3  ;;  %v6296_v37 = vadd.f32 %v6295_v23, %v6105_v33  ;;  %v6367_v25 = vmul.f32 %v6105_v33, %v6105_v33  ;;  %v5528_v42 = vadd.f32 %v5414_v13, %v5284_v14  ;;  %v5285_v51 = vadd.f32 %v5173_v54, %v10224_v26 }
 0x425   : > { %v5924_v6 = vpop.f32.mrf.mxu0  ;;  %7265 = vmatmul.msk.bf16.gmra.mxu1 %vm3599_vm2, %v10217_v60  ;;  %v6430_v20 = vadd.f32 %v6429_v38, %v6367_v25  ;;  %v5788_v24 = vadd.f32 %v5674_v52, %v5528_v42 }
 0x427   : > { %v6038_v22 = vadd.f32 %v5924_v6, %v5788_v24  ;;  %7298 = vmatmul.msk.bf16.gmra.mxu2 %vm3599_vm2, %v10222_v61  ;;  %v10229_v6 = vld [vmem:[#allocation69_spill] sm:$0xff] }
 0x428   : > { %7331 = vmatmul.msk.bf16.gmra.mxu3 %vm3599_vm2, %v10223_v0  ;;  %v10230_v24 = vld [vmem:[#allocation113_spill] sm:$0xff] }
 0x429   : > { %v6106_v11 = vadd.f32 %v9356_v63, %v6038_v22 }
 0x42a   : > { %v5175_v58 = vpop.f32.mrf.mxu1  ;;  %v5417_v49 = vpop.f32.mrf.mxu2 }
 0x42b   : > { %v5677_v17 = vpop.f32.mrf.mxu3  ;;  %v7472_v12 = vpack.c.bf16 %v6106_v11, %v6105_v33  ;;  %v6297_v47 = vadd.f32 %v6296_v37, %v6106_v11  ;;  %v6368_v60 = vmul.f32 %v6106_v11, %v6106_v11  ;;  %v5529_v3 = vadd.f32 %v5417_v49, %v5285_v51 }
 0x42c   : > { %v5286_v45 = vadd.f32 %v5175_v58, %v10226_v19 }
 0x42d   : > { %v5927_v50 = vpop.f32.mrf.mxu0  ;;  %7568 = vst [vmem:[%s9370_s22 + $0x78] sm:$0xff] %v7472_v12   ;;  %v6431_v29 = vadd.f32 %v6430_v20, %v6368_v60  ;;  %v5789_v44 = vadd.f32 %v5677_v17, %v5529_v3  ;;  %v10231_v60 = vld [vmem:[#allocation19_spill] sm:$0xff]  ;;  %v9594_v3 = vld [vmem:[%s9803_s4] ss:$0 sm:$0xff] }
 0x42f   : > { %v6039_v1 = vadd.f32 %v5927_v50, %v5789_v44 }
 0x430   : > { %7364 = vmatmul.msk.bf16.gmra.mxu0 %vm3599_vm2, %v10225_v35 }
 0x431   : > { %v6107_v36 = vadd.f32 %v9356_v63, %v6039_v1 }
 0x432   : > { %v5178_v48 = vpop.f32.mrf.mxu1  ;;  %v5419_v41 = vpop.f32.mrf.mxu2 }
 0x433   : > { %v5679_v9 = vpop.f32.mrf.mxu3  ;;  %v6298_v43 = vadd.f32 %v6297_v47, %v6107_v36  ;;  %v6369_v27 = vmul.f32 %v6107_v36, %v6107_v36  ;;  %v5530_v53 = vadd.f32 %v5419_v41, %v5286_v45  ;;  %v5287_v21 = vadd.f32 %v5178_v48, %v10228_v39 }
 0x435   : > { %v5929_v30 = vpop.f32.mrf.mxu0  ;;  %7266 = vmatmul.msk.bf16.gmra.mxu1 %vm3599_vm2, %v9077_v8  ;;  %v6432_v23 = vadd.f32 %v6431_v29, %v6369_v27  ;;  %v5790_v34 = vadd.f32 %v5679_v9, %v5530_v53  ;;  %v10233_v29 = vld [vmem:[#allocation52_spill] sm:$0xff] }
 0x436   : > { %v10234_v53 = vld [vmem:[#allocation76_spill] sm:$0xff] }
 0x437   : > { %v6040_v28 = vadd.f32 %v5929_v30, %v5790_v34  ;;  %7299 = vmatmul.msk.bf16.gmra.mxu2 %vm3599_vm2, %v9019_v5  ;;  %v10235_v34 = vld [vmem:[#allocation54_spill] sm:$0xff] }
 0x438   : > { %7332 = vmatmul.msk.bf16.gmra.mxu3 %vm3599_vm2, %v10227_v15 }
 0x439   : > { %v6108_v38 = vadd.f32 %v9356_v63, %v6040_v28 }
 0x43a   : > { %v5180_v33 = vpop.f32.mrf.mxu1  ;;  %v5422_v18 = vpop.f32.mrf.mxu2 }
 0x43b   : > { %v5682_v14 = vpop.f32.mrf.mxu3  ;;  %v7477_v54 = vpack.c.bf16 %v6108_v38, %v6107_v36  ;;  %v6299_v13 = vadd.f32 %v6298_v43, %v6108_v38  ;;  %v6370_v8 = vmul.f32 %v6108_v38, %v6108_v38  ;;  %v5531_v52 = vadd.f32 %v5422_v18, %v5287_v21  ;;  %v10236_v38 = vld [vmem:[#allocation22_spill] sm:$0xff] }
 0x43c   : > { %v5288_v22 = vadd.f32 %v5180_v33, %v10230_v24  ;;  %v903_v39 = vadd.s32 544, %v10236_v38 }
 0x43d   : > { %v5932_v37 = vpop.f32.mrf.mxu0  ;;  %7569 = vst [vmem:[%s9370_s22 + $0x80] sm:$0xff] %v7477_v54   ;;  %v6433_v25 = vadd.f32 %v6432_v23, %v6370_v8  ;;  %v5791_v42 = vadd.f32 %v5682_v14, %v5531_v52 }
 0x43f   : > { %v6041_v5 = vadd.f32 %v5932_v37, %v5791_v42  ;;  %v6925_v37 = vadd.s32 4294967295, %v903_v39  ;;  %v10237_v42 = vld [vmem:[#allocation37_spill] sm:$0xff] }
 0x440   : > { %7365 = vmatmul.msk.bf16.gmra.mxu0 %vm3599_vm2, %v10229_v6 }
 0x441   : > { %v6109_v20 = vadd.f32 %v9356_v63, %v6041_v5  ;;  %v10232_v63 = vld [vmem:[#allocation29_spill] sm:$0xff] }
 0x442   : > { %v5183_v61 = vpop.f32.mrf.mxu1  ;;  %v5424_v0 = vpop.f32.mrf.mxu2 }
 0x443   : > { %v5684_v11 = vpop.f32.mrf.mxu3  ;;  %v6300_v26 = vadd.f32 %v6299_v13, %v6109_v20  ;;  %v6371_v51 = vmul.f32 %v6109_v20, %v6109_v20  ;;  %v5532_v58 = vadd.f32 %v5424_v0, %v5288_v22  ;;  %v5289_v44 = vadd.f32 %v5183_v61, %v10233_v29 }
 0x444   : > { %v1461_v61 = vand.u32 31, %v6925_v37  ;;  %v9630_v37 = vsel %vm4172_vm4, %v9193_v40, %v9154_v2 }
 0x445   : > { %v5934_v49 = vpop.f32.mrf.mxu0  ;;  %7267 = vmatmul.msk.bf16.gmra.mxu1 %vm3599_vm2, %v10225_v35  ;;  %v6434_v17 = vadd.f32 %v6433_v25, %v6371_v51  ;;  %v5792_v12 = vadd.f32 %v5684_v11, %v5532_v58 }
 0x446   : > { %vm2681_vm13 = vcmp.eq.s32.totalorder %v1461_v61, 0  ;;  %vm9633_vm15 = vcmp.eq.s32.totalorder %v1461_v61, 31 }
 0x447   : > { %v6042_v47 = vadd.f32 %v5934_v49, %v5792_v12  ;;  %7300 = vmatmul.msk.bf16.gmra.mxu2 %vm3599_vm2, %v10231_v60  ;;  %vm2900_vm14 = vmpackc.low %vm2681_vm13, %vm2681_vm13 }
 0x448   : > { %7333 = vmatmul.msk.bf16.gmra.mxu3 %vm3599_vm2, %v10232_v63  ;;  %v10239_v63 = vld [vmem:[#allocation114_spill] sm:$0xff]  ;;  %vm2141_vm8 = vmpackc.low %vm9633_vm15, %vm9633_vm15 }
 0x449   : > { %v6110_v50 = vadd.f32 %v9594_v3, %v6042_v47 }
 0x44a   : > { %v5185_v35 = vpop.f32.mrf.mxu1  ;;  %v5427_v1 = vpop.f32.mrf.mxu2 }
 0x44b   : > { %v5687_v36 = vpop.f32.mrf.mxu3  ;;  %v7482_v19 = vpack.c.bf16 %v6110_v50, %v6109_v20  ;;  %v6301_v45 = vadd.f32 %v6300_v26, %v6110_v50  ;;  %v6372_v48 = vmul.f32 %v6110_v50, %v6110_v50  ;;  %v5533_v41 = vadd.f32 %v5427_v1, %v5289_v44  ;;  %v10238_v20 = vld [vmem:[#allocation58_spill] sm:$0xff] }
 0x44c   : > { %v5290_v28 = vadd.f32 %v5185_v35, %v10235_v34  ;;  %v7393_v34 = vld [vmem:[%s9146_s15 + $0x8] sm:$0xff] }
 0x44d   : > { %v5937_v9 = vpop.f32.mrf.mxu0  ;;  %7570 = vst [vmem:[%s9370_s22 + $0x88] sm:$0xff] %v7482_v19   ;;  %v6435_v43 = vadd.f32 %v6434_v17, %v6372_v48  ;;  %v5793_v27 = vadd.f32 %v5687_v36, %v5533_v41 }
 0x44f   : > { %v6043_v30 = vadd.f32 %v5937_v9, %v5793_v27 }
 0x450   : > { %7366 = vmatmul.msk.bf16.gmra.mxu0 %vm3599_vm2, %v10234_v53 }
 0x451   : > { %v6111_v23 = vadd.f32 %v9594_v3, %v6043_v30 }
 0x452   : > { %v5188_v15 = vpop.f32.mrf.mxu1  ;;  %v5429_v21 = vpop.f32.mrf.mxu2 }
 0x453   : > { %v5689_v33 = vpop.f32.mrf.mxu3  ;;  %v6302_v18 = vadd.f32 %v6301_v45, %v6111_v23  ;;  %v6373_v14 = vmul.f32 %v6111_v23, %v6111_v23  ;;  %v5534_v54 = vadd.f32 %v5429_v21, %v5290_v28  ;;  %v5291_v24 = vadd.f32 %v5188_v15, %v10238_v20  ;;  %v10242_v15 = vld [vmem:[#allocation66_spill] sm:$0xff] }
 0x454   : > { %v10240_v45 = vmov 0   ;;  %v10245_v20 = vld [vmem:[#allocation34_spill] sm:$0xff] }
 0x455   : > { %v5939_v13 = vpop.f32.mrf.mxu0  ;;  %7268 = vmatmul.msk.bf16.gmra.mxu1 %vm3599_vm2, %v10229_v6  ;;  %v6436_v8 = vadd.f32 %v6435_v43, %v6373_v14  ;;  %v5794_v52 = vadd.f32 %v5689_v33, %v5534_v54  ;;  %v2973_v48 = vsel %vm2900_vm14, 65537, %v10240_v45 }
 0x456   : > { %v3046_v27 = vunpack.c.l.b16 %v2973_v48 }
 0x457   : > { %v6044_v25 = vadd.f32 %v5939_v13, %v5794_v52  ;;  %7301 = vmatmul.msk.bf16.gmra.mxu2 %vm3599_vm2, %v9131_v46 }
 0x458   : > { %7334 = vmatmul.msk.bf16.gmra.mxu3 %vm3599_vm2, %v10237_v42 }
 0x459   : > { %v6112_v5 = vadd.f32 %v9594_v3, %v6044_v25 }
 0x45a   : > { %v5190_v22 = vpop.f32.mrf.mxu1  ;;  %v5432_v0 = vpop.f32.mrf.mxu2 }
 0x45b   : > { %v5692_v11 = vpop.f32.mrf.mxu3  ;;  %v7487_v6 = vpack.c.bf16 %v6112_v5, %v6111_v23  ;;  %v6303_v26 = vadd.f32 %v6302_v18, %v6112_v5  ;;  %v6374_v51 = vmul.f32 %v6112_v5, %v6112_v5  ;;  %v5535_v58 = vadd.f32 %v5432_v0, %v5291_v24  ;;  %v10241_v23 = vld [vmem:[#allocation30_spill] sm:$0xff]  ;;  %v10246_v0 = vld [vmem:[#allocation25_spill] sm:$0xff] }
 0x45c   : > { %v5292_v50 = vadd.f32 %v5190_v22, %v10239_v63  ;;  %v2213_v63 = vsel %vm2141_vm8, 65537, %v10240_v45  ;;  %v10256_v5 = vld [vmem:[#allocation21_spill] sm:$0xff] }
 0x45d   : > { %v5942_v49 = vpop.f32.mrf.mxu0  ;;  %7571 = vst [vmem:[%s9370_s22 + $0x90] sm:$0xff] %v7487_v6   ;;  %v6437_v17 = vadd.f32 %v6436_v8, %v6374_v51  ;;  %v5795_v12 = vadd.f32 %v5692_v11, %v5535_v58  ;;  %v797_v51 = vshll.u32 %v7393_v34, 16  ;;  %v907_v58 = vadd.s32 576, %v10236_v38 }
 0x45f   : > { %v6045_v47 = vadd.f32 %v5942_v49, %v5795_v12  ;;  %v6929_v38 = vadd.s32 4294967295, %v907_v58 }
 0x460   : > { %7367 = vmatmul.msk.bf16.gmra.mxu0 %vm3599_vm2, %v9205_v57 }
 0x461   : > { %v6113_v60 = vadd.f32 %v9594_v3, %v6045_v47 }
 0x462   : > { %v5193_v29 = vpop.f32.mrf.mxu1  ;;  %v5434_v44 = vpop.f32.mrf.mxu2 }
 0x463   : > { %v5694_v35 = vpop.f32.mrf.mxu3  ;;  %v6304_v1 = vadd.f32 %v6303_v26, %v6113_v60  ;;  %v6375_v36 = vmul.f32 %v6113_v60, %v6113_v60  ;;  %v5536_v19 = vadd.f32 %v5434_v44, %v5292_v50  ;;  %v5293_v39 = vadd.f32 %v5193_v29, %v10242_v15  ;;  %v10250_v29 = vld [vmem:[#allocation27_spill] sm:$0xff] }
 0x465   : > { %v5944_v41 = vpop.f32.mrf.mxu0  ;;  %7269 = vmatmul.msk.bf16.gmra.mxu1 %vm3599_vm2, %v10234_v53  ;;  %v6438_v9 = vadd.f32 %v6437_v17, %v6375_v36  ;;  %v5796_v43 = vadd.f32 %v5694_v35, %v5536_v19  ;;  %v7070_v53 = vunpack.i.l.s16 %v3046_v27  ;;  %v2285_v19 = vunpack.c.l.b16 %v2213_v63 }
 0x467   : > { %v6046_v30 = vadd.f32 %v5944_v41, %v5796_v43  ;;  %7302 = vmatmul.msk.bf16.gmra.mxu2 %vm3599_vm2, %v10241_v23  ;;  %vm3330_vm6 = vcmp.ne.s32.totalorder %v7070_v53, %v10245_v20  ;;  %v10251_v41 = vld [vmem:[#allocation88_spill] sm:$0xff]  ;;  %v10252_v43 = vld [vmem:[#allocation73_spill] sm:$0xff] }
 0x468   : > { %7335 = vmatmul.msk.bf16.gmra.mxu3 %vm3599_vm2, %v9185_v10  ;;  %v794_v10 = vshrl.u32 %v7393_v34, 16  ;;  %vm9649_vm9 = vmpackc.low %vm8251_vm7, %vm3330_vm6  ;;  %v10253_v23 = vld [vmem:[#allocation33_spill] sm:$0xff] }
 0x469   : > { %v6114_v28 = vadd.f32 %v9594_v3, %v6046_v30  ;;  %v3381_v44 = vsel %vm9649_vm9, 0, %v10250_v29 }
 0x46a   : > { %v5195_v21 = vpop.f32.mrf.mxu1  ;;  %v5437_v33 = vpop.f32.mrf.mxu2  ;;  %v9643_v40 = vrot.slane %v794_v10, 7 }
 0x46b   : > { %v5697_v18 = vpop.f32.mrf.mxu3  ;;  %v7492_v14 = vpack.c.bf16 %v6114_v28, %v6113_v60  ;;  %v6305_v54 = vadd.f32 %v6304_v1, %v6114_v28  ;;  %v6376_v13 = vmul.f32 %v6114_v28, %v6114_v28  ;;  %v5537_v8 = vadd.f32 %v5437_v33, %v5293_v39 }
 0x46c   : > { %v5294_v11 = vadd.f32 %v5195_v21, %v10246_v0  ;;  %v799_v36 = vor.u32 %v797_v51, %v9643_v40  ;;  %v1489_v28 = vand.u32 31, %v6929_v38  ;;  %v6998_v21 = vunpack.i.l.s16 %v2285_v19  ;;  %v10257_v0 = vld [vmem:[#allocation115_spill] sm:$0xff]  ;;  %v10261_v19 = vld [vmem:[#allocation81_spill] sm:$0xff] }
 0x46d   : > { %v5947_v52 = vpop.f32.mrf.mxu0  ;;  %7572 = vst [vmem:[%s9370_s22 + $0x98] sm:$0xff] %v7492_v14   ;;  %v6439_v25 = vadd.f32 %v6438_v9, %v6376_v13  ;;  %v5797_v42 = vadd.f32 %v5697_v18, %v5537_v8  ;;  %v5073_v9 = vrot.slane %v3381_v44, 1  ;;  %v5563_v13 = vshrl.u32 %v10250_v29, 16 }
 0x46e   : > { %v9669_v34 = vsel %vm633_vm1, %v10253_v23, %v799_v36  ;;  %vm9678_vm1 = vcmp.eq.s32.totalorder %v1489_v28, 0  ;;  %vm2567_vm10 = vcmp.ne.s32.totalorder %v6998_v21, %v10245_v20 }
 0x46f   : > { %v6047_v24 = vadd.f32 %v5947_v52, %v5797_v42  ;;  %v5567_v8 = vshll.u32 %v9669_v34, 16  ;;  %vm2904_vm12 = vmpackc.low %vm9678_vm1, %vm9678_vm1 }
 0x470   : > { %7368 = vmatmul.msk.bf16.gmra.mxu0 %vm3599_vm2, %v9630_v37  ;;  %vm9693_vm0 = vmpackc.low %vm8251_vm7, %vm2567_vm10 }
 0x471   : > { %v6115_v22 = vadd.f32 %v9594_v3, %v6047_v24  ;;  %v5569_v24 = vrot.slane %v5567_v8, 1  ;;  %v2611_v63 = vsel %vm9693_vm0, 0, %v10250_v29 }
 0x472   : > { %v5198_v61 = vpop.f32.mrf.mxu1  ;;  %v5439_v49 = vpop.f32.mrf.mxu2 }
 0x473   : > { %v5699_v17 = vpop.f32.mrf.mxu3  ;;  %v6306_v12 = vadd.f32 %v6305_v54, %v6115_v22  ;;  %v6377_v47 = vmul.f32 %v6115_v22, %v6115_v22  ;;  %v5538_v60 = vadd.f32 %v5439_v49, %v5294_v11  ;;  %v5295_v27 = vadd.f32 %v5198_v61, %v10252_v43 }
 0x474   : > { %v9673_v54 = vsel %vm4172_vm4, %v9154_v2, %v5073_v9  ;;  %v5565_v2 = vor.u32 %v5563_v13, %v10256_v5 }
 0x475   : > { %v5949_v50 = vpop.f32.mrf.mxu0  ;;  %7270 = vmatmul.msk.bf16.gmra.mxu1 %vm3599_vm2, %v9205_v57  ;;  %v6440_v35 = vadd.f32 %v6439_v25, %v6377_v47  ;;  %v5798_v1 = vadd.f32 %v5699_v17, %v5538_v60  ;;  %v2977_v47 = vsel %vm2904_vm12, 65537, %v10240_v45  ;;  %v10264_v25 = vld [vmem:[#allocation84_spill] sm:$0xff] }
 0x476   : > { %v5570_v6 = vsel %vm3387_vm3, %v5565_v2, %v5569_v24  ;;  %v3050_v36 = vunpack.c.l.b16 %v2977_v47 }
 0x477   : > { %v6048_v48 = vadd.f32 %v5949_v50, %v5798_v1  ;;  %7303 = vmatmul.msk.bf16.gmra.mxu2 %vm3599_vm2, %v9131_v46  ;;  %v2612_v1 = vsel %vm8264_vm11, 0, %v9669_v34 }
 0x478   : > { %7336 = vmatmul.msk.bf16.gmra.mxu3 %vm3599_vm2, %v10251_v41  ;;  %v5825_v45 = vrot.slane %v2612_v1, 1 }
 0x479   : > { %v6116_v57 = vadd.f32 %v9594_v3, %v6048_v48 }
 0x47a   : > { %v5200_v30 = vpop.f32.mrf.mxu1  ;;  %v5442_v15 = vpop.f32.mrf.mxu2 }
 0x47b   : > { %v5702_v39 = vpop.f32.mrf.mxu3  ;;  %v7497_v33 = vpack.c.bf16 %v6116_v57, %v6115_v22  ;;  %v6307_v46 = vadd.f32 %v6306_v12, %v6116_v57  ;;  %v6378_v18 = vmul.f32 %v6116_v57, %v6116_v57  ;;  %v5539_v53 = vadd.f32 %v5442_v15, %v5295_v27 }
 0x47c   : > { %v5296_v11 = vadd.f32 %v5200_v30, %v10257_v0  ;;  %v833_v57 = vsel %vm7870_vm5, %v9643_v40, 0  ;;  %v7074_v30 = vunpack.i.l.s16 %v3050_v36  ;;  %v10263_v40 = vld [vmem:[#allocation35_spill] sm:$0xff] }
 0x47d   : > { %v5952_v14 = vpop.f32.mrf.mxu0  ;;  %7573 = vst [vmem:[%s9370_s22 + $0xa0] sm:$0xff] %v7497_v33   ;;  %v6441_v52 = vadd.f32 %v6440_v35, %v6378_v18  ;;  %v5799_v10 = vadd.f32 %v5702_v39, %v5539_v53  ;;  %v5826_v33 = vsel %vm4172_vm4, %v5073_v9, %v5825_v45  ;;  %v5575_v18 = vshll.u32 %v833_v57, 16 }
 0x47e   : > { %vm3344_vm5 = vcmp.ne.s32.totalorder %v7074_v30, %v10245_v20  ;;  %vm3345_vm7 = vcmp.ne.s32.totalorder %v7074_v30, %v10263_v40 }
 0x47f   : > { %v6049_v42 = vadd.f32 %v5952_v14, %v5799_v10  ;;  %vm3346_vm11 = vmpackc.low %vm3345_vm7, %vm3344_vm5 }
 0x480   : > { %7369 = vmatmul.msk.bf16.gmra.mxu0 %vm3599_vm2, %v9673_v54  ;;  %v3383_v26 = vsel %vm3346_vm11, 0, %v833_v57 }
 0x481   : > { %v6117_v22 = vadd.f32 %v9594_v3, %v6049_v42 }
 0x482   : > { %v5203_v61 = vpop.f32.mrf.mxu1  ;;  %v5444_v51 = vpop.f32.mrf.mxu2 }
 0x483   : > { %v5704_v58 = vpop.f32.mrf.mxu3  ;;  %v6308_v49 = vadd.f32 %v6307_v46, %v6117_v22  ;;  %v6379_v17 = vmul.f32 %v6117_v22, %v6117_v22  ;;  %v5540_v12 = vadd.f32 %v5444_v51, %v5296_v11  ;;  %v5297_v29 = vadd.f32 %v5203_v61, %v10261_v19 }
 0x484   : > { %v5571_v46 = vshrl.u32 %v9669_v34, 16 }
 0x485   : > { %v5954_v60 = vpop.f32.mrf.mxu0  ;;  %7271 = vmatmul.msk.bf16.gmra.mxu1 %vm3599_vm2, %v9630_v37  ;;  %v6442_v50 = vadd.f32 %v6441_v52, %v6379_v17  ;;  %v5800_v44 = vadd.f32 %v5704_v58, %v5540_v12  ;;  %v5577_v52 = vrot.slane %v5575_v18, 1  ;;  %v5827_v58 = vrot.slane %v3383_v26, 1  ;;  %v10265_v17 = vld [vmem:[#allocation32_spill] sm:$0xff] }
 0x486   : > { %v5573_v8 = vor.u32 %v5571_v46, %v5569_v24 }
 0x487   : > { %v6050_v38 = vadd.f32 %v5954_v60, %v5800_v44  ;;  %7304 = vmatmul.msk.bf16.gmra.mxu2 %vm3599_vm2, %v2611_v63  ;;  %v5828_v36 = vsel %vm4172_vm4, %v5825_v45, %v5827_v58 }
 0x488   : > { %7337 = vmatmul.msk.bf16.gmra.mxu3 %vm3599_vm2, %v5570_v6  ;;  %v5578_v20 = vsel %vm3387_vm3, %v5573_v8, %v5577_v52 }
 0x489   : > { %v6118_v37 = vadd.f32 %v9594_v3, %v6050_v38 }
 0x48a   : > { %v5205_v48 = vpop.f32.mrf.mxu1  ;;  %v5447_v43 = vpop.f32.mrf.mxu2 }
 0x48b   : > { %v5707_v27 = vpop.f32.mrf.mxu3  ;;  %v7502_v23 = vpack.c.bf16 %v6118_v37, %v6117_v22  ;;  %v6309_v28 = vadd.f32 %v6308_v49, %v6118_v37  ;;  %v6380_v15 = vmul.f32 %v6118_v37, %v6118_v37  ;;  %v5541_v39 = vadd.f32 %v5447_v43, %v5297_v29  ;;  %v10266_v29 = vld [vmem:[#allocation90_spill] sm:$0xff] }
 0x48c   : > { %v5298_v42 = vadd.f32 %v5205_v48, %v10264_v25 }
 0x48d   : > { %v5957_v21 = vpop.f32.mrf.mxu0  ;;  %7574 = vst [vmem:[%s9370_s22 + $0xa8] sm:$0xff] %v7502_v23   ;;  %v6443_v53 = vadd.f32 %v6442_v50, %v6380_v15  ;;  %v5801_v14 = vadd.f32 %v5707_v27, %v5541_v39 }
 0x48f   : > { %v6051_v13 = vadd.f32 %v5957_v21, %v5801_v14 }
 0x490   : > { %7370 = vmatmul.msk.bf16.gmra.mxu0 %vm3599_vm2, %v5826_v33  ;;  %v10267_v33 = vld [vmem:[#allocation50_spill] sm:$0xff] }
 0x491   : > { %v6119_v10 = vadd.f32 %v9594_v3, %v6051_v13 }
 0x492   : > { %v5208_v9 = vpop.f32.mrf.mxu1  ;;  %v5449_v5 = vpop.f32.mrf.mxu2 }
 0x493   : > { %v5709_v34 = vpop.f32.mrf.mxu3  ;;  %v6310_v2 = vadd.f32 %v6309_v28, %v6119_v10  ;;  %v6381_v22 = vmul.f32 %v6119_v10, %v6119_v10  ;;  %v5542_v0 = vadd.f32 %v5449_v5, %v5298_v42  ;;  %v5299_v12 = vadd.f32 %v5208_v9, %v10265_v17 }
 0x495   : > { %v5959_v11 = vpop.f32.mrf.mxu0  ;;  %7272 = vmatmul.msk.bf16.gmra.mxu1 %vm3599_vm2, %v9673_v54  ;;  %v6444_v61 = vadd.f32 %v6443_v53, %v6381_v22  ;;  %v5802_v24 = vadd.f32 %v5709_v34, %v5542_v0  ;;  %v10268_v34 = vld [vmem:[#allocation51_spill] sm:$0xff] }
 0x497   : > { %v6052_v51 = vadd.f32 %v5959_v11, %v5802_v24  ;;  %7305 = vmatmul.msk.bf16.gmra.mxu2 %vm3599_vm2, %v2612_v1 }
 0x498   : > { %7338 = vmatmul.msk.bf16.gmra.mxu3 %vm3599_vm2, %v5578_v20 }
 0x499   : > { %v6120_v49 = vadd.f32 %v9594_v3, %v6052_v51 }
 0x49a   : > { %v5210_v47 = vpop.f32.mrf.mxu1  ;;  %v5452_v60 = vpop.f32.mrf.mxu2 }
 0x49b   : > { %v5712_v63 = vpop.f32.mrf.mxu3  ;;  %v7507_v54 = vpack.c.bf16 %v6120_v49, %v6119_v10  ;;  %v6311_v6 = vadd.f32 %v6310_v2, %v6120_v49  ;;  %v6382_v50 = vmul.f32 %v6120_v49, %v6120_v49  ;;  %v5543_v44 = vadd.f32 %v5452_v60, %v5299_v12  ;;  %v10269_v12 = vld [vmem:[#allocation20_spill] sm:$0xff] }
 0x49c   : > { %v5300_v48 = vadd.f32 %v5210_v47, %v10266_v29  ;;  %v10270_v29 = vld [vmem:[#allocation42_spill] sm:$0xff] }
 0x49d   : > { %v5962_v35 = vpop.f32.mrf.mxu0  ;;  %7575 = vst [vmem:[%s9370_s22 + $0xb0] sm:$0xff] %v7507_v54   ;;  %v6445_v38 = vadd.f32 %v6444_v61, %v6382_v50  ;;  %v5803_v1 = vadd.f32 %v5712_v63, %v5543_v44 }
 0x49f   : > { %v6053_v37 = vadd.f32 %v5962_v35, %v5803_v1 }
 0x4a0   : > { %7371 = vmatmul.msk.bf16.gmra.mxu0 %vm3599_vm2, %v5828_v36 }
 0x4a1   : > { %v6121_v19 = vadd.f32 %v9594_v3, %v6053_v37 }
 0x4a2   : > { %v5213_v41 = vpop.f32.mrf.mxu1  ;;  %v5454_v57 = vpop.f32.mrf.mxu2 }
 0x4a3   : > { %v5714_v43 = vpop.f32.mrf.mxu3  ;;  %v6312_v27 = vadd.f32 %v6311_v6, %v6121_v19  ;;  %v6383_v30 = vmul.f32 %v6121_v19, %v6121_v19  ;;  %v5544_v23 = vadd.f32 %v5454_v57, %v5300_v48  ;;  %v5301_v46 = vadd.f32 %v5213_v41, %v10267_v33  ;;  %v10271_v33 = vld [vmem:[#allocation63_spill] sm:$0xff] }
 0x4a5   : > { %v5964_v28 = vpop.f32.mrf.mxu0  ;;  %v6446_v15 = vadd.f32 %v6445_v38, %v6383_v30  ;;  %v5804_v45 = vadd.f32 %v5714_v43, %v5544_v23 }
 0x4a7   : > { %v6054_v39 = vadd.f32 %v5964_v28, %v5804_v45 }
 0x4a9   : > { %v6122_v21 = vadd.f32 %v9594_v3, %v6054_v39 }
 0x4aa   : > { %v5215_v18 = vpop.f32.mrf.mxu1  ;;  %v5457_v53 = vpop.f32.mrf.mxu2 }
 0x4ab   : > { %v5717_v14 = vpop.f32.mrf.mxu3  ;;  %v7512_v13 = vpack.c.bf16 %v6122_v21, %v6121_v19  ;;  %v6313_v40 = vadd.f32 %v6312_v27, %v6122_v21  ;;  %v6384_v8 = vmul.f32 %v6122_v21, %v6122_v21  ;;  %v5545_v52 = vadd.f32 %v5457_v53, %v5301_v46 }
 0x4ac   : > { %v5302_v2 = vadd.f32 %v5215_v18, %v10268_v34  ;;  %v10272_v34 = vld [vmem:[#allocation44_spill] sm:$0xff] }
 0x4ad   : > { %v5967_v10 = vpop.f32.mrf.mxu0  ;;  %7576 = vst [vmem:[%s9370_s22 + $0xb8] sm:$0xff] %v7512_v13   ;;  %v6447_v25 = vadd.f32 %v6446_v15, %v6384_v8  ;;  %v5805_v42 = vadd.f32 %v5717_v14, %v5545_v52 }
 0x4af   : > { %v6055_v9 = vadd.f32 %v5967_v10, %v5805_v42 }
 0x4b1   : > { %v6123_v5 = vadd.f32 %v9594_v3, %v6055_v9 }
 0x4b2   : > { %v5218_v22 = vpop.f32.mrf.mxu1  ;;  %v5459_v0 = vpop.f32.mrf.mxu2 }
 0x4b3   : > { %v5719_v11 = vpop.f32.mrf.mxu3  ;;  %v6314_v20 = vadd.f32 %v6313_v40, %v6123_v5  ;;  %v6385_v61 = vmul.f32 %v6123_v5, %v6123_v5  ;;  %v5546_v24 = vadd.f32 %v5459_v0, %v5302_v2  ;;  %v5303_v47 = vadd.f32 %v5218_v22, %v10269_v12  ;;  %v10273_v12 = vld [vmem:[#allocation56_spill] sm:$0xff] }
 0x4b5   : > { %v5969_v26 = vpop.f32.mrf.mxu0  ;;  %v6448_v51 = vadd.f32 %v6447_v25, %v6385_v61  ;;  %v5806_v58 = vadd.f32 %v5719_v11, %v5546_v24 }
 0x4b7   : > { %v6056_v49 = vadd.f32 %v5969_v26, %v5806_v58 }
 0x4b9   : > { %v6124_v17 = vadd.f32 %v9594_v3, %v6056_v49 }
 0x4ba   : > { %v5220_v60 = vpop.f32.mrf.mxu1  ;;  %v5462_v63 = vpop.f32.mrf.mxu2 }
 0x4bb   : > { %v5722_v54 = vpop.f32.mrf.mxu3  ;;  %v7517_v6 = vpack.c.bf16 %v6124_v17, %v6123_v5  ;;  %v6315_v50 = vadd.f32 %v6314_v20, %v6124_v17  ;;  %v6386_v44 = vmul.f32 %v6124_v17, %v6124_v17  ;;  %v5547_v35 = vadd.f32 %v5462_v63, %v5303_v47 }
 0x4bc   : > { %v5304_v48 = vadd.f32 %v5220_v60, %v10270_v29 }
 0x4bd   : > { %v5972_v36 = vpop.f32.mrf.mxu0  ;;  %7577 = vst [vmem:[%s9370_s22 + $0xc0] sm:$0xff] %v7517_v6   ;;  %v6449_v38 = vadd.f32 %v6448_v51, %v6386_v44  ;;  %v5807_v1 = vadd.f32 %v5722_v54, %v5547_v35 }
 0x4bf   : > { %v6057_v37 = vadd.f32 %v5972_v36, %v5807_v1 }
 0x4c1   : > { %v6125_v19 = vadd.f32 %v9594_v3, %v6057_v37 }
 0x4c2   : > { %v5223_v41 = vpop.f32.mrf.mxu1  ;;  %v5464_v57 = vpop.f32.mrf.mxu2 }
 0x4c3   : > { %v5724_v43 = vpop.f32.mrf.mxu3  ;;  %v6316_v27 = vadd.f32 %v6315_v50, %v6125_v19  ;;  %v6387_v30 = vmul.f32 %v6125_v19, %v6125_v19  ;;  %v5548_v23 = vadd.f32 %v5464_v57, %v5304_v48  ;;  %v5305_v46 = vadd.f32 %v5223_v41, %v10271_v33 }
 0x4c5   : > { %v5974_v28 = vpop.f32.mrf.mxu0  ;;  %v6450_v15 = vadd.f32 %v6449_v38, %v6387_v30  ;;  %v5808_v45 = vadd.f32 %v5724_v43, %v5548_v23 }
 0x4c7   : > { %v6058_v39 = vadd.f32 %v5974_v28, %v5808_v45 }
 0x4c9   : > { %v6126_v21 = vadd.f32 %v9594_v3, %v6058_v39 }
 0x4ca   : > { %v5225_v18 = vpop.f32.mrf.mxu1  ;;  %v5467_v53 = vpop.f32.mrf.mxu2 }
 0x4cb   : > { %v5727_v14 = vpop.f32.mrf.mxu3  ;;  %v7522_v13 = vpack.c.bf16 %v6126_v21, %v6125_v19  ;;  %v6317_v40 = vadd.f32 %v6316_v27, %v6126_v21  ;;  %v6388_v8 = vmul.f32 %v6126_v21, %v6126_v21  ;;  %v5549_v52 = vadd.f32 %v5467_v53, %v5305_v46 }
 0x4cc   : > { %v5306_v2 = vadd.f32 %v5225_v18, %v10272_v34 }
 0x4cd   : > { %v5977_v10 = vpop.f32.mrf.mxu0  ;;  %7578 = vst [vmem:[%s9370_s22 + $0xc8] sm:$0xff] %v7522_v13   ;;  %v6451_v25 = vadd.f32 %v6450_v15, %v6388_v8  ;;  %v5809_v42 = vadd.f32 %v5727_v14, %v5549_v52 }
 0x4cf   : > { %v6059_v9 = vadd.f32 %v5977_v10, %v5809_v42 }
 0x4d1   : > { %v6127_v5 = vadd.f32 %v9594_v3, %v6059_v9 }
 0x4d2   : > { %v5228_v22 = vpop.f32.mrf.mxu1  ;;  %v5469_v0 = vpop.f32.mrf.mxu2 }
 0x4d3   : > { %v5729_v11 = vpop.f32.mrf.mxu3  ;;  %v6318_v20 = vadd.f32 %v6317_v40, %v6127_v5  ;;  %v6389_v61 = vmul.f32 %v6127_v5, %v6127_v5  ;;  %v5550_v24 = vadd.f32 %v5469_v0, %v5306_v2  ;;  %v5307_v47 = vadd.f32 %v5228_v22, %v10273_v12 }
 0x4d5   : > { %v5979_v26 = vpop.f32.mrf.mxu0  ;;  %v6452_v51 = vadd.f32 %v6451_v25, %v6389_v61  ;;  %v5810_v58 = vadd.f32 %v5729_v11, %v5550_v24 }
 0x4d7   : > { %v6060_v49 = vadd.f32 %v5979_v26, %v5810_v58 }
 0x4d9   : > { %v6128_v17 = vadd.f32 %v9594_v3, %v6060_v49 }
 0x4da   : > { %v5230_v60 = vpop.f32.mrf.mxu1  ;;  %v5472_v63 = vpop.f32.mrf.mxu2 }
 0x4db   : > { %v5732_v54 = vpop.f32.mrf.mxu3  ;;  %v7527_v6 = vpack.c.bf16 %v6128_v17, %v6127_v5  ;;  %v6319_v50 = vadd.f32 %v6318_v20, %v6128_v17  ;;  %v6390_v44 = vmul.f32 %v6128_v17, %v6128_v17  ;;  %v5551_v35 = vadd.f32 %v5472_v63, %v5307_v47 }
 0x4dc   : > { %v5308_v29 = vadd.f32 %v5230_v60, %v9289_v55 }
 0x4dd   : > { %v5982_v36 = vpop.f32.mrf.mxu0  ;;  %7579 = vst [vmem:[%s9370_s22 + $0xd0] sm:$0xff] %v7527_v6   ;;  %v6453_v38 = vadd.f32 %v6452_v51, %v6390_v44  ;;  %v5811_v1 = vadd.f32 %v5732_v54, %v5551_v35 }
 0x4df   : > { %v6061_v37 = vadd.f32 %v5982_v36, %v5811_v1 }
 0x4e1   : > { %v6129_v19 = vadd.f32 %v9594_v3, %v6061_v37 }
 0x4e2   : > { %v5233_v48 = vpop.f32.mrf.mxu1  ;;  %v5474_v41 = vpop.f32.mrf.mxu2 }
 0x4e3   : > { %v5734_v57 = vpop.f32.mrf.mxu3  ;;  %v6320_v43 = vadd.f32 %v6319_v50, %v6129_v19  ;;  %v6391_v27 = vmul.f32 %v6129_v19, %v6129_v19  ;;  %v5552_v30 = vadd.f32 %v5474_v41, %v5308_v29  ;;  %v5309_v21 = vadd.f32 %v5233_v48, %v9294_v4 }
 0x4e5   : > { %v5984_v23 = vpop.f32.mrf.mxu0  ;;  %v6454_v28 = vadd.f32 %v6453_v38, %v6391_v27  ;;  %v5812_v15 = vadd.f32 %v5734_v57, %v5552_v30 }
 0x4e7   : > { %v6062_v45 = vadd.f32 %v5984_v23, %v5812_v15 }
 0x4e9   : > { %v6130_v39 = vadd.f32 %v9594_v3, %v6062_v45 }
 0x4ea   : > { %v5235_v33 = vpop.f32.mrf.mxu1  ;;  %v5477_v46 = vpop.f32.mrf.mxu2 }
 0x4eb   : > { %v5737_v18 = vpop.f32.mrf.mxu3  ;;  %v7532_v53 = vpack.c.bf16 %v6130_v39, %v6129_v19  ;;  %v6321_v55 = vadd.f32 %v6320_v43, %v6130_v39  ;;  %v6392_v14 = vmul.f32 %v6130_v39, %v6130_v39  ;;  %v5553_v13 = vadd.f32 %v5477_v46, %v5309_v21 }
 0x4ec   : > { %v5310_v42 = vadd.f32 %v5235_v33, %v9303_v32 }
 0x4ed   : > { %v5987_v40 = vpop.f32.mrf.mxu0  ;;  %7580 = vst [vmem:[%s9370_s22 + $0xd8] sm:$0xff] %v7532_v53   ;;  %v6455_v8 = vadd.f32 %v6454_v28, %v6392_v14  ;;  %v5813_v52 = vadd.f32 %v5737_v18, %v5553_v13 }
 0x4ef   : > { %v6063_v10 = vadd.f32 %v5987_v40, %v5813_v52 }
 0x4f1   : > { %v6131_v25 = vadd.f32 %v9594_v3, %v6063_v10 }
 0x4f2   : > { %v5238_v9 = vpop.f32.mrf.mxu1  ;;  %v5479_v5 = vpop.f32.mrf.mxu2 }
 0x4f3   : > { %v5739_v34 = vpop.f32.mrf.mxu3  ;;  %v6322_v4 = vadd.f32 %v6321_v55, %v6131_v25  ;;  %v6393_v2 = vmul.f32 %v6131_v25, %v6131_v25  ;;  %v5554_v22 = vadd.f32 %v5479_v5, %v5310_v42  ;;  %v5311_v26 = vadd.f32 %v5238_v9, %v9308_v62 }
 0x4f5   : > { %v5989_v0 = vpop.f32.mrf.mxu0  ;;  %v6456_v11 = vadd.f32 %v6455_v8, %v6393_v2  ;;  %v5814_v20 = vadd.f32 %v5739_v34, %v5554_v22 }
 0x4f7   : > { %v6064_v61 = vadd.f32 %v5989_v0, %v5814_v20 }
 0x4f9   : > { %v6132_v24 = vadd.f32 %v9594_v3, %v6064_v61 }
 0x4fa   : > { %v5240_v51 = vpop.f32.mrf.mxu1  ;;  %v5482_v58 = vpop.f32.mrf.mxu2 }
 0x4fb   : > { %v5742_v49 = vpop.f32.mrf.mxu3  ;;  %v7537_v17 = vpack.c.bf16 %v6132_v24, %v6131_v25  ;;  %v6323_v32 = vadd.f32 %v6322_v4, %v6132_v24  ;;  %v6394_v12 = vmul.f32 %v6132_v24, %v6132_v24  ;;  %v5555_v47 = vadd.f32 %v5482_v58, %v5311_v26 }
 0x4fc   : > { %v5312_v44 = vadd.f32 %v5240_v51, %v9317_v31 }
 0x4fd   : > { %v5992_v60 = vpop.f32.mrf.mxu0  ;;  %7581 = vst [vmem:[%s9370_s22 + $0xe0] sm:$0xff] %v7537_v17   ;;  %v6457_v63 = vadd.f32 %v6456_v11, %v6394_v12  ;;  %v5815_v54 = vadd.f32 %v5742_v49, %v5555_v47 }
 0x4ff   : > { %v6065_v6 = vadd.f32 %v5992_v60, %v5815_v54 }
 0x501   : > { %v6133_v50 = vadd.f32 %v9594_v3, %v6065_v6 }
 0x502   : > { %v5243_v35 = vpop.f32.mrf.mxu1  ;;  %v5484_v36 = vpop.f32.mrf.mxu2 }
 0x503   : > { %v5744_v38 = vpop.f32.mrf.mxu3  ;;  %v6324_v62 = vadd.f32 %v6323_v32, %v6133_v50  ;;  %v6395_v1 = vmul.f32 %v6133_v50, %v6133_v50  ;;  %v5556_v37 = vadd.f32 %v5484_v36, %v5312_v44  ;;  %v5313_v43 = vadd.f32 %v5243_v35, %v9322_v59 }
 0x505   : > { %v5994_v19 = vpop.f32.mrf.mxu0  ;;  %v6458_v29 = vadd.f32 %v6457_v63, %v6395_v1  ;;  %v5816_v48 = vadd.f32 %v5744_v38, %v5556_v37 }
 0x507   : > { %v6066_v41 = vadd.f32 %v5994_v19, %v5816_v48 }
 0x509   : > { %v6134_v57 = vadd.f32 %v9594_v3, %v6066_v41 }
 0x50a   : > { %v5245_v27 = vpop.f32.mrf.mxu1  ;;  %v5487_v30 = vpop.f32.mrf.mxu2 }
 0x50b   : > { %v5747_v23 = vpop.f32.mrf.mxu3  ;;  %v7542_v28 = vpack.c.bf16 %v6134_v57, %v6133_v50  ;;  %v6325_v31 = vadd.f32 %v6324_v62, %v6134_v57  ;;  %v6396_v15 = vmul.f32 %v6134_v57, %v6134_v57  ;;  %v5557_v45 = vadd.f32 %v5487_v30, %v5313_v43 }
 0x50c   : > { %v5314_v53 = vadd.f32 %v5245_v27, %v9331_v16 }
 0x50d   : > { %v5997_v39 = vpop.f32.mrf.mxu0  ;;  %7582 = vst [vmem:[%s9370_s22 + $0xe8] sm:$0xff] %v7542_v28   ;;  %v6459_v21 = vadd.f32 %v6458_v29, %v6396_v15  ;;  %v5817_v33 = vadd.f32 %v5747_v23, %v5557_v45 }
 0x50f   : > { %v6067_v46 = vadd.f32 %v5997_v39, %v5817_v33 }
 0x511   : > { %v6135_v18 = vadd.f32 %v9594_v3, %v6067_v46 }
 0x512   : > { %v5489_v55 = vpop.f32.mrf.mxu2  ;;  %v5248_v52 = vpop.f32.mrf.mxu1 }
 0x513   : > { %v5749_v14 = vpop.f32.mrf.mxu3  ;;  %v6326_v13 = vadd.f32 %v6325_v31, %v6135_v18  ;;  %v6397_v59 = vmul.f32 %v6135_v18, %v6135_v18  ;;  %v5558_v40 = vadd.f32 %v5489_v55, %v5314_v53  ;;  %v5315_v5 = vadd.f32 %v5248_v52, %v9336_v56 }
 0x515   : > { %v5999_v8 = vpop.f32.mrf.mxu0  ;;  %v6460_v10 = vadd.f32 %v6459_v21, %v6397_v59  ;;  %v5818_v25 = vadd.f32 %v5749_v14, %v5558_v40 }
 0x517   : > { %v6068_v42 = vadd.f32 %v5999_v8, %v5818_v25 }
 0x519   : > { %v6136_v9 = vadd.f32 %v9594_v3, %v6068_v42 }
 0x51a   : > { %v5492_v34 = vpop.f32.mrf.mxu2  ;;  %v5250_v24 = vpop.f32.mrf.mxu1 }
 0x51b   : > { %v5752_v4 = vpop.f32.mrf.mxu3  ;;  %v7547_v2 = vpack.c.bf16 %v6136_v9, %v6135_v18  ;;  %v6327_v22 = vadd.f32 %v6326_v13, %v6136_v9  ;;  %v6398_v16 = vmul.f32 %v6136_v9, %v6136_v9  ;;  %v5559_v0 = vadd.f32 %v5492_v34, %v5315_v5 }
 0x51c   : > { %v5316_v58 = vadd.f32 %v5250_v24, %v9346_v7 }
 0x51d   : > { %v6002_v11 = vpop.f32.mrf.mxu0  ;;  %7583 = vst [vmem:[%s9370_s22 + $0xf0] sm:$0xff] %v7547_v2   ;;  %v6461_v20 = vadd.f32 %v6460_v10, %v6398_v16  ;;  %v5819_v61 = vadd.f32 %v5752_v4, %v5559_v0 }
 0x51f   : > { %v6069_v26 = vadd.f32 %v6002_v11, %v5819_v61 }
 0x521   : > { %v6137_v51 = vadd.f32 %v9594_v3, %v6069_v26 }
 0x522   : > { %v5494_v49 = vpop.f32.mrf.mxu2 }
 0x523   : > { %v6328_v17 = vadd.f32 %v6327_v22, %v6137_v51  ;;  %v6399_v56 = vmul.f32 %v6137_v51, %v6137_v51  ;;  %v5560_v32 = vadd.f32 %v5494_v49, %v5316_v58  ;;  %v5754_v12 = vpop.f32.mrf.mxu3 }
 0x525   : > { %v6462_v47 = vadd.f32 %v6461_v20, %v6399_v56  ;;  %v5820_v60 = vadd.f32 %v5754_v12, %v5560_v32  ;;  %v6004_v63 = vpop.f32.mrf.mxu0 }
 0x527   : > { %v6070_v54 = vadd.f32 %v6004_v63, %v5820_v60 }
 0x529   : > { %v6138_v6 = vadd.f32 %v9594_v3, %v6070_v54 }
 0x52b   : > { %v7552_v50 = vpack.c.bf16 %v6138_v6, %v6137_v51  ;;  %v6329_v44 = vadd.f32 %v6328_v17, %v6138_v6  ;;  %v6400_v35 = vmul.f32 %v6138_v6, %v6138_v6 }
 0x52d   : > { %7584 = vst [vmem:[%s9370_s22 + $0xf8] sm:$0xff] %v7552_v50   ;;  %v6330_v36 = vrot.slane %v6329_v44, 4  ;;  %v6463_v38 = vadd.f32 %v6462_v47, %v6400_v35 }
 0x52f   : > { %v6331_v7 = vadd.f32 %v6330_v36, %v6329_v44  ;;  %v6464_v62 = vrot.slane %v6463_v38, 4 }
 0x531   : > { %v6332_v1 = vrot.slane %v6331_v7, 2  ;;  %v6465_v37 = vadd.f32 %v6464_v62, %v6463_v38 }
 0x533   : > { %v6333_v19 = vadd.f32 %v6332_v1, %v6331_v7  ;;  %v6466_v29 = vrot.slane %v6465_v37, 2 }
 0x535   : > { %v6334_v48 = vrot.slane %v6333_v19, 1  ;;  %v6467_v41 = vadd.f32 %v6466_v29, %v6465_v37 }
 0x537   : > { %v6335_v3 = vadd.f32 %v6334_v48, %v6333_v19  ;;  %v6468_v57 = vrot.slane %v6467_v41, 1 }
 0x539   : > { %6336 = vst [vmem:[%s479_s13] sm:$0x1] %v6335_v3  ;;  %v6469_v43 = vadd.f32 %v6468_v57, %v6467_v41 }
 0x53b   : > { %6470 = vst [vmem:[%s489_s16] sm:$0x1] %v6469_v43 }
 0x53c PF: > { %s18_s28 = sadd.s32 1, %s7670_s28   ;;  %s10274_s24 = smov %s7662_s26 }
 0x53d   : > { %p15_p9 = scmp.ge.s32.totalorder %s18_s28, 6   ;;  %s10275_s25 = smov %s7666_s27 }
 0x53e   : > { %s10276_s26 = smov %s10279_s29  ;;  %s10277_s27 = smov %s10283_s30 }
 0x53f   :  { %17 = sbr.rel (!%p15_p9) target bundleno = 3 (0x3), region = 114 }

</bundles_post_ra>
